<compile_context>
chip_gen: v7x
topology: tpu7x:2x2x1
jax: 0.10.0
libtpu: 0.0.40
codegen_flags: <defaults>
</compile_context>

<pallas_src>
import functools

import jax
import jax.numpy as jnp
from jax.experimental import pallas as pl
from jax.experimental.pallas import tpu as pltpu


def _round_up(n, m):
  return ((n + m - 1) // m) * m


def _cdiv(a, b):
  return -(-a // b)


# ---------------------------------------------------------------------------
# Kernel
# ---------------------------------------------------------------------------
def _vae_kernel(
    x_ref, eps_ref,
    w1, b1, w2, b2, w3, b3, w4, b4,      # encoder (w4/b4 = fused fc41|fc42)
    w5, b5, w6, b6, w7, b7, w8, b8,      # decoder
    recon_ref, lat_ref,
    *, act_dtype,
):
  """One batch tile of the full encode -> reparameterize -> decode pass."""

  def mm(h, w_ref):
    # bf16 operands on the MXU, f32 accumulation.
    return jnp.dot(h.astype(jnp.bfloat16), w_ref[...],
                   preferred_element_type=jnp.float32)

  def hidden(h, w_ref, b_ref):
    # Bias add + ReLU in act_dtype: bf16 on v6e/v7x halves the VALU bundles
    # on the wide activations; f32 on v5e (no bf16 VPU there).
    y = mm(h, w_ref).astype(act_dtype) + b_ref[...]
    return jnp.maximum(y, 0.0)

  x = x_ref[...]

  # ---- encode ----
  h1 = hidden(x, w1, b1)
  h2 = hidden(h1, w2, b2)
  h3 = hidden(h2, w3, b3)
  latent = mm(h3, w4) + b4[...]            # f32 (tile_b, 4) = [mu | logvar]
  mu = latent[:, 0:2]
  logvar = latent[:, 2:4]

  # ---- reparameterize (f32) ----
  std = jnp.exp(0.5 * logvar)
  z = mu + eps_ref[...] * std

  # ---- decode ----
  # fc5 has K=2: far too short for the MXU, do it on the VPU as two broadcast
  # multiply-adds (w5/b5 kept in f32).
  w5v = w5[...]
  h5 = jnp.maximum(
      z[:, 0:1] * w5v[0:1, :] + z[:, 1:2] * w5v[1:2, :] + b5[...], 0.0)
  h6 = hidden(h5, w6, b6)
  h7 = hidden(h6, w7, b7)
  logits = mm(h7, w8) + b8[...]            # f32 pre-sigmoid logits
  # sigmoid = 1 / (1 + exp(-v)): exp and the approx reciprocal both run on the
  # EUP slot, keeping the (tile_b x dim) divide off the VALU.
  recon = pl.reciprocal(1.0 + jnp.exp(-logits), approx=True)

  recon_ref[...] = recon
  # Pack the tiny latent outputs into one lane-aligned 8-wide slab:
  # [mu(2) | logvar(2) | z(2) | pad(2)].
  lat_ref[...] = jnp.concatenate([mu, logvar, z, jnp.zeros_like(z)], axis=1)


# ---------------------------------------------------------------------------
# Parameter packing / per-chip configuration
# ---------------------------------------------------------------------------
def _prepare_kernel_params(params, act_dtype):
  """18-tuple (w1,b1,...,w8,b8), weights [in,out] f32 -> kernel 16-tuple.

  fc41/fc42 fused into a single (32, 4) head; matmul weights cast to bf16;
  wide-layer biases cast to act_dtype (bf16 on v6e/v7x); head/fc5/fc8 biases
  and the K=2 decoder weight (VPU path) stay f32."""
  (w1, b1, w2, b2, w3, b3, w41, b41, w42, b42,
   w5, b5, w6, b6, w7, b7, w8, b8) = params
  w4 = jnp.concatenate([w41, w42], axis=1)      # (32, 4)
  b4 = jnp.concatenate([b41, b42], axis=1)      # (1, 4)
  bf = lambda w: w.astype(jnp.bfloat16)
  act = lambda v: v.astype(act_dtype)
  return (bf(w1), act(b1), bf(w2), act(b2), bf(w3), act(b3), bf(w4), b4,
          w5, b5, bf(w6), act(b6), bf(w7), act(b7), bf(w8), b8)


def _chip_config():
  """Per-generation knobs: (use_bf16_elementwise, is_v7x, vmem_limit_bytes)."""
  try:
    kind = jax.devices()[0].device_kind.lower()
  except Exception:
    kind = ""
  is_v7 = ("v7" in kind) or ("tpu7" in kind)
  is_v6 = "v6" in kind
  # bf16 VPU/EUP only exists on v6e/v7x; keep elementwise math in f32 elsewhere.
  use_bf16 = is_v6 or is_v7
  # v7x has 64 MiB VMEM per TensorCore -> stay <= ~48 MB; 64 MB on v5e/v6e.
  vmem_limit = (48 if is_v7 else 64) * 1024 * 1024
  return use_bf16, is_v7, vmem_limit


def _choose_tiling(b, is_v7):
  """Divisor-aware batch tiling (avoids near-2x padding) + megacore split."""
  max_tile = 1024 if is_v7 else 2048
  n_tiles = max(1, _cdiv(b, max_tile))
  if is_v7:
    # 2 TensorCores per chip: the "parallel" grid axis only uses both if
    # there are >= 2 (ideally an even number of) grid steps.
    if n_tiles == 1 and b >= 16:
      n_tiles = 2
    elif n_tiles > 1 and n_tiles % 2 == 1:
      n_tiles += 1
  tile_b = _round_up(_cdiv(b, n_tiles), 8)   # sublane-aligned
  return tile_b, n_tiles * tile_b


# ---------------------------------------------------------------------------
# pallas_call wrapper
# ---------------------------------------------------------------------------
@functools.partial(
    jax.jit,
    static_argnames=("dim", "tile_b", "padded_b", "use_bf16",
                     "vmem_limit", "single_buffer_weights"))
def _vae2d_impl(x, eps, params, *, dim, tile_b, padded_b, use_bf16,
                vmem_limit, single_buffer_weights):
  x2d = x.reshape(-1, dim).astype(jnp.float32)
  eps = eps.astype(jnp.float32)
  b = x2d.shape[0]
  if padded_b != b:
    x2d = jnp.pad(x2d, ((0, padded_b - b), (0, 0)))
    eps = jnp.pad(eps, ((0, padded_b - b), (0, 0)))
  grid = (padded_b // tile_b,)

  act_dtype = jnp.bfloat16 if use_bf16 else jnp.float32
  kparams = _prepare_kernel_params(params, act_dtype)

  in_specs = [
      pl.BlockSpec((tile_b, dim), lambda i: (i, 0)),   # x
      pl.BlockSpec((tile_b, 2), lambda i: (i, 0)),     # eps
  ]
  # Weights/biases: full-shape blocks, constant index_map -> DMA'd once and
  # VMEM-resident across all batch tiles; single-buffered (no point keeping a
  # second pipeline buffer for a block that never changes).
  if single_buffer_weights:
    def wspec(shape):
      return pl.BlockSpec(shape, lambda i: (0, 0),
                          pipeline_mode=pl.Buffered(1))
  else:
    def wspec(shape):
      return pl.BlockSpec(shape, lambda i: (0, 0))
  in_specs += [wspec(p.shape) for p in kparams]

  out_specs = (
      pl.BlockSpec((tile_b, dim), lambda i: (i, 0)),   # recon
      pl.BlockSpec((tile_b, 8), lambda i: (i, 0)),     # packed mu|logvar|z
  )
  out_shapes = (
      jax.ShapeDtypeStruct((padded_b, dim), jnp.float32),
      jax.ShapeDtypeStruct((padded_b, 8), jnp.float32),
  )

  # Advisory cost estimate so XLA can schedule/overlap this kernel.
  flops_per_row = 2 * (dim * 512 + 512 * 128 + 128 * 32 + 32 * 4
                       + 2 * 32 + 32 * 128 + 128 * 512 + 512 * dim)
  weight_bytes = sum(int(p.size) * p.dtype.itemsize for p in kparams)
  io_bytes = padded_b * (dim * 4 + 2 * 4 + dim * 4 + 8 * 4)
  cost = pl.CostEstimate(
      flops=padded_b * flops_per_row,
      transcendentals=padded_b * (2 * dim + 2),
      bytes_accessed=weight_bytes + io_bytes,
  )

  recon_p, lat_p = pl.pallas_call(
      functools.partial(_vae_kernel, act_dtype=act_dtype),
      out_shape=out_shapes,
      grid=grid,
      in_specs=in_specs,
      out_specs=out_specs,
      compiler_params=pltpu.CompilerParams(
          dimension_semantics=("parallel",),
          vmem_limit_bytes=vmem_limit,
      ),
      cost_estimate=cost,
  )(x2d, eps, *kparams)

  recon = recon_p[:b]
  mu = lat_p[:b, 0:2]
  logvar = lat_p[:b, 2:4]
  z = lat_p[:b, 4:6]
  return recon, mu, logvar, z


def vae2d_forward(x, eps, params, *, dim):
  """Pallas VAE2d forward.

  x:      any shape that flattens to (-1, dim)   (e.g. NCHW image batch)
  eps:    (B, 2) standard-normal noise (B = prod(x.shape)//dim)
  params: flat 18-tuple (w1, b1, ..., w8, b8) with weights as [in, out], f32
  Returns (recon, mu, logvar, z), matching torch's (decode(z), mu, logvar, z).
  """
  assert x.size % dim == 0, "input does not flatten to (-1, dim)"
  b = x.size // dim
  assert eps.shape == (b, 2), "eps must match the flattened batch"

  use_bf16, is_v7, vmem_limit = _chip_config()
  tile_b, padded_b = _choose_tiling(b, is_v7)
  kwargs = dict(dim=dim, tile_b=tile_b, padded_b=padded_b, use_bf16=use_bf16,
                vmem_limit=vmem_limit)
  try:
    return _vae2d_impl(x, eps, params, single_buffer_weights=True, **kwargs)
  except Exception:
    # pl.Buffered(1) not supported by this jax/libtpu combo -> fall back to
    # default (double-buffered) resident weights; ~1 MB extra VMEM, same math.
    return _vae2d_impl(x, eps, params, single_buffer_weights=False, **kwargs)


# ---------------------------------------------------------------------------
# Pure-JAX f32 reference + deterministic init + self-test
# ---------------------------------------------------------------------------
def vae2d_reference(x2d, eps, params):
  """f32 (HIGHEST matmul precision) reference used to bound bf16 error."""
  (w1, b1, w2, b2, w3, b3, w41, b41, w42, b42,
   w5, b5, w6, b6, w7, b7, w8, b8) = params
  hp = jax.lax.Precision.HIGHEST
  relu = lambda v: jnp.maximum(v, 0.0)
  dot = lambda a, w: jnp.dot(a, w, precision=hp)
  h1 = relu(dot(x2d, w1) + b1)
  h2 = relu(dot(h1, w2) + b2)
  h3 = relu(dot(h2, w3) + b3)
  mu = dot(h3, w41) + b41
  logvar = dot(h3, w42) + b42
  z = mu + eps * jnp.exp(0.5 * logvar)
  h5 = relu(dot(z, w5) + b5)
  h6 = relu(dot(h5, w6) + b6)
  h7 = relu(dot(h6, w7) + b7)
  recon = jax.nn.sigmoid(dot(h7, w8) + b8)
  return recon, mu, logvar, z


def init_vae2d_params(key, dim):
  """Deterministic init mimicking nn.Linear defaults (uniform +-1/sqrt(fan_in)).

  Weights are stored transposed: [in_features, out_features]."""
  sizes = [
      (dim, 512),  # fc1
      (512, 128),  # fc2
      (128, 32),   # fc3
      (32, 2),     # fc41
      (32, 2),     # fc42
      (2, 32),     # fc5
      (32, 128),   # fc6
      (128, 512),  # fc7
      (512, dim),  # fc8
  ]
  params = []
  for (fan_in, fan_out) in sizes:
    key, kw, kb = jax.random.split(key, 3)
    bound = 1.0 / jnp.sqrt(fan_in)
    w = jax.random.uniform(kw, (fan_in, fan_out), jnp.float32, -bound, bound)
    bvec = jax.random.uniform(kb, (1, fan_out), jnp.float32, -bound, bound)
    params.extend([w, bvec])
  return tuple(params)


if __name__ == "__main__":
  DIM = 256            # 16 * 16 image flattened
  B, C, H, W = 2, 1, 16, 16

  root = jax.random.PRNGKey(0)
  k_x, k_eps, k_p = jax.random.split(root, 3)

  x = jax.random.uniform(k_x, (B, C, H, W), jnp.float32)     # NCHW input
  flat_b = B * C * H * W // DIM
  # TODO(synk): torch.randn_like draws eps internally; here the caller supplies
  # it explicitly (same reparameterization semantics, deterministic).
  eps = jax.random.normal(k_eps, (flat_b, 2), jnp.float32)
  params = init_vae2d_params(k_p, DIM)

  recon, mu, logvar, z = vae2d_forward(x, eps, params, dim=DIM)
  jax.block_until_ready((recon, mu, logvar, z))

  assert recon.shape == (flat_b, DIM)
  assert mu.shape == (flat_b, 2) and logvar.shape == (flat_b, 2)
  assert z.shape == (flat_b, 2)
  assert bool(jnp.all(jnp.isfinite(recon)))
  assert bool(jnp.all((recon >= 0.0) & (recon <= 1.0)))
  # reparameterization consistency: z == mu + eps * exp(0.5*logvar) (f32 path)
  assert bool(jnp.allclose(z, mu + eps * jnp.exp(0.5 * logvar),
                           rtol=1e-5, atol=1e-5))

  # Validate against the f32 reference (bf16 MXU / approx-sigmoid error budget).
  r_recon, r_mu, r_logvar, r_z = vae2d_reference(x.reshape(-1, DIM), eps, params)
  assert bool(jnp.allclose(mu, r_mu, rtol=0.0, atol=2e-2))
  assert bool(jnp.allclose(logvar, r_logvar, rtol=0.0, atol=2e-2))
  assert bool(jnp.allclose(z, r_z, rtol=0.0, atol=2e-2))
  assert bool(jnp.allclose(recon, r_recon, rtol=0.0, atol=2e-2))

  print("KERNEL_OK")
</pallas_src>

<mosaic_0001>
module attributes {stable_mosaic.version = 11 : i64} {
  func.func @_vae_kernel(%arg0: i32, %arg1: memref<8x256xf32, #tpu.memory_space<vmem>>, %arg2: memref<8x2xf32, #tpu.memory_space<vmem>>, %arg3: memref<256x512xbf16, #tpu.memory_space<vmem>>, %arg4: memref<1x512xf32, #tpu.memory_space<vmem>>, %arg5: memref<512x128xbf16, #tpu.memory_space<vmem>>, %arg6: memref<1x128xf32, #tpu.memory_space<vmem>>, %arg7: memref<128x32xbf16, #tpu.memory_space<vmem>>, %arg8: memref<1x32xf32, #tpu.memory_space<vmem>>, %arg9: memref<32x4xbf16, #tpu.memory_space<vmem>>, %arg10: memref<1x4xf32, #tpu.memory_space<vmem>>, %arg11: memref<2x32xf32, #tpu.memory_space<vmem>>, %arg12: memref<1x32xf32, #tpu.memory_space<vmem>>, %arg13: memref<32x128xbf16, #tpu.memory_space<vmem>>, %arg14: memref<1x128xf32, #tpu.memory_space<vmem>>, %arg15: memref<128x512xbf16, #tpu.memory_space<vmem>>, %arg16: memref<1x512xf32, #tpu.memory_space<vmem>>, %arg17: memref<512x256xbf16, #tpu.memory_space<vmem>>, %arg18: memref<1x256xf32, #tpu.memory_space<vmem>>, %arg19: memref<8x256xf32, #tpu.memory_space<vmem>>, %arg20: memref<8x8xf32, #tpu.memory_space<vmem>>) attributes {dimension_semantics = [#tpu.dimension_semantics<parallel>], iteration_bounds = array<i64: 1>, scalar_prefetch = 0 : i64, scratch_operands = 0 : i64, tpu.core_type = #tpu.core_type<tc>, window_params = [{transform_indices = @transform_0, window_bounds = array<i64: 8, 256>}, {transform_indices = @transform_1, window_bounds = array<i64: 8, 2>}, {pipeline_mode = #tpu.pipeline_mode<synchronous>, transform_indices = @transform_2, window_bounds = array<i64: 256, 512>}, {pipeline_mode = #tpu.pipeline_mode<synchronous>, transform_indices = @transform_3, window_bounds = array<i64: 1, 512>}, {pipeline_mode = #tpu.pipeline_mode<synchronous>, transform_indices = @transform_4, window_bounds = array<i64: 512, 128>}, {pipeline_mode = #tpu.pipeline_mode<synchronous>, transform_indices = @transform_5, window_bounds = array<i64: 1, 128>}, {pipeline_mode = #tpu.pipeline_mode<synchronous>, transform_indices = @transform_6, window_bounds = array<i64: 128, 32>}, {pipeline_mode = #tpu.pipeline_mode<synchronous>, transform_indices = @transform_7, window_bounds = array<i64: 1, 32>}, {pipeline_mode = #tpu.pipeline_mode<synchronous>, transform_indices = @transform_8, window_bounds = array<i64: 32, 4>}, {pipeline_mode = #tpu.pipeline_mode<synchronous>, transform_indices = @transform_9, window_bounds = array<i64: 1, 4>}, {pipeline_mode = #tpu.pipeline_mode<synchronous>, transform_indices = @transform_10, window_bounds = array<i64: 2, 32>}, {pipeline_mode = #tpu.pipeline_mode<synchronous>, transform_indices = @transform_11, window_bounds = array<i64: 1, 32>}, {pipeline_mode = #tpu.pipeline_mode<synchronous>, transform_indices = @transform_12, window_bounds = array<i64: 32, 128>}, {pipeline_mode = #tpu.pipeline_mode<synchronous>, transform_indices = @transform_13, window_bounds = array<i64: 1, 128>}, {pipeline_mode = #tpu.pipeline_mode<synchronous>, transform_indices = @transform_14, window_bounds = array<i64: 128, 512>}, {pipeline_mode = #tpu.pipeline_mode<synchronous>, transform_indices = @transform_15, window_bounds = array<i64: 1, 512>}, {pipeline_mode = #tpu.pipeline_mode<synchronous>, transform_indices = @transform_16, window_bounds = array<i64: 512, 256>}, {pipeline_mode = #tpu.pipeline_mode<synchronous>, transform_indices = @transform_17, window_bounds = array<i64: 1, 256>}, {transform_indices = @transform_18, window_bounds = array<i64: 8, 256>}, {transform_indices = @transform_19, window_bounds = array<i64: 8, 8>}]} {
    %c0 = arith.constant 0 : index
    %c0_0 = arith.constant 0 : index
    %0 = vector.load %arg1[%c0, %c0_0] : memref<8x256xf32, #tpu.memory_space<vmem>>, vector<8x256xf32>
    %1 = arith.truncf %0 : vector<8x256xf32> to vector<8x256xbf16>
    %c0_1 = arith.constant 0 : index
    %c0_2 = arith.constant 0 : index
    %2 = vector.load %arg3[%c0_1, %c0_2] : memref<256x512xbf16, #tpu.memory_space<vmem>>, vector<256x512xbf16>
    %cst = arith.constant dense<0.000000e+00> : vector<8x512xf32>
    %3 = tpu.matmul %1, %2, %cst {dimension_numbers = #tpu.dot_dimension_numbers<[1], [0], [0], [1], [0, 0, 1, 1], [], []>} : vector<8x256xbf16>, vector<256x512xbf16>, vector<8x512xf32> -> vector<8x512xf32>
    %c0_3 = arith.constant 0 : index
    %c0_4 = arith.constant 0 : index
    %4 = vector.load %arg4[%c0_3, %c0_4] : memref<1x512xf32, #tpu.memory_space<vmem>>, vector<1x512xf32>
    %5 = vector.broadcast %4 : vector<1x512xf32> to vector<8x512xf32>
    %6 = arith.addf %3, %5 : vector<8x512xf32>
    %cst_5 = arith.constant 0.000000e+00 : f32
    %7 = vector.broadcast %cst_5 : f32 to vector<8x512xf32>
    %8 = arith.maximumf %6, %7 : vector<8x512xf32>
    %9 = arith.truncf %8 : vector<8x512xf32> to vector<8x512xbf16>
    %c0_6 = arith.constant 0 : index
    %c0_7 = arith.constant 0 : index
    %10 = vector.load %arg5[%c0_6, %c0_7] : memref<512x128xbf16, #tpu.memory_space<vmem>>, vector<512x128xbf16>
    %cst_8 = arith.constant dense<0.000000e+00> : vector<8x128xf32>
    %11 = tpu.matmul %9, %10, %cst_8 {dimension_numbers = #tpu.dot_dimension_numbers<[1], [0], [0], [1], [0, 0, 1, 1], [], []>} : vector<8x512xbf16>, vector<512x128xbf16>, vector<8x128xf32> -> vector<8x128xf32>
    %c0_9 = arith.constant 0 : index
    %c0_10 = arith.constant 0 : index
    %12 = vector.load %arg6[%c0_9, %c0_10] : memref<1x128xf32, #tpu.memory_space<vmem>>, vector<1x128xf32>
    %13 = vector.broadcast %12 : vector<1x128xf32> to vector<8x128xf32>
    %14 = arith.addf %11, %13 : vector<8x128xf32>
    %cst_11 = arith.constant 0.000000e+00 : f32
    %15 = vector.broadcast %cst_11 : f32 to vector<8x128xf32>
    %16 = arith.maximumf %14, %15 : vector<8x128xf32>
    %17 = arith.truncf %16 : vector<8x128xf32> to vector<8x128xbf16>
    %c0_12 = arith.constant 0 : index
    %c0_13 = arith.constant 0 : index
    %18 = vector.load %arg7[%c0_12, %c0_13] : memref<128x32xbf16, #tpu.memory_space<vmem>>, vector<128x32xbf16>
    %cst_14 = arith.constant dense<0.000000e+00> : vector<8x32xf32>
    %19 = tpu.matmul %17, %18, %cst_14 {dimension_numbers = #tpu.dot_dimension_numbers<[1], [0], [0], [1], [0, 0, 1, 1], [], []>} : vector<8x128xbf16>, vector<128x32xbf16>, vector<8x32xf32> -> vector<8x32xf32>
    %c0_15 = arith.constant 0 : index
    %c0_16 = arith.constant 0 : index
    %20 = vector.load %arg8[%c0_15, %c0_16] : memref<1x32xf32, #tpu.memory_space<vmem>>, vector<1x32xf32>
    %21 = vector.broadcast %20 : vector<1x32xf32> to vector<8x32xf32>
    %22 = arith.addf %19, %21 : vector<8x32xf32>
    %cst_17 = arith.constant 0.000000e+00 : f32
    %23 = vector.broadcast %cst_17 : f32 to vector<8x32xf32>
    %24 = arith.maximumf %22, %23 : vector<8x32xf32>
    %25 = arith.truncf %24 : vector<8x32xf32> to vector<8x32xbf16>
    %c0_18 = arith.constant 0 : index
    %c0_19 = arith.constant 0 : index
    %26 = vector.load %arg9[%c0_18, %c0_19] : memref<32x4xbf16, #tpu.memory_space<vmem>>, vector<32x4xbf16>
    %cst_20 = arith.constant dense<0.000000e+00> : vector<8x4xf32>
    %27 = tpu.matmul %25, %26, %cst_20 {dimension_numbers = #tpu.dot_dimension_numbers<[1], [0], [0], [1], [0, 0, 1, 1], [], []>} : vector<8x32xbf16>, vector<32x4xbf16>, vector<8x4xf32> -> vector<8x4xf32>
    %c0_21 = arith.constant 0 : index
    %c0_22 = arith.constant 0 : index
    %28 = vector.load %arg10[%c0_21, %c0_22] : memref<1x4xf32, #tpu.memory_space<vmem>>, vector<1x4xf32>
    %29 = vector.broadcast %28 : vector<1x4xf32> to vector<8x4xf32>
    %30 = arith.addf %27, %29 : vector<8x4xf32>
    %31 = vector.extract_strided_slice %30 {offsets = [0, 0], sizes = [8, 2], strides = [1, 1]} : vector<8x4xf32> to vector<8x2xf32>
    %32 = vector.extract_strided_slice %30 {offsets = [0, 2], sizes = [8, 2], strides = [1, 1]} : vector<8x4xf32> to vector<8x2xf32>
    %cst_23 = arith.constant 5.000000e-01 : f32
    %33 = vector.broadcast %cst_23 : f32 to vector<8x2xf32>
    %34 = arith.mulf %33, %32 : vector<8x2xf32>
    %35 = math.exp %34 : vector<8x2xf32>
    %c0_24 = arith.constant 0 : index
    %c0_25 = arith.constant 0 : index
    %36 = vector.load %arg2[%c0_24, %c0_25] : memref<8x2xf32, #tpu.memory_space<vmem>>, vector<8x2xf32>
    %37 = arith.mulf %36, %35 : vector<8x2xf32>
    %38 = arith.addf %31, %37 : vector<8x2xf32>
    %c0_26 = arith.constant 0 : index
    %c0_27 = arith.constant 0 : index
    %39 = vector.load %arg11[%c0_26, %c0_27] : memref<2x32xf32, #tpu.memory_space<vmem>>, vector<2x32xf32>
    %40 = vector.extract_strided_slice %38 {offsets = [0, 0], sizes = [8, 1], strides = [1, 1]} : vector<8x2xf32> to vector<8x1xf32>
    %41 = vector.extract_strided_slice %39 {offsets = [0, 0], sizes = [1, 32], strides = [1, 1]} : vector<2x32xf32> to vector<1x32xf32>
    %42 = vector.broadcast %40 : vector<8x1xf32> to vector<8x32xf32>
    %43 = vector.broadcast %41 : vector<1x32xf32> to vector<8x32xf32>
    %44 = arith.mulf %42, %43 : vector<8x32xf32>
    %45 = vector.extract_strided_slice %38 {offsets = [0, 1], sizes = [8, 1], strides = [1, 1]} : vector<8x2xf32> to vector<8x1xf32>
    %46 = vector.extract_strided_slice %39 {offsets = [1, 0], sizes = [1, 32], strides = [1, 1]} : vector<2x32xf32> to vector<1x32xf32>
    %47 = vector.broadcast %45 : vector<8x1xf32> to vector<8x32xf32>
    %48 = vector.broadcast %46 : vector<1x32xf32> to vector<8x32xf32>
    %49 = arith.mulf %47, %48 : vector<8x32xf32>
    %50 = arith.addf %44, %49 : vector<8x32xf32>
    %c0_28 = arith.constant 0 : index
    %c0_29 = arith.constant 0 : index
    %51 = vector.load %arg12[%c0_28, %c0_29] : memref<1x32xf32, #tpu.memory_space<vmem>>, vector<1x32xf32>
    %52 = vector.broadcast %51 : vector<1x32xf32> to vector<8x32xf32>
    %53 = arith.addf %50, %52 : vector<8x32xf32>
    %cst_30 = arith.constant 0.000000e+00 : f32
    %54 = vector.broadcast %cst_30 : f32 to vector<8x32xf32>
    %55 = arith.maximumf %53, %54 : vector<8x32xf32>
    %56 = arith.truncf %55 : vector<8x32xf32> to vector<8x32xbf16>
    %c0_31 = arith.constant 0 : index
    %c0_32 = arith.constant 0 : index
    %57 = vector.load %arg13[%c0_31, %c0_32] : memref<32x128xbf16, #tpu.memory_space<vmem>>, vector<32x128xbf16>
    %cst_33 = arith.constant dense<0.000000e+00> : vector<8x128xf32>
    %58 = tpu.matmul %56, %57, %cst_33 {dimension_numbers = #tpu.dot_dimension_numbers<[1], [0], [0], [1], [0, 0, 1, 1], [], []>} : vector<8x32xbf16>, vector<32x128xbf16>, vector<8x128xf32> -> vector<8x128xf32>
    %c0_34 = arith.constant 0 : index
    %c0_35 = arith.constant 0 : index
    %59 = vector.load %arg14[%c0_34, %c0_35] : memref<1x128xf32, #tpu.memory_space<vmem>>, vector<1x128xf32>
    %60 = vector.broadcast %59 : vector<1x128xf32> to vector<8x128xf32>
    %61 = arith.addf %58, %60 : vector<8x128xf32>
    %cst_36 = arith.constant 0.000000e+00 : f32
    %62 = vector.broadcast %cst_36 : f32 to vector<8x128xf32>
    %63 = arith.maximumf %61, %62 : vector<8x128xf32>
    %64 = arith.truncf %63 : vector<8x128xf32> to vector<8x128xbf16>
    %c0_37 = arith.constant 0 : index
    %c0_38 = arith.constant 0 : index
    %65 = vector.load %arg15[%c0_37, %c0_38] : memref<128x512xbf16, #tpu.memory_space<vmem>>, vector<128x512xbf16>
    %cst_39 = arith.constant dense<0.000000e+00> : vector<8x512xf32>
    %66 = tpu.matmul %64, %65, %cst_39 {dimension_numbers = #tpu.dot_dimension_numbers<[1], [0], [0], [1], [0, 0, 1, 1], [], []>} : vector<8x128xbf16>, vector<128x512xbf16>, vector<8x512xf32> -> vector<8x512xf32>
    %c0_40 = arith.constant 0 : index
    %c0_41 = arith.constant 0 : index
    %67 = vector.load %arg16[%c0_40, %c0_41] : memref<1x512xf32, #tpu.memory_space<vmem>>, vector<1x512xf32>
    %68 = vector.broadcast %67 : vector<1x512xf32> to vector<8x512xf32>
    %69 = arith.addf %66, %68 : vector<8x512xf32>
    %cst_42 = arith.constant 0.000000e+00 : f32
    %70 = vector.broadcast %cst_42 : f32 to vector<8x512xf32>
    %71 = arith.maximumf %69, %70 : vector<8x512xf32>
    %72 = arith.truncf %71 : vector<8x512xf32> to vector<8x512xbf16>
    %c0_43 = arith.constant 0 : index
    %c0_44 = arith.constant 0 : index
    %73 = vector.load %arg17[%c0_43, %c0_44] : memref<512x256xbf16, #tpu.memory_space<vmem>>, vector<512x256xbf16>
    %cst_45 = arith.constant dense<0.000000e+00> : vector<8x256xf32>
    %74 = tpu.matmul %72, %73, %cst_45 {dimension_numbers = #tpu.dot_dimension_numbers<[1], [0], [0], [1], [0, 0, 1, 1], [], []>} : vector<8x512xbf16>, vector<512x256xbf16>, vector<8x256xf32> -> vector<8x256xf32>
    %c0_46 = arith.constant 0 : index
    %c0_47 = arith.constant 0 : index
    %75 = vector.load %arg18[%c0_46, %c0_47] : memref<1x256xf32, #tpu.memory_space<vmem>>, vector<1x256xf32>
    %76 = vector.broadcast %75 : vector<1x256xf32> to vector<8x256xf32>
    %77 = arith.addf %74, %76 : vector<8x256xf32>
    %cst_48 = arith.constant 0.000000e+00 : f32
    %78 = vector.broadcast %cst_48 : f32 to vector<8x256xf32>
    %79 = arith.subf %78, %77 : vector<8x256xf32>
    %80 = math.exp %79 : vector<8x256xf32>
    %cst_49 = arith.constant 1.000000e+00 : f32
    %81 = vector.broadcast %cst_49 : f32 to vector<8x256xf32>
    %82 = arith.addf %81, %80 : vector<8x256xf32>
    %83 = tpu.reciprocal %82 {approx = true} : vector<8x256xf32> -> vector<8x256xf32>
    %c0_50 = arith.constant 0 : index
    %c0_51 = arith.constant 0 : index
    %84 = vector.load %arg19[%c0_50, %c0_51] : memref<8x256xf32, #tpu.memory_space<vmem>>, vector<8x256xf32>
    tpu.vector_store %arg19[%c0_50, %c0_51], %83 {strides = array<i32>} : memref<8x256xf32, #tpu.memory_space<vmem>>, vector<8x256xf32>,
    %cst_52 = arith.constant 0.000000e+00 : f32
    %85 = vector.broadcast %cst_52 : f32 to vector<8x2xf32>
    %86 = tpu.concatenate %31, %32, %38, %85 in 1 : vector<8x2xf32>, vector<8x2xf32>, vector<8x2xf32>, vector<8x2xf32> -> vector<8x8xf32>
    %c0_53 = arith.constant 0 : index
    %c0_54 = arith.constant 0 : index
    %87 = vector.load %arg20[%c0_53, %c0_54] : memref<8x8xf32, #tpu.memory_space<vmem>>, vector<8x8xf32>
    tpu.vector_store %arg20[%c0_53, %c0_54], %86 {strides = array<i32>} : memref<8x8xf32, #tpu.memory_space<vmem>>, vector<8x8xf32>,
    return
  }
  func.func @transform_0(%arg0: i32) -> (i32, i32) {
    %c0_i32 = arith.constant 0 : i32
    %c0_i32_0 = arith.constant 0 : i32
    return %arg0, %c0_i32 : i32, i32
  }
  func.func @transform_1(%arg0: i32) -> (i32, i32) {
    %c0_i32 = arith.constant 0 : i32
    %c0_i32_0 = arith.constant 0 : i32
    return %arg0, %c0_i32 : i32, i32
  }
  func.func @transform_2(%arg0: i32) -> (i32, i32) {
    %c0_i32 = arith.constant 0 : i32
    %c0_i32_0 = arith.constant 0 : i32
    %c0_i32_1 = arith.constant 0 : i32
    return %c0_i32, %c0_i32_0 : i32, i32
  }
  func.func @transform_3(%arg0: i32) -> (i32, i32) {
    %c0_i32 = arith.constant 0 : i32
    %c0_i32_0 = arith.constant 0 : i32
    %c0_i32_1 = arith.constant 0 : i32
    return %c0_i32, %c0_i32_0 : i32, i32
  }
  func.func @transform_4(%arg0: i32) -> (i32, i32) {
    %c0_i32 = arith.constant 0 : i32
    %c0_i32_0 = arith.constant 0 : i32
    %c0_i32_1 = arith.constant 0 : i32
    return %c0_i32, %c0_i32_0 : i32, i32
  }
  func.func @transform_5(%arg0: i32) -> (i32, i32) {
    %c0_i32 = arith.constant 0 : i32
    %c0_i32_0 = arith.constant 0 : i32
    %c0_i32_1 = arith.constant 0 : i32
    return %c0_i32, %c0_i32_0 : i32, i32
  }
  func.func @transform_6(%arg0: i32) -> (i32, i32) {
    %c0_i32 = arith.constant 0 : i32
    %c0_i32_0 = arith.constant 0 : i32
    %c0_i32_1 = arith.constant 0 : i32
    return %c0_i32, %c0_i32_0 : i32, i32
  }
  func.func @transform_7(%arg0: i32) -> (i32, i32) {
    %c0_i32 = arith.constant 0 : i32
    %c0_i32_0 = arith.constant 0 : i32
    %c0_i32_1 = arith.constant 0 : i32
    return %c0_i32, %c0_i32_0 : i32, i32
  }
  func.func @transform_8(%arg0: i32) -> (i32, i32) {
    %c0_i32 = arith.constant 0 : i32
    %c0_i32_0 = arith.constant 0 : i32
    %c0_i32_1 = arith.constant 0 : i32
    return %c0_i32, %c0_i32_0 : i32, i32
  }
  func.func @transform_9(%arg0: i32) -> (i32, i32) {
    %c0_i32 = arith.constant 0 : i32
    %c0_i32_0 = arith.constant 0 : i32
    %c0_i32_1 = arith.constant 0 : i32
    return %c0_i32, %c0_i32_0 : i32, i32
  }
  func.func @transform_10(%arg0: i32) -> (i32, i32) {
    %c0_i32 = arith.constant 0 : i32
    %c0_i32_0 = arith.constant 0 : i32
    %c0_i32_1 = arith.constant 0 : i32
    return %c0_i32, %c0_i32_0 : i32, i32
  }
  func.func @transform_11(%arg0: i32) -> (i32, i32) {
    %c0_i32 = arith.constant 0 : i32
    %c0_i32_0 = arith.constant 0 : i32
    %c0_i32_1 = arith.constant 0 : i32
    return %c0_i32, %c0_i32_0 : i32, i32
  }
  func.func @transform_12(%arg0: i32) -> (i32, i32) {
    %c0_i32 = arith.constant 0 : i32
    %c0_i32_0 = arith.constant 0 : i32
    %c0_i32_1 = arith.constant 0 : i32
    return %c0_i32, %c0_i32_0 : i32, i32
  }
  func.func @transform_13(%arg0: i32) -> (i32, i32) {
    %c0_i32 = arith.constant 0 : i32
    %c0_i32_0 = arith.constant 0 : i32
    %c0_i32_1 = arith.constant 0 : i32
    return %c0_i32, %c0_i32_0 : i32, i32
  }
  func.func @transform_14(%arg0: i32) -> (i32, i32) {
    %c0_i32 = arith.constant 0 : i32
    %c0_i32_0 = arith.constant 0 : i32
    %c0_i32_1 = arith.constant 0 : i32
    return %c0_i32, %c0_i32_0 : i32, i32
  }
  func.func @transform_15(%arg0: i32) -> (i32, i32) {
    %c0_i32 = arith.constant 0 : i32
    %c0_i32_0 = arith.constant 0 : i32
    %c0_i32_1 = arith.constant 0 : i32
    return %c0_i32, %c0_i32_0 : i32, i32
  }
  func.func @transform_16(%arg0: i32) -> (i32, i32) {
    %c0_i32 = arith.constant 0 : i32
    %c0_i32_0 = arith.constant 0 : i32
    %c0_i32_1 = arith.constant 0 : i32
    return %c0_i32, %c0_i32_0 : i32, i32
  }
  func.func @transform_17(%arg0: i32) -> (i32, i32) {
    %c0_i32 = arith.constant 0 : i32
    %c0_i32_0 = arith.constant 0 : i32
    %c0_i32_1 = arith.constant 0 : i32
    return %c0_i32, %c0_i32_0 : i32, i32
  }
  func.func @transform_18(%arg0: i32) -> (i32, i32) {
    %c0_i32 = arith.constant 0 : i32
    %c0_i32_0 = arith.constant 0 : i32
    return %arg0, %c0_i32 : i32, i32
  }
  func.func @transform_19(%arg0: i32) -> (i32, i32) {
    %c0_i32 = arith.constant 0 : i32
    %c0_i32_0 = arith.constant 0 : i32
    return %arg0, %c0_i32 : i32, i32
  }
}

module attributes {stable_mosaic.version = 11 : i64} {
  func.func @_vae_kernel(%arg0: i32, %arg1: memref<8x256xf32, #tpu.memory_space<vmem>>, %arg2: memref<8x2xf32, #tpu.memory_space<vmem>>, %arg3: memref<256x512xbf16, #tpu.memory_space<vmem>>, %arg4: memref<1x512xf32, #tpu.memory_space<vmem>>, %arg5: memref<512x128xbf16, #tpu.memory_space<vmem>>, %arg6: memref<1x128xf32, #tpu.memory_space<vmem>>, %arg7: memref<128x32xbf16, #tpu.memory_space<vmem>>, %arg8: memref<1x32xf32, #tpu.memory_space<vmem>>, %arg9: memref<32x4xbf16, #tpu.memory_space<vmem>>, %arg10: memref<1x4xf32, #tpu.memory_space<vmem>>, %arg11: memref<2x32xf32, #tpu.memory_space<vmem>>, %arg12: memref<1x32xf32, #tpu.memory_space<vmem>>, %arg13: memref<32x128xbf16, #tpu.memory_space<vmem>>, %arg14: memref<1x128xf32, #tpu.memory_space<vmem>>, %arg15: memref<128x512xbf16, #tpu.memory_space<vmem>>, %arg16: memref<1x512xf32, #tpu.memory_space<vmem>>, %arg17: memref<512x256xbf16, #tpu.memory_space<vmem>>, %arg18: memref<1x256xf32, #tpu.memory_space<vmem>>, %arg19: memref<8x256xf32, #tpu.memory_space<vmem>>, %arg20: memref<8x8xf32, #tpu.memory_space<vmem>>) attributes {dimension_semantics = [#tpu.dimension_semantics<parallel>], iteration_bounds = array<i64: 1>, scalar_prefetch = 0 : i64, scratch_operands = 0 : i64, tpu.core_type = #tpu.core_type<tc>, window_params = [{transform_indices = @transform_0, window_bounds = array<i64: 8, 256>}, {transform_indices = @transform_1, window_bounds = array<i64: 8, 2>}, {pipeline_mode = #tpu.pipeline_mode<synchronous>, transform_indices = @transform_2, window_bounds = array<i64: 256, 512>}, {pipeline_mode = #tpu.pipeline_mode<synchronous>, transform_indices = @transform_3, window_bounds = array<i64: 1, 512>}, {pipeline_mode = #tpu.pipeline_mode<synchronous>, transform_indices = @transform_4, window_bounds = array<i64: 512, 128>}, {pipeline_mode = #tpu.pipeline_mode<synchronous>, transform_indices = @transform_5, window_bounds = array<i64: 1, 128>}, {pipeline_mode = #tpu.pipeline_mode<synchronous>, transform_indices = @transform_6, window_bounds = array<i64: 128, 32>}, {pipeline_mode = #tpu.pipeline_mode<synchronous>, transform_indices = @transform_7, window_bounds = array<i64: 1, 32>}, {pipeline_mode = #tpu.pipeline_mode<synchronous>, transform_indices = @transform_8, window_bounds = array<i64: 32, 4>}, {pipeline_mode = #tpu.pipeline_mode<synchronous>, transform_indices = @transform_9, window_bounds = array<i64: 1, 4>}, {pipeline_mode = #tpu.pipeline_mode<synchronous>, transform_indices = @transform_10, window_bounds = array<i64: 2, 32>}, {pipeline_mode = #tpu.pipeline_mode<synchronous>, transform_indices = @transform_11, window_bounds = array<i64: 1, 32>}, {pipeline_mode = #tpu.pipeline_mode<synchronous>, transform_indices = @transform_12, window_bounds = array<i64: 32, 128>}, {pipeline_mode = #tpu.pipeline_mode<synchronous>, transform_indices = @transform_13, window_bounds = array<i64: 1, 128>}, {pipeline_mode = #tpu.pipeline_mode<synchronous>, transform_indices = @transform_14, window_bounds = array<i64: 128, 512>}, {pipeline_mode = #tpu.pipeline_mode<synchronous>, transform_indices = @transform_15, window_bounds = array<i64: 1, 512>}, {pipeline_mode = #tpu.pipeline_mode<synchronous>, transform_indices = @transform_16, window_bounds = array<i64: 512, 256>}, {pipeline_mode = #tpu.pipeline_mode<synchronous>, transform_indices = @transform_17, window_bounds = array<i64: 1, 256>}, {transform_indices = @transform_18, window_bounds = array<i64: 8, 256>}, {transform_indices = @transform_19, window_bounds = array<i64: 8, 8>}]} {
    %c0 = arith.constant 0 : index
    %c0_0 = arith.constant 0 : index
    %0 = vector.load %arg1[%c0, %c0_0] : memref<8x256xf32, #tpu.memory_space<vmem>>, vector<8x256xf32>
    %1 = arith.truncf %0 : vector<8x256xf32> to vector<8x256xbf16>
    %c0_1 = arith.constant 0 : index
    %c0_2 = arith.constant 0 : index
    %2 = vector.load %arg3[%c0_1, %c0_2] : memref<256x512xbf16, #tpu.memory_space<vmem>>, vector<256x512xbf16>
    %cst = arith.constant dense<0.000000e+00> : vector<8x512xf32>
    %3 = tpu.matmul %1, %2, %cst {dimension_numbers = #tpu.dot_dimension_numbers<[1], [0], [0], [1], [0, 0, 1, 1], [], []>} : vector<8x256xbf16>, vector<256x512xbf16>, vector<8x512xf32> -> vector<8x512xf32>
    %c0_3 = arith.constant 0 : index
    %c0_4 = arith.constant 0 : index
    %4 = vector.load %arg4[%c0_3, %c0_4] : memref<1x512xf32, #tpu.memory_space<vmem>>, vector<1x512xf32>
    %5 = vector.broadcast %4 : vector<1x512xf32> to vector<8x512xf32>
    %6 = arith.addf %3, %5 : vector<8x512xf32>
    %cst_5 = arith.constant 0.000000e+00 : f32
    %7 = vector.broadcast %cst_5 : f32 to vector<8x512xf32>
    %8 = arith.maximumf %6, %7 : vector<8x512xf32>
    %9 = arith.truncf %8 : vector<8x512xf32> to vector<8x512xbf16>
    %c0_6 = arith.constant 0 : index
    %c0_7 = arith.constant 0 : index
    %10 = vector.load %arg5[%c0_6, %c0_7] : memref<512x128xbf16, #tpu.memory_space<vmem>>, vector<512x128xbf16>
    %cst_8 = arith.constant dense<0.000000e+00> : vector<8x128xf32>
    %11 = tpu.matmul %9, %10, %cst_8 {dimension_numbers = #tpu.dot_dimension_numbers<[1], [0], [0], [1], [0, 0, 1, 1], [], []>} : vector<8x512xbf16>, vector<512x128xbf16>, vector<8x128xf32> -> vector<8x128xf32>
    %c0_9 = arith.constant 0 : index
    %c0_10 = arith.constant 0 : index
    %12 = vector.load %arg6[%c0_9, %c0_10] : memref<1x128xf32, #tpu.memory_space<vmem>>, vector<1x128xf32>
    %13 = vector.broadcast %12 : vector<1x128xf32> to vector<8x128xf32>
    %14 = arith.addf %11, %13 : vector<8x128xf32>
    %cst_11 = arith.constant 0.000000e+00 : f32
    %15 = vector.broadcast %cst_11 : f32 to vector<8x128xf32>
    %16 = arith.maximumf %14, %15 : vector<8x128xf32>
    %17 = arith.truncf %16 : vector<8x128xf32> to vector<8x128xbf16>
    %c0_12 = arith.constant 0 : index
    %c0_13 = arith.constant 0 : index
    %18 = vector.load %arg7[%c0_12, %c0_13] : memref<128x32xbf16, #tpu.memory_space<vmem>>, vector<128x32xbf16>
    %cst_14 = arith.constant dense<0.000000e+00> : vector<8x32xf32>
    %19 = tpu.matmul %17, %18, %cst_14 {dimension_numbers = #tpu.dot_dimension_numbers<[1], [0], [0], [1], [0, 0, 1, 1], [], []>} : vector<8x128xbf16>, vector<128x32xbf16>, vector<8x32xf32> -> vector<8x32xf32>
    %c0_15 = arith.constant 0 : index
    %c0_16 = arith.constant 0 : index
    %20 = vector.load %arg8[%c0_15, %c0_16] : memref<1x32xf32, #tpu.memory_space<vmem>>, vector<1x32xf32>
    %21 = vector.broadcast %20 : vector<1x32xf32> to vector<8x32xf32>
    %22 = arith.addf %19, %21 : vector<8x32xf32>
    %cst_17 = arith.constant 0.000000e+00 : f32
    %23 = vector.broadcast %cst_17 : f32 to vector<8x32xf32>
    %24 = arith.maximumf %22, %23 : vector<8x32xf32>
    %25 = arith.truncf %24 : vector<8x32xf32> to vector<8x32xbf16>
    %c0_18 = arith.constant 0 : index
    %c0_19 = arith.constant 0 : index
    %26 = vector.load %arg9[%c0_18, %c0_19] : memref<32x4xbf16, #tpu.memory_space<vmem>>, vector<32x4xbf16>
    %cst_20 = arith.constant dense<0.000000e+00> : vector<8x4xf32>
    %27 = tpu.matmul %25, %26, %cst_20 {dimension_numbers = #tpu.dot_dimension_numbers<[1], [0], [0], [1], [0, 0, 1, 1], [], []>} : vector<8x32xbf16>, vector<32x4xbf16>, vector<8x4xf32> -> vector<8x4xf32>
    %c0_21 = arith.constant 0 : index
    %c0_22 = arith.constant 0 : index
    %28 = vector.load %arg10[%c0_21, %c0_22] : memref<1x4xf32, #tpu.memory_space<vmem>>, vector<1x4xf32>
    %29 = vector.broadcast %28 : vector<1x4xf32> to vector<8x4xf32>
    %30 = arith.addf %27, %29 : vector<8x4xf32>
    %31 = vector.extract_strided_slice %30 {offsets = [0, 0], sizes = [8, 2], strides = [1, 1]} : vector<8x4xf32> to vector<8x2xf32>
    %32 = vector.extract_strided_slice %30 {offsets = [0, 2], sizes = [8, 2], strides = [1, 1]} : vector<8x4xf32> to vector<8x2xf32>
    %cst_23 = arith.constant 5.000000e-01 : f32
    %33 = vector.broadcast %cst_23 : f32 to vector<8x2xf32>
    %34 = arith.mulf %33, %32 : vector<8x2xf32>
    %35 = math.exp %34 : vector<8x2xf32>
    %c0_24 = arith.constant 0 : index
    %c0_25 = arith.constant 0 : index
    %36 = vector.load %arg2[%c0_24, %c0_25] : memref<8x2xf32, #tpu.memory_space<vmem>>, vector<8x2xf32>
    %37 = arith.mulf %36, %35 : vector<8x2xf32>
    %38 = arith.addf %31, %37 : vector<8x2xf32>
    %c0_26 = arith.constant 0 : index
    %c0_27 = arith.constant 0 : index
    %39 = vector.load %arg11[%c0_26, %c0_27] : memref<2x32xf32, #tpu.memory_space<vmem>>, vector<2x32xf32>
    %40 = vector.extract_strided_slice %38 {offsets = [0, 0], sizes = [8, 1], strides = [1, 1]} : vector<8x2xf32> to vector<8x1xf32>
    %41 = vector.extract_strided_slice %39 {offsets = [0, 0], sizes = [1, 32], strides = [1, 1]} : vector<2x32xf32> to vector<1x32xf32>
    %42 = vector.broadcast %40 : vector<8x1xf32> to vector<8x32xf32>
    %43 = vector.broadcast %41 : vector<1x32xf32> to vector<8x32xf32>
    %44 = arith.mulf %42, %43 : vector<8x32xf32>
    %45 = vector.extract_strided_slice %38 {offsets = [0, 1], sizes = [8, 1], strides = [1, 1]} : vector<8x2xf32> to vector<8x1xf32>
    %46 = vector.extract_strided_slice %39 {offsets = [1, 0], sizes = [1, 32], strides = [1, 1]} : vector<2x32xf32> to vector<1x32xf32>
    %47 = vector.broadcast %45 : vector<8x1xf32> to vector<8x32xf32>
    %48 = vector.broadcast %46 : vector<1x32xf32> to vector<8x32xf32>
    %49 = arith.mulf %47, %48 : vector<8x32xf32>
    %50 = arith.addf %44, %49 : vector<8x32xf32>
    %c0_28 = arith.constant 0 : index
    %c0_29 = arith.constant 0 : index
    %51 = vector.load %arg12[%c0_28, %c0_29] : memref<1x32xf32, #tpu.memory_space<vmem>>, vector<1x32xf32>
    %52 = vector.broadcast %51 : vector<1x32xf32> to vector<8x32xf32>
    %53 = arith.addf %50, %52 : vector<8x32xf32>
    %cst_30 = arith.constant 0.000000e+00 : f32
    %54 = vector.broadcast %cst_30 : f32 to vector<8x32xf32>
    %55 = arith.maximumf %53, %54 : vector<8x32xf32>
    %56 = arith.truncf %55 : vector<8x32xf32> to vector<8x32xbf16>
    %c0_31 = arith.constant 0 : index
    %c0_32 = arith.constant 0 : index
    %57 = vector.load %arg13[%c0_31, %c0_32] : memref<32x128xbf16, #tpu.memory_space<vmem>>, vector<32x128xbf16>
    %cst_33 = arith.constant dense<0.000000e+00> : vector<8x128xf32>
    %58 = tpu.matmul %56, %57, %cst_33 {dimension_numbers = #tpu.dot_dimension_numbers<[1], [0], [0], [1], [0, 0, 1, 1], [], []>} : vector<8x32xbf16>, vector<32x128xbf16>, vector<8x128xf32> -> vector<8x128xf32>
    %c0_34 = arith.constant 0 : index
    %c0_35 = arith.constant 0 : index
    %59 = vector.load %arg14[%c0_34, %c0_35] : memref<1x128xf32, #tpu.memory_space<vmem>>, vector<1x128xf32>
    %60 = vector.broadcast %59 : vector<1x128xf32> to vector<8x128xf32>
    %61 = arith.addf %58, %60 : vector<8x128xf32>
    %cst_36 = arith.constant 0.000000e+00 : f32
    %62 = vector.broadcast %cst_36 : f32 to vector<8x128xf32>
    %63 = arith.maximumf %61, %62 : vector<8x128xf32>
    %64 = arith.truncf %63 : vector<8x128xf32> to vector<8x128xbf16>
    %c0_37 = arith.constant 0 : index
    %c0_38 = arith.constant 0 : index
    %65 = vector.load %arg15[%c0_37, %c0_38] : memref<128x512xbf16, #tpu.memory_space<vmem>>, vector<128x512xbf16>
    %cst_39 = arith.constant dense<0.000000e+00> : vector<8x512xf32>
    %66 = tpu.matmul %64, %65, %cst_39 {dimension_numbers = #tpu.dot_dimension_numbers<[1], [0], [0], [1], [0, 0, 1, 1], [], []>} : vector<8x128xbf16>, vector<128x512xbf16>, vector<8x512xf32> -> vector<8x512xf32>
    %c0_40 = arith.constant 0 : index
    %c0_41 = arith.constant 0 : index
    %67 = vector.load %arg16[%c0_40, %c0_41] : memref<1x512xf32, #tpu.memory_space<vmem>>, vector<1x512xf32>
    %68 = vector.broadcast %67 : vector<1x512xf32> to vector<8x512xf32>
    %69 = arith.addf %66, %68 : vector<8x512xf32>
    %cst_42 = arith.constant 0.000000e+00 : f32
    %70 = vector.broadcast %cst_42 : f32 to vector<8x512xf32>
    %71 = arith.maximumf %69, %70 : vector<8x512xf32>
    %72 = arith.truncf %71 : vector<8x512xf32> to vector<8x512xbf16>
    %c0_43 = arith.constant 0 : index
    %c0_44 = arith.constant 0 : index
    %73 = vector.load %arg17[%c0_43, %c0_44] : memref<512x256xbf16, #tpu.memory_space<vmem>>, vector<512x256xbf16>
    %cst_45 = arith.constant dense<0.000000e+00> : vector<8x256xf32>
    %74 = tpu.matmul %72, %73, %cst_45 {dimension_numbers = #tpu.dot_dimension_numbers<[1], [0], [0], [1], [0, 0, 1, 1], [], []>} : vector<8x512xbf16>, vector<512x256xbf16>, vector<8x256xf32> -> vector<8x256xf32>
    %c0_46 = arith.constant 0 : index
    %c0_47 = arith.constant 0 : index
    %75 = vector.load %arg18[%c0_46, %c0_47] : memref<1x256xf32, #tpu.memory_space<vmem>>, vector<1x256xf32>
    %76 = vector.broadcast %75 : vector<1x256xf32> to vector<8x256xf32>
    %77 = arith.addf %74, %76 : vector<8x256xf32>
    %cst_48 = arith.constant 0.000000e+00 : f32
    %78 = vector.broadcast %cst_48 : f32 to vector<8x256xf32>
    %79 = arith.subf %78, %77 : vector<8x256xf32>
    %80 = math.exp %79 : vector<8x256xf32>
    %cst_49 = arith.constant 1.000000e+00 : f32
    %81 = vector.broadcast %cst_49 : f32 to vector<8x256xf32>
    %82 = arith.addf %81, %80 : vector<8x256xf32>
    %83 = tpu.reciprocal %82 {approx = true} : vector<8x256xf32> -> vector<8x256xf32>
    %c0_50 = arith.constant 0 : index
    %c0_51 = arith.constant 0 : index
    %84 = vector.load %arg19[%c0_50, %c0_51] : memref<8x256xf32, #tpu.memory_space<vmem>>, vector<8x256xf32>
    tpu.vector_store %arg19[%c0_50, %c0_51], %83 {strides = array<i32>} : memref<8x256xf32, #tpu.memory_space<vmem>>, vector<8x256xf32>,
    %cst_52 = arith.constant 0.000000e+00 : f32
    %85 = vector.broadcast %cst_52 : f32 to vector<8x2xf32>
    %86 = tpu.concatenate %31, %32, %38, %85 in 1 : vector<8x2xf32>, vector<8x2xf32>, vector<8x2xf32>, vector<8x2xf32> -> vector<8x8xf32>
    %c0_53 = arith.constant 0 : index
    %c0_54 = arith.constant 0 : index
    %87 = vector.load %arg20[%c0_53, %c0_54] : memref<8x8xf32, #tpu.memory_space<vmem>>, vector<8x8xf32>
    tpu.vector_store %arg20[%c0_53, %c0_54], %86 {strides = array<i32>} : memref<8x8xf32, #tpu.memory_space<vmem>>, vector<8x8xf32>,
    return
  }
  func.func @transform_0(%arg0: i32) -> (i32, i32) {
    %c0_i32 = arith.constant 0 : i32
    %c0_i32_0 = arith.constant 0 : i32
    return %arg0, %c0_i32 : i32, i32
  }
  func.func @transform_1(%arg0: i32) -> (i32, i32) {
    %c0_i32 = arith.constant 0 : i32
    %c0_i32_0 = arith.constant 0 : i32
    return %arg0, %c0_i32 : i32, i32
  }
  func.func @transform_2(%arg0: i32) -> (i32, i32) {
    %c0_i32 = arith.constant 0 : i32
    %c0_i32_0 = arith.constant 0 : i32
    %c0_i32_1 = arith.constant 0 : i32
    return %c0_i32, %c0_i32_0 : i32, i32
  }
  func.func @transform_3(%arg0: i32) -> (i32, i32) {
    %c0_i32 = arith.constant 0 : i32
    %c0_i32_0 = arith.constant 0 : i32
    %c0_i32_1 = arith.constant 0 : i32
    return %c0_i32, %c0_i32_0 : i32, i32
  }
  func.func @transform_4(%arg0: i32) -> (i32, i32) {
    %c0_i32 = arith.constant 0 : i32
    %c0_i32_0 = arith.constant 0 : i32
    %c0_i32_1 = arith.constant 0 : i32
    return %c0_i32, %c0_i32_0 : i32, i32
  }
  func.func @transform_5(%arg0: i32) -> (i32, i32) {
    %c0_i32 = arith.constant 0 : i32
    %c0_i32_0 = arith.constant 0 : i32
    %c0_i32_1 = arith.constant 0 : i32
    return %c0_i32, %c0_i32_0 : i32, i32
  }
  func.func @transform_6(%arg0: i32) -> (i32, i32) {
    %c0_i32 = arith.constant 0 : i32
    %c0_i32_0 = arith.constant 0 : i32
    %c0_i32_1 = arith.constant 0 : i32
    return %c0_i32, %c0_i32_0 : i32, i32
  }
  func.func @transform_7(%arg0: i32) -> (i32, i32) {
    %c0_i32 = arith.constant 0 : i32
    %c0_i32_0 = arith.constant 0 : i32
    %c0_i32_1 = arith.constant 0 : i32
    return %c0_i32, %c0_i32_0 : i32, i32
  }
  func.func @transform_8(%arg0: i32) -> (i32, i32) {
    %c0_i32 = arith.constant 0 : i32
    %c0_i32_0 = arith.constant 0 : i32
    %c0_i32_1 = arith.constant 0 : i32
    return %c0_i32, %c0_i32_0 : i32, i32
  }
  func.func @transform_9(%arg0: i32) -> (i32, i32) {
    %c0_i32 = arith.constant 0 : i32
    %c0_i32_0 = arith.constant 0 : i32
    %c0_i32_1 = arith.constant 0 : i32
    return %c0_i32, %c0_i32_0 : i32, i32
  }
  func.func @transform_10(%arg0: i32) -> (i32, i32) {
    %c0_i32 = arith.constant 0 : i32
    %c0_i32_0 = arith.constant 0 : i32
    %c0_i32_1 = arith.constant 0 : i32
    return %c0_i32, %c0_i32_0 : i32, i32
  }
  func.func @transform_11(%arg0: i32) -> (i32, i32) {
    %c0_i32 = arith.constant 0 : i32
    %c0_i32_0 = arith.constant 0 : i32
    %c0_i32_1 = arith.constant 0 : i32
    return %c0_i32, %c0_i32_0 : i32, i32
  }
  func.func @transform_12(%arg0: i32) -> (i32, i32) {
    %c0_i32 = arith.constant 0 : i32
    %c0_i32_0 = arith.constant 0 : i32
    %c0_i32_1 = arith.constant 0 : i32
    return %c0_i32, %c0_i32_0 : i32, i32
  }
  func.func @transform_13(%arg0: i32) -> (i32, i32) {
    %c0_i32 = arith.constant 0 : i32
    %c0_i32_0 = arith.constant 0 : i32
    %c0_i32_1 = arith.constant 0 : i32
    return %c0_i32, %c0_i32_0 : i32, i32
  }
  func.func @transform_14(%arg0: i32) -> (i32, i32) {
    %c0_i32 = arith.constant 0 : i32
    %c0_i32_0 = arith.constant 0 : i32
    %c0_i32_1 = arith.constant 0 : i32
    return %c0_i32, %c0_i32_0 : i32, i32
  }
  func.func @transform_15(%arg0: i32) -> (i32, i32) {
    %c0_i32 = arith.constant 0 : i32
    %c0_i32_0 = arith.constant 0 : i32
    %c0_i32_1 = arith.constant 0 : i32
    return %c0_i32, %c0_i32_0 : i32, i32
  }
  func.func @transform_16(%arg0: i32) -> (i32, i32) {
    %c0_i32 = arith.constant 0 : i32
    %c0_i32_0 = arith.constant 0 : i32
    %c0_i32_1 = arith.constant 0 : i32
    return %c0_i32, %c0_i32_0 : i32, i32
  }
  func.func @transform_17(%arg0: i32) -> (i32, i32) {
    %c0_i32 = arith.constant 0 : i32
    %c0_i32_0 = arith.constant 0 : i32
    %c0_i32_1 = arith.constant 0 : i32
    return %c0_i32, %c0_i32_0 : i32, i32
  }
  func.func @transform_18(%arg0: i32) -> (i32, i32) {
    %c0_i32 = arith.constant 0 : i32
    %c0_i32_0 = arith.constant 0 : i32
    return %arg0, %c0_i32 : i32, i32
  }
  func.func @transform_19(%arg0: i32) -> (i32, i32) {
    %c0_i32 = arith.constant 0 : i32
    %c0_i32_0 = arith.constant 0 : i32
    return %arg0, %c0_i32 : i32, i32
  }
}

</mosaic_0001>

<bundles_post_ra>
// kernel: _vae2d_impl.1
= control target key start
LH: loop header
LB: loop body
LE: loop exit
PB: predicated region body
PF: predicated region fallthrough
CT: control target
= control target key end

     0   :  { %s3829_s0 = inlined_call_operand.hbm [shape: f32[8,256], index: 0, kind: input, shape index: {}]   ;;  %s3830_s1 = inlined_call_operand.hbm [shape: f32[8,2], index: 1, kind: input, shape index: {}]   ;;  %s3831_s2 = inlined_call_operand.hbm [shape: bf16[256,512], index: 2, kind: input, shape index: {}]   ;;  %s3832_s3 = inlined_call_operand.hbm [shape: f32[1,512], index: 3, kind: input, shape index: {}]   ;;  %s3833_s4 = inlined_call_operand.hbm [shape: bf16[512,128], index: 4, kind: input, shape index: {}]   ;;  %s3834_s5 = inlined_call_operand.hbm [shape: f32[1,128], index: 5, kind: input, shape index: {}]   ;;  %s3835_s6 = inlined_call_operand.hbm [shape: bf16[128,32], index: 6, kind: input, shape index: {}]   ;;  %s3836_s7 = inlined_call_operand.hbm [shape: f32[1,32], index: 7, kind: input, shape index: {}]   ;;  %s3837_s8 = inlined_call_operand.hbm [shape: bf16[32,4], index: 8, kind: input, shape index: {}]   ;;  %s3838_s9 = inlined_call_operand.hbm [shape: f32[1,4], index: 9, kind: input, shape index: {}]   ;;  %s3839_s10 = inlined_call_operand.hbm [shape: f32[2,32], index: 10, kind: input, shape index: {}]   ;;  %s3840_s11 = inlined_call_operand.hbm [shape: f32[1,32], index: 11, kind: input, shape index: {}]   ;;  %s3841_s12 = inlined_call_operand.hbm [shape: bf16[32,128], index: 12, kind: input, shape index: {}]   ;;  %s3842_s13 = inlined_call_operand.hbm [shape: f32[1,128], index: 13, kind: input, shape index: {}]   ;;  %s3843_s14 = inlined_call_operand.hbm [shape: bf16[128,512], index: 14, kind: input, shape index: {}]   ;;  %s3844_s15 = inlined_call_operand.hbm [shape: f32[1,512], index: 15, kind: input, shape index: {}]   ;;  %s3845_s16 = inlined_call_operand.hbm [shape: bf16[512,256], index: 16, kind: input, shape index: {}]   ;;  %s3846_s17 = inlined_call_operand.hbm [shape: f32[1,256], index: 17, kind: input, shape index: {}]   ;;  %s3847_s18 = inlined_call_operand.hbm [shape: f32[8,256], index: 18, kind: output, shape index: {0}]   ;;  %s3848_s19 = inlined_call_operand.hbm [shape: f32[8,8], index: 19, kind: output, shape index: {1}]  }
   0x1   :  { %3853 = sst [smem:[#allocation46_spill]] %s3829_s0 }
   0x2   :  { %3854 = sst [smem:[#allocation47_spill]] %s3830_s1 }
   0x3   :  { %3855 = sst [smem:[#allocation48_spill]] %s3831_s2 }
   0x4   :  { %3856 = sst [smem:[#allocation49_spill]] %s3832_s3 }
   0x5   :  { %25 = vsyncpa [#allocation3], 0 }
   0x6   :  { %26 = vsyncpa [#allocation6], 0 }
   0x7   :  { %27 = vsyncpa [#allocation9], 0 }
   0x8   :  { %28 = vsyncpa [#allocation12], 0 }
   0x9   :  { %29 = vsyncpa [#allocation15], 0 }
   0xa   :  { %30 = vsyncpa [#allocation18], 0 }
   0xb   :  { %31 = vsyncpa [#allocation21], 0 }
   0xc   :  { %32 = vsyncpa [#allocation24], 0 }
   0xd   :  { %33 = vsyncpa [#allocation27], 0 }
   0xe   :  { %34 = vsyncpa [#allocation30], 0 }
   0xf   :  { %35 = vsyncpa [#allocation4], 0 }
  0x10   :  { %36 = vsyncpa [#allocation33], 0  ;;  %s3365_s0 = smov [#allocation5]   ;;  %s3366_s20 = smov [#allocation8]  }
  0x11   :  { %s53_s30 = sshll.u32 %s3365_s0, 4  ;;  %s75_s21 = sshll.u32 %s3366_s20, 4  ;;  %s54_s30 = int_to_ptr.vmem [resolvable:$true] %s53_s30  ;;  %s76_s21 = int_to_ptr.vmem [resolvable:$true] %s75_s21 }
  0x12   :  { %s3857_s2 = sld [smem:[#allocation47_spill]] }
  0x18   :  { %s2901_s23 = scalar_lea.hbm %s3857_s2, 128 }
  0x19   :  { %p2902_p0 = scmp.ne.s32.totalorder %s3857_s2, %s2901_s23  ;;  %p2905_p1 = scmp.lt.u32.totalorder %s2901_s23, %s3857_s2 }
  0x1b   :  { %p2907_p2 = pnand %p2905_p1, %p2902_p0 }
  0x1d   :  { %2910 = shalt.err (!%p2907_p2)
}
  0x1e   :  { %s2911_s27 = scalar_lea.vmem %s54_s30, 128  ;;  %p2916_p4 = scmp.lt.s32.totalorder %s54_s30, %s54_s30 }
  0x1f   :  { %p2912_p3 = scmp.ne.s32.totalorder %s54_s30, %s2911_s27  ;;  %p2917_p5 = scmp.lt.s32.totalorder %s2911_s27, %s2911_s27 }
  0x21   :  { %p2918_p6 = por %p2917_p5, %p2916_p4 }
  0x23   :  { %p2919_p7 = pnand %p2918_p6, %p2912_p3 }
  0x25   :  { %2922 = shalt.err (!%p2919_p7)
}
  0x26   :  { %56 = dma.hbm_to_vmem [thread:$0]  %s3857_s2, 128, %s54_s30, [#allocation6]  }
  0x27   :  { %s3858_s1 = sld [smem:[#allocation49_spill]] }
  0x2d   :  { %s2923_s22 = scalar_lea.hbm %s3858_s1, 64 }
  0x2e   :  { %p2924_p8 = scmp.ne.s32.totalorder %s3858_s1, %s2923_s22  ;;  %p2927_p9 = scmp.lt.u32.totalorder %s2923_s22, %s3858_s1 }
  0x30   :  { %p2929_p10 = pnand %p2927_p9, %p2924_p8 }
  0x32   :  { %2932 = shalt.err (!%p2929_p10)
}
  0x33   :  { %s2933_s26 = scalar_lea.vmem %s76_s21, 64  ;;  %p2938_p12 = scmp.lt.s32.totalorder %s76_s21, %s76_s21 }
  0x34   :  { %p2934_p11 = scmp.ne.s32.totalorder %s76_s21, %s2933_s26  ;;  %p2939_p13 = scmp.lt.s32.totalorder %s2933_s26, %s2933_s26 }
  0x36   :  { %p2940_p0 = por %p2939_p13, %p2938_p12 }
  0x38   :  { %p2941_p1 = pnand %p2940_p0, %p2934_p11 }
  0x3a   :  { %2944 = shalt.err (!%p2941_p1)
}
  0x3b   :  { %78 = dma.hbm_to_vmem [thread:$0]  %s3858_s1, 64, %s76_s21, [#allocation9]  }
  0x3c   :  { %s3367_s27 = smov [#allocation11]   ;;  %s3368_s29 = smov [#allocation14]  }
  0x3d   :  { %s97_s28 = sshll.u32 %s3367_s27, 4  ;;  %s119_s0 = sshll.u32 %s3368_s29, 4  ;;  %s98_s28 = int_to_ptr.vmem [resolvable:$true] %s97_s28  ;;  %s120_s0 = int_to_ptr.vmem [resolvable:$true] %s119_s0 }
  0x3e   :  { %s2945_s24 = scalar_lea.hbm %s3834_s5, 16 }
  0x3f   :  { %p2946_p2 = scmp.ne.s32.totalorder %s3834_s5, %s2945_s24  ;;  %p2949_p3 = scmp.lt.u32.totalorder %s2945_s24, %s3834_s5 }
  0x41   :  { %p2951_p4 = pnand %p2949_p3, %p2946_p2 }
  0x43   :  { %2954 = shalt.err (!%p2951_p4)
}
  0x44   :  { %s2955_s21 = scalar_lea.vmem %s98_s28, 16  ;;  %s2959_s1 = scalar_lea.vmem %s98_s28, 32 }
  0x45   :  { %p2956_p5 = scmp.ne.s32.totalorder %s98_s28, %s2955_s21  ;;  %p2960_p6 = scmp.lt.s32.totalorder %s98_s28, %s98_s28 }
  0x46   :  { %p2961_p7 = scmp.lt.s32.totalorder %s2959_s1, %s2955_s21 }
  0x48   :  { %p2962_p8 = por %p2961_p7, %p2960_p6 }
  0x4a   :  { %p2963_p9 = pnand %p2962_p8, %p2956_p5 }
  0x4c   :  { %2966 = shalt.err (!%p2963_p9)
}
  0x4d   :  { %100 = dma.hbm_to_vmem [thread:$0]  %s3834_s5, 16, %s98_s28, [#allocation12]  }
  0x4e   :  { %s2967_s20 = scalar_lea.hbm %s3836_s7, 16 }
  0x4f   :  { %p2968_p10 = scmp.ne.s32.totalorder %s3836_s7, %s2967_s20  ;;  %p2971_p11 = scmp.lt.u32.totalorder %s2967_s20, %s3836_s7 }
  0x51   :  { %p2973_p12 = pnand %p2971_p11, %p2968_p10 }
  0x53   :  { %2976 = shalt.err (!%p2973_p12)
}
  0x54   :  { %s2977_s3 = scalar_lea.vmem %s120_s0, 16  ;;  %s2981_s26 = scalar_lea.vmem %s120_s0, 32 }
  0x55   :  { %p2978_p13 = scmp.ne.s32.totalorder %s120_s0, %s2977_s3  ;;  %p2982_p0 = scmp.lt.s32.totalorder %s120_s0, %s120_s0 }
  0x56   :  { %p2983_p1 = scmp.lt.s32.totalorder %s2981_s26, %s2977_s3 }
  0x58   :  { %p2984_p2 = por %p2983_p1, %p2982_p0 }
  0x5a   :  { %p2985_p3 = pnand %p2984_p2, %p2978_p13 }
  0x5c   :  { %2988 = shalt.err (!%p2985_p3)
}
  0x5d   :  { %122 = dma.hbm_to_vmem [thread:$0]  %s3836_s7, 16, %s120_s0, [#allocation15]  }
  0x5e   :  { %s3369_s21 = smov [#allocation17]   ;;  %s3370_s30 = smov [#allocation20]  }
  0x5f   :  { %s141_s1 = sshll.u32 %s3369_s21, 4  ;;  %s161_s2 = sshll.u32 %s3370_s30, 4  ;;  %s142_s1 = int_to_ptr.vmem [resolvable:$true] %s141_s1  ;;  %s162_s2 = int_to_ptr.vmem [resolvable:$true] %s161_s2 }
  0x60   :  { %s2989_s20 = scalar_lea.hbm %s3838_s9, 16 }
  0x61   :  { %p2990_p4 = scmp.ne.s32.totalorder %s3838_s9, %s2989_s20  ;;  %p2993_p5 = scmp.lt.u32.totalorder %s2989_s20, %s3838_s9 }
  0x63   :  { %p2995_p6 = pnand %p2993_p5, %p2990_p4 }
  0x65   :  { %2998 = shalt.err (!%p2995_p6)
}
  0x66   :  { %s2999_s7 = scalar_lea.vmem %s142_s1, 16  ;;  %s3003_s0 = scalar_lea.vmem %s142_s1, 32 }
  0x67   :  { %p3000_p7 = scmp.ne.s32.totalorder %s142_s1, %s2999_s7  ;;  %p3004_p8 = scmp.lt.s32.totalorder %s142_s1, %s142_s1 }
  0x68   :  { %p3005_p9 = scmp.lt.s32.totalorder %s3003_s0, %s2999_s7 }
  0x6a   :  { %p3006_p10 = por %p3005_p9, %p3004_p8 }
  0x6c   :  { %p3007_p11 = pnand %p3006_p10, %p3000_p7 }
  0x6e   :  { %3010 = shalt.err (!%p3007_p11)
}
  0x6f   :  { %144 = dma.hbm_to_vmem [thread:$0]  %s3838_s9, 16, %s142_s1, [#allocation18]  }
  0x70   :  { %s3011_s21 = scalar_lea.hbm %s3840_s11, 16 }
  0x71   :  { %p3012_p12 = scmp.ne.s32.totalorder %s3840_s11, %s3011_s21  ;;  %p3015_p13 = scmp.lt.u32.totalorder %s3011_s21, %s3840_s11 }
  0x73   :  { %p3017_p0 = pnand %p3015_p13, %p3012_p12 }
  0x75   :  { %3020 = shalt.err (!%p3017_p0)
}
  0x76   :  { %s3021_s22 = scalar_lea.vmem %s162_s2, 16  ;;  %s3025_s24 = scalar_lea.vmem %s162_s2, 32 }
  0x77   :  { %p3022_p1 = scmp.ne.s32.totalorder %s162_s2, %s3021_s22  ;;  %p3026_p2 = scmp.lt.s32.totalorder %s162_s2, %s162_s2 }
  0x78   :  { %p3027_p3 = scmp.lt.s32.totalorder %s3025_s24, %s3021_s22 }
  0x7a   :  { %p3028_p4 = por %p3027_p3, %p3026_p2 }
  0x7c   :  { %p3029_p5 = pnand %p3028_p4, %p3022_p1 }
  0x7e   :  { %3032 = shalt.err (!%p3029_p5)
}
  0x7f   :  { %164 = dma.hbm_to_vmem [thread:$0]  %s3840_s11, 16, %s162_s2, [#allocation21]  }
  0x80   :  { %s3371_s25 = smov [#allocation23]   ;;  %s3372_s7 = smov [#allocation26]  }
  0x81   :  { %s183_s23 = sshll.u32 %s3371_s25, 4  ;;  %s205_s0 = sshll.u32 %s3372_s7, 4  ;;  %s184_s23 = int_to_ptr.vmem [resolvable:$true] %s183_s23  ;;  %s206_s0 = int_to_ptr.vmem [resolvable:$true] %s205_s0 }
  0x82   :  { %s3033_s5 = scalar_lea.hbm %s3842_s13, 16 }
  0x83   :  { %p3034_p6 = scmp.ne.s32.totalorder %s3842_s13, %s3033_s5  ;;  %p3037_p7 = scmp.lt.u32.totalorder %s3033_s5, %s3842_s13 }
  0x85   :  { %p3039_p8 = pnand %p3037_p7, %p3034_p6 }
  0x87   :  { %3042 = shalt.err (!%p3039_p8)
}
  0x88   :  { %s3043_s11 = scalar_lea.vmem %s184_s23, 16  ;;  %s3047_s2 = scalar_lea.vmem %s184_s23, 32 }
  0x89   :  { %p3044_p9 = scmp.ne.s32.totalorder %s184_s23, %s3043_s11  ;;  %p3048_p10 = scmp.lt.s32.totalorder %s184_s23, %s184_s23 }
  0x8a   :  { %p3049_p11 = scmp.lt.s32.totalorder %s3047_s2, %s3043_s11 }
  0x8c   :  { %p3050_p12 = por %p3049_p11, %p3048_p10 }
  0x8e   :  { %p3051_p13 = pnand %p3050_p12, %p3044_p9 }
  0x90   :  { %3054 = shalt.err (!%p3051_p13)
}
  0x91   :  { %186 = dma.hbm_to_vmem [thread:$0]  %s3842_s13, 16, %s184_s23, [#allocation24]  }
  0x92   :  { %s3055_s9 = scalar_lea.hbm %s3844_s15, 64 }
  0x93   :  { %p3056_p0 = scmp.ne.s32.totalorder %s3844_s15, %s3055_s9  ;;  %p3059_p1 = scmp.lt.u32.totalorder %s3055_s9, %s3844_s15 }
  0x95   :  { %p3061_p2 = pnand %p3059_p1, %p3056_p0 }
  0x97   :  { %3064 = shalt.err (!%p3061_p2)
}
  0x98   :  { %s3065_s26 = scalar_lea.vmem %s206_s0, 64  ;;  %p3070_p4 = scmp.lt.s32.totalorder %s206_s0, %s206_s0 }
  0x99   :  { %p3066_p3 = scmp.ne.s32.totalorder %s206_s0, %s3065_s26  ;;  %p3071_p5 = scmp.lt.s32.totalorder %s3065_s26, %s3065_s26 }
  0x9b   :  { %p3072_p6 = por %p3071_p5, %p3070_p4 }
  0x9d   :  { %p3073_p7 = pnand %p3072_p6, %p3066_p3 }
  0x9f   :  { %3076 = shalt.err (!%p3073_p7)
}
  0xa0   :  { %208 = dma.hbm_to_vmem [thread:$0]  %s3844_s15, 64, %s206_s0, [#allocation27]  }
  0xa1   :  { %s3373_s5 = smov [#allocation2]   ;;  %s3374_s21 = smov [#allocation7]  }
  0xa2   :  { %s43_s28 = sshll.u32 %s3373_s5, 4  ;;  %s62_s30 = sshll.u32 %s3374_s21, 4  ;;  %s44_s28 = int_to_ptr.vmem [resolvable:$true] %s43_s28  ;;  %s3592_s30 = int_to_ptr.vmem [resolvable:$true] %s62_s30 }
  0xa3   :  { %s3859_s2 = sld [smem:[#allocation46_spill]] }
  0xa9   :  { %s3077_s29 = scalar_lea.hbm %s3859_s2, 256 }
  0xaa   :  { %p3078_p8 = scmp.ne.s32.totalorder %s3859_s2, %s3077_s29  ;;  %p3081_p9 = scmp.lt.u32.totalorder %s3077_s29, %s3859_s2 }
  0xac   :  { %p3083_p10 = pnand %p3081_p9, %p3078_p8 }
  0xae   :  { %3086 = shalt.err (!%p3083_p10)
}
  0xaf   :  { %s3087_s15 = scalar_lea.vmem %s44_s28, 256  ;;  %p3092_p12 = scmp.lt.s32.totalorder %s44_s28, %s44_s28 }
  0xb0   :  { %p3088_p11 = scmp.ne.s32.totalorder %s44_s28, %s3087_s15  ;;  %p3093_p13 = scmp.lt.s32.totalorder %s3087_s15, %s3087_s15 }
  0xb2   :  { %p3094_p0 = por %p3093_p13, %p3092_p12 }
  0xb4   :  { %p3095_p1 = pnand %p3094_p0, %p3088_p11 }
  0xb6   :  { %3098 = shalt.err (!%p3095_p1)
}
  0xb7   :  { %46 = dma.hbm_to_vmem [thread:$0]  %s3859_s2, 256, %s44_s28, [#allocation3]  }
  0xb8   :  { %s3860_s3 = sld [smem:[#allocation48_spill]] }
  0xbe   :  { %s3099_s26 = scalar_lea.hbm %s3860_s3, 8192 }
  0xbf   :  { %p3100_p2 = scmp.ne.s32.totalorder %s3860_s3, %s3099_s26  ;;  %p3103_p3 = scmp.lt.u32.totalorder %s3099_s26, %s3860_s3 }
  0xc1   :  { %p3105_p4 = pnand %p3103_p3, %p3100_p2 }
  0xc3   :  { %3108 = shalt.err (!%p3105_p4)
}
  0xc4   :  { %s3109_s27 = scalar_lea.vmem %s3592_s30, 8192  ;;  %p3114_p6 = scmp.lt.s32.totalorder %s3592_s30, %s3592_s30 }
  0xc5   :  { %p3110_p5 = scmp.ne.s32.totalorder %s3592_s30, %s3109_s27  ;;  %p3115_p7 = scmp.lt.s32.totalorder %s3109_s27, %s3109_s27 }
  0xc7   :  { %p3116_p8 = por %p3115_p7, %p3114_p6 }
  0xc9   :  { %p3117_p9 = pnand %p3116_p8, %p3110_p5 }
  0xcb   :  { %3120 = shalt.err (!%p3117_p9)
}
  0xcc   :  { %s3375_s28 = smov 256   ;;  %s3376_s11 = smov 16  }
  0xcd   :  { %68 = dma.hbm_to_vmem [thread:$0]  %s3860_s3, 8192, %s3592_s30, [#allocation6], %s3375_s28, %s3375_s28, %s3376_s11  }
  0xce   :  { %s3377_s20 = smov [#allocation10]   ;;  %s3121_s15 = scalar_lea.hbm %s3833_s4, 4096 }
  0xcf   :  { %s84_s22 = sshll.u32 %s3377_s20, 4  ;;  %p3122_p10 = scmp.ne.s32.totalorder %s3833_s4, %s3121_s15  ;;  %s85_s22 = int_to_ptr.vmem [resolvable:$true] %s84_s22 }
  0xd0   :  { %p3125_p11 = scmp.lt.u32.totalorder %s3121_s15, %s3833_s4 }
  0xd2   :  { %p3127_p12 = pnand %p3125_p11, %p3122_p10 }
  0xd4   :  { %3130 = shalt.err (!%p3127_p12)
}
  0xd5   :  { %s3131_s26 = scalar_lea.vmem %s85_s22, 4096  ;;  %p3136_p0 = scmp.lt.s32.totalorder %s85_s22, %s85_s22 }
  0xd6   :  { %p3132_p13 = scmp.ne.s32.totalorder %s85_s22, %s3131_s26  ;;  %p3137_p1 = scmp.lt.s32.totalorder %s3131_s26, %s3131_s26 }
  0xd8   :  { %p3138_p2 = por %p3137_p1, %p3136_p0 }
  0xda   :  { %p3139_p3 = pnand %p3138_p2, %p3132_p13 }
  0xdc   :  { %3142 = shalt.err (!%p3139_p3)
}
  0xdd   :  { %s3378_s30 = smov 64   ;;  %s3379_s3 = smov 4  }
  0xde   :  { %90 = dma.hbm_to_vmem [thread:$0]  %s3833_s4, 4096, %s85_s22, [#allocation9], %s3378_s30, %s3378_s30, %s3379_s3  }
  0xdf   :  { %s3380_s5 = smov [#allocation13]   ;;  %s3381_s27 = smov [#allocation16]  }
  0xe0   :  { %s106_s21 = sshll.u32 %s3380_s5, 4  ;;  %s128_s2 = sshll.u32 %s3381_s27, 4  ;;  %s107_s21 = int_to_ptr.vmem [resolvable:$true] %s106_s21  ;;  %s129_s2 = int_to_ptr.vmem [resolvable:$true] %s128_s2 }
  0xe1   :  { %s3143_s24 = scalar_lea.hbm %s3835_s6, 1024 }
  0xe2   :  { %p3144_p4 = scmp.ne.s32.totalorder %s3835_s6, %s3143_s24  ;;  %p3147_p5 = scmp.lt.u32.totalorder %s3143_s24, %s3835_s6 }
  0xe4   :  { %p3149_p6 = pnand %p3147_p5, %p3144_p4 }
  0xe6   :  { %3152 = shalt.err (!%p3149_p6)
}
  0xe7   :  { %s3153_s4 = scalar_lea.vmem %s107_s21, 1024  ;;  %p3158_p8 = scmp.lt.s32.totalorder %s107_s21, %s107_s21 }
  0xe8   :  { %p3154_p7 = scmp.ne.s32.totalorder %s107_s21, %s3153_s4  ;;  %p3159_p9 = scmp.lt.s32.totalorder %s3153_s4, %s3153_s4 }
  0xea   :  { %p3160_p10 = por %p3159_p9, %p3158_p8 }
  0xec   :  { %p3161_p11 = pnand %p3160_p10, %p3154_p7 }
  0xee   :  { %3164 = shalt.err (!%p3161_p11)
}
  0xef   :  { %112 = dma.hbm_to_vmem [thread:$0]  %s3835_s6, 1024, %s107_s21, [#allocation12], %s3378_s30, %s3378_s30, %s3379_s3  }
  0xf0   :  { %s3165_s13 = scalar_lea.hbm %s3837_s8, 256 }
  0xf1   :  { %p3166_p12 = scmp.ne.s32.totalorder %s3837_s8, %s3165_s13  ;;  %p3169_p13 = scmp.lt.u32.totalorder %s3165_s13, %s3837_s8 }
  0xf3   :  { %p3171_p0 = pnand %p3169_p13, %p3166_p12 }
  0xf5   :  { %3174 = shalt.err (!%p3171_p0)
}
  0xf6   :  { %s3175_s20 = scalar_lea.vmem %s129_s2, 256  ;;  %p3180_p2 = scmp.lt.s32.totalorder %s129_s2, %s129_s2 }
  0xf7   :  { %p3176_p1 = scmp.ne.s32.totalorder %s129_s2, %s3175_s20  ;;  %p3181_p3 = scmp.lt.s32.totalorder %s3175_s20, %s3175_s20 }
  0xf9   :  { %p3182_p4 = por %p3181_p3, %p3180_p2 }
  0xfb   :  { %p3183_p5 = pnand %p3182_p4, %p3176_p1 }
  0xfd   :  { %3186 = shalt.err (!%p3183_p5)
}
  0xfe   :  { %134 = dma.hbm_to_vmem [thread:$0]  %s3837_s8, 256, %s129_s2, [#allocation15], %s3378_s30, %s3378_s30, %s3379_s3  }
  0xff   :  { %s3382_s24 = smov [#allocation19]   ;;  %s3383_s15 = smov [#allocation22]  }
 0x100   :  { %s151_s9 = sshll.u32 %s3382_s24, 4  ;;  %s170_s0 = sshll.u32 %s3383_s15, 4  ;;  %s152_s9 = int_to_ptr.vmem [resolvable:$true] %s151_s9  ;;  %s171_s0 = int_to_ptr.vmem [resolvable:$true] %s170_s0 }
 0x101   :  { %s3187_s22 = scalar_lea.hbm %s3839_s10, 32 }
 0x102   :  { %p3188_p6 = scmp.ne.s32.totalorder %s3839_s10, %s3187_s22  ;;  %p3191_p7 = scmp.lt.u32.totalorder %s3187_s22, %s3839_s10 }
 0x104   :  { %p3193_p8 = pnand %p3191_p7, %p3188_p6 }
 0x106   :  { %3196 = shalt.err (!%p3193_p8)
}
 0x107   :  { %s3197_s8 = scalar_lea.vmem %s152_s9, 32  ;;  %p3202_p10 = scmp.lt.s32.totalorder %s152_s9, %s152_s9 }
 0x108   :  { %p3198_p9 = scmp.ne.s32.totalorder %s152_s9, %s3197_s8  ;;  %p3203_p11 = scmp.lt.s32.totalorder %s3197_s8, %s3197_s8 }
 0x10a   :  { %p3204_p12 = por %p3203_p11, %p3202_p10 }
 0x10c   :  { %p3205_p13 = pnand %p3204_p12, %p3198_p9 }
 0x10e   :  { %3208 = shalt.err (!%p3205_p13)
}
 0x10f   :  { %154 = dma.hbm_to_vmem [thread:$0]  %s3839_s10, 32, %s152_s9, [#allocation18]  }
 0x110   :  { %s3209_s29 = scalar_lea.hbm %s3841_s12, 256 }
 0x111   :  { %p3210_p0 = scmp.ne.s32.totalorder %s3841_s12, %s3209_s29  ;;  %p3213_p1 = scmp.lt.u32.totalorder %s3209_s29, %s3841_s12 }
 0x113   :  { %p3215_p2 = pnand %p3213_p1, %p3210_p0 }
 0x115   :  { %3218 = shalt.err (!%p3215_p2)
}
 0x116   :  { %s3219_s15 = scalar_lea.vmem %s171_s0, 256  ;;  %p3224_p4 = scmp.lt.s32.totalorder %s171_s0, %s171_s0 }
 0x117   :  { %p3220_p3 = scmp.ne.s32.totalorder %s171_s0, %s3219_s15  ;;  %p3225_p5 = scmp.lt.s32.totalorder %s3219_s15, %s3219_s15 }
 0x119   :  { %p3226_p6 = por %p3225_p5, %p3224_p4 }
 0x11b   :  { %p3227_p7 = pnand %p3226_p6, %p3220_p3 }
 0x11d   :  { %3230 = shalt.err (!%p3227_p7)
}
 0x11e   :  { %176 = dma.hbm_to_vmem [thread:$0]  %s3841_s12, 256, %s171_s0, [#allocation21], %s3378_s30, %s3378_s30, %s3379_s3  }
 0x11f   :  { %s3384_s1 = smov [#allocation25]   ;;  %s3385_s22 = smov [#allocation28]  }
 0x120   :  { %s192_s4 = sshll.u32 %s3384_s1, 4  ;;  %s214_s25 = sshll.u32 %s3385_s22, 4  ;;  %s193_s4 = int_to_ptr.vmem [resolvable:$true] %s192_s4  ;;  %s215_s25 = int_to_ptr.vmem [resolvable:$true] %s214_s25 }
 0x121   :  { %s3231_s13 = scalar_lea.hbm %s3843_s14, 4096 }
 0x122   :  { %p3232_p8 = scmp.ne.s32.totalorder %s3843_s14, %s3231_s13  ;;  %p3235_p9 = scmp.lt.u32.totalorder %s3231_s13, %s3843_s14 }
 0x124   :  { %p3237_p10 = pnand %p3235_p9, %p3232_p8 }
 0x126   :  { %3240 = shalt.err (!%p3237_p10)
}
 0x127   :  { %s3241_s12 = scalar_lea.vmem %s193_s4, 4096  ;;  %p3246_p12 = scmp.lt.s32.totalorder %s193_s4, %s193_s4 }
 0x128   :  { %p3242_p11 = scmp.ne.s32.totalorder %s193_s4, %s3241_s12  ;;  %p3247_p13 = scmp.lt.s32.totalorder %s3241_s12, %s3241_s12 }
 0x12a   :  { %p3248_p0 = por %p3247_p13, %p3246_p12 }
 0x12c   :  { %p3249_p1 = pnand %p3248_p0, %p3242_p11 }
 0x12e   :  { %3252 = shalt.err (!%p3249_p1)
}
 0x12f   :  { %198 = dma.hbm_to_vmem [thread:$0]  %s3843_s14, 4096, %s193_s4, [#allocation24], %s3375_s28, %s3375_s28, %s3376_s11  }
 0x130   :  { %s3253_s20 = scalar_lea.hbm %s3845_s16, 8192 }
 0x131   :  { %p3254_p2 = scmp.ne.s32.totalorder %s3845_s16, %s3253_s20  ;;  %p3257_p3 = scmp.lt.u32.totalorder %s3253_s20, %s3845_s16 }
 0x133   :  { %p3259_p4 = pnand %p3257_p3, %p3254_p2 }
 0x135   :  { %3262 = shalt.err (!%p3259_p4)
}
 0x136   :  { %s3263_s10 = scalar_lea.vmem %s215_s25, 8192  ;;  %p3268_p6 = scmp.lt.s32.totalorder %s215_s25, %s215_s25 }
 0x137   :  { %p3264_p5 = scmp.ne.s32.totalorder %s215_s25, %s3263_s10  ;;  %p3269_p7 = scmp.lt.s32.totalorder %s3263_s10, %s3263_s10 }
 0x139   :  { %p3270_p8 = por %p3269_p7, %p3268_p6 }
 0x13b   :  { %p3271_p9 = pnand %p3270_p8, %p3264_p5 }
 0x13d   :  { %3274 = shalt.err (!%p3271_p9)
}
 0x13e   :  { %s3386_s14 = smov 128   ;;  %s3387_s28 = smov 8  }
 0x13f   :  { %220 = dma.hbm_to_vmem [thread:$0]  %s3845_s16, 8192, %s215_s25, [#allocation27], %s3386_s14, %s3386_s14, %s3387_s28  }
 0x140   :  { %s3388_s1 = smov [#allocation29]   ;;  %s3275_s26 = scalar_lea.hbm %s3846_s17, 32 }
 0x141   :  { %s227_s4 = sshll.u32 %s3388_s1, 4  ;;  %p3276_p10 = scmp.ne.s32.totalorder %s3846_s17, %s3275_s26  ;;  %s228_s4 = int_to_ptr.vmem [resolvable:$true] %s227_s4 }
 0x142   :  { %p3279_p11 = scmp.lt.u32.totalorder %s3275_s26, %s3846_s17 }
 0x144   :  { %p3281_p12 = pnand %p3279_p11, %p3276_p10 }
 0x146   :  { %3284 = shalt.err (!%p3281_p12)
}
 0x147   :  { %s3285_s5 = scalar_lea.vmem %s228_s4, 32  ;;  %p3290_p0 = scmp.lt.s32.totalorder %s228_s4, %s228_s4 }
 0x148   :  { %p3286_p13 = scmp.ne.s32.totalorder %s228_s4, %s3285_s5  ;;  %p3291_p1 = scmp.lt.s32.totalorder %s3285_s5, %s3285_s5 }
 0x14a   :  { %p3292_p2 = por %p3291_p1, %p3290_p0 }
 0x14c   :  { %p3293_p3 = pnand %p3292_p2, %p3286_p13 }
 0x14e   :  { %3296 = shalt.err (!%p3293_p3)
}
 0x14f   :  { %230 = dma.hbm_to_vmem [thread:$0]  %s3846_s17, 32, %s228_s4, [#allocation30]  }
 0x150   :  { %3341 = dma.done.wait [#allocation3], 256  }
 0x151   :  { %3342 = vsyncadd [#allocation3], 4294967040 }
 0x152   :  { %3343 = dma.done.wait [#allocation6], 8320  }
 0x153   :  { %3344 = vsyncadd [#allocation6], 4294958976 }
 0x154   :  { %3345 = dma.done.wait [#allocation9], 4160  }
 0x155   :  { %3346 = vsyncadd [#allocation9], 4294963136 }
 0x156   :  { %3347 = dma.done.wait [#allocation12], 1040  }
 0x157   :  { %3348 = vsyncadd [#allocation12], 4294966256 }
 0x158   :  { %3349 = dma.done.wait [#allocation15], 272  }
 0x159   :  { %3350 = vsyncadd [#allocation15], 4294967024 }
 0x15a   :  { %3351 = dma.done.wait [#allocation18], 48  }
 0x15b   :  { %3352 = vsyncadd [#allocation18], 4294967248 }
 0x15c   :  { %3353 = dma.done.wait [#allocation21], 272  }
 0x15d   :  { %3354 = vsyncadd [#allocation21], 4294967024 }
 0x15e   :  { %3355 = dma.done.wait [#allocation24], 4112  }
 0x15f   :  { %3356 = vsyncadd [#allocation24], 4294963184 }
 0x160   :  { %3357 = dma.done.wait [#allocation27], 8256  }
 0x161   :  { %3358 = vsyncadd [#allocation27], 4294959040 }
 0x162   :  { %3359 = dma.done.wait [#allocation30], 32  }
 0x163   :  { %3360 = vsyncadd [#allocation30], 4294967264  ;;  %v2607_v0 = vld [vmem:[#allocation7 + $0x4] ss:$16 sps:$4 sm:$0xff]   ;;  %v2609_v1 = vld [vmem:[#allocation7] ss:$16 sps:$4 sm:$0xff]  }
 0x164   :  { %696 = vmatprep.subr.bf16.mxu0 %v2607_v0  ;;  %v2610_v2 = vld [vmem:[#allocation7 + $0x24] ss:$16 sps:$4 sm:$0xff]   ;;  %v2612_v3 = vld [vmem:[#allocation7 + $0x20] ss:$16 sps:$4 sm:$0xff]   ;;  %v286_v34 = vld [vmem:[#allocation2] sm:$0xff]  ;;  %vm3390_vm0 = vmmov 0  }
 0x165   :  { %697 = vmatpush1.bf16.msra.mxu0 %v2609_v1  ;;  %v2613_v4 = vld [vmem:[#allocation7 + $0x44] ss:$16 sps:$4 sm:$0xff]   ;;  %v2615_v5 = vld [vmem:[#allocation7 + $0x40] ss:$16 sps:$4 sm:$0xff]   ;;  %v2657_v35 = vld [vmem:[#allocation7 + $0xc] ss:$16 sps:$4 sm:$0xff]   ;;  %v3737_v37 = vpack.c.bf16 %v286_v34, %v286_v34 }
 0x166   :  { %698 = vmatprep.subr.bf16.mxu0 %v2610_v2  ;;  %v2616_v6 = vld [vmem:[#allocation7 + $0x64] ss:$16 sps:$4 sm:$0xff]   ;;  %v2618_v7 = vld [vmem:[#allocation7 + $0x60] ss:$16 sps:$4 sm:$0xff]   ;;  %v2655_v36 = vld [vmem:[#allocation7 + $0x8] ss:$16 sps:$4 sm:$0xff]  }
 0x167   :  { %v2619_v8 = vld [vmem:[#allocation7 + $0x84] ss:$16 sps:$4 sm:$0xff]   ;;  %v2621_v9 = vld [vmem:[#allocation7 + $0x80] ss:$16 sps:$4 sm:$0xff]   ;;  %v2660_v38 = vld [vmem:[#allocation7 + $0x2c] ss:$16 sps:$4 sm:$0xff]  }
 0x168   :  { %v2622_v10 = vld [vmem:[#allocation7 + $0xa4] ss:$16 sps:$4 sm:$0xff]   ;;  %v2624_v11 = vld [vmem:[#allocation7 + $0xa0] ss:$16 sps:$4 sm:$0xff]   ;;  %v2658_v39 = vld [vmem:[#allocation7 + $0x28] ss:$16 sps:$4 sm:$0xff]  }
 0x169   :  { %699 = vmatpush1.bf16.msra.mxu0 %v2612_v3  ;;  %v2625_v12 = vld [vmem:[#allocation7 + $0xc4] ss:$16 sps:$4 sm:$0xff]   ;;  %v2627_v15 = vld [vmem:[#allocation7 + $0xc0] ss:$16 sps:$4 sm:$0xff]   ;;  %v2663_v40 = vld [vmem:[#allocation7 + $0x4c] ss:$16 sps:$4 sm:$0xff]  }
 0x16a   :  { %700 = vmatprep.subr.bf16.mxu0 %v2613_v4  ;;  %v287_v13 = vld [vmem:[#allocation2 + $0x8] sm:$0xff]  ;;  %v2661_v41 = vld [vmem:[#allocation7 + $0x48] ss:$16 sps:$4 sm:$0xff]   ;;  %v2666_v42 = vld [vmem:[#allocation7 + $0x6c] ss:$16 sps:$4 sm:$0xff]   ;;  %vm1267_vm1 = vcmask 261120  }
 0x16b   :  { %v289_v14 = vpack.c.bf16 %v287_v13, %v287_v13  ;;  %v2628_v16 = vld [vmem:[#allocation7 + $0xe4] ss:$16 sps:$4 sm:$0xff]   ;;  %v2630_v17 = vld [vmem:[#allocation7 + $0xe0] ss:$16 sps:$4 sm:$0xff]   ;;  %v2664_v43 = vld [vmem:[#allocation7 + $0x68] ss:$16 sps:$4 sm:$0xff]  }
 0x16c   :  { %v2631_v18 = vld [vmem:[#allocation7 + $0x104] ss:$16 sps:$4 sm:$0xff]   ;;  %v2633_v19 = vld [vmem:[#allocation7 + $0x100] ss:$16 sps:$4 sm:$0xff]   ;;  %v2669_v44 = vld [vmem:[#allocation7 + $0x8c] ss:$16 sps:$4 sm:$0xff]  }
 0x16d   :  { %701 = vmatpush1.bf16.msra.mxu0 %v2615_v5  ;;  %728 = vmatprep.mubr.bf16.mxu0 %v289_v14  ;;  %v2634_v20 = vld [vmem:[#allocation7 + $0x124] ss:$16 sps:$4 sm:$0xff]   ;;  %v2636_v21 = vld [vmem:[#allocation7 + $0x120] ss:$16 sps:$4 sm:$0xff]   ;;  %v2667_v45 = vld [vmem:[#allocation7 + $0x88] ss:$16 sps:$4 sm:$0xff]  }
 0x16e   :  { %702 = vmatprep.subr.bf16.mxu0 %v2616_v6  ;;  %v2637_v22 = vld [vmem:[#allocation7 + $0x144] ss:$16 sps:$4 sm:$0xff]   ;;  %v2639_v23 = vld [vmem:[#allocation7 + $0x140] ss:$16 sps:$4 sm:$0xff]   ;;  %v2672_v46 = vld [vmem:[#allocation7 + $0xac] ss:$16 sps:$4 sm:$0xff]  }
 0x16f   :  { %v2640_v24 = vld [vmem:[#allocation7 + $0x164] ss:$16 sps:$4 sm:$0xff]   ;;  %v2642_v25 = vld [vmem:[#allocation7 + $0x160] ss:$16 sps:$4 sm:$0xff]   ;;  %v2670_v47 = vld [vmem:[#allocation7 + $0xa8] ss:$16 sps:$4 sm:$0xff]  }
 0x170   :  { %v2643_v26 = vld [vmem:[#allocation7 + $0x184] ss:$16 sps:$4 sm:$0xff]   ;;  %v2645_v27 = vld [vmem:[#allocation7 + $0x180] ss:$16 sps:$4 sm:$0xff]   ;;  %v2675_v48 = vld [vmem:[#allocation7 + $0xcc] ss:$16 sps:$4 sm:$0xff]  }
 0x171   :  { %703 = vmatpush1.bf16.msra.mxu0 %v2618_v7  ;;  %v2646_v28 = vld [vmem:[#allocation7 + $0x1a4] ss:$16 sps:$4 sm:$0xff]   ;;  %v2648_v29 = vld [vmem:[#allocation7 + $0x1a0] ss:$16 sps:$4 sm:$0xff]   ;;  %v2673_v49 = vld [vmem:[#allocation7 + $0xc8] ss:$16 sps:$4 sm:$0xff]  }
 0x172   :  { %704 = vmatprep.subr.bf16.mxu0 %v2619_v8  ;;  %v2649_v30 = vld [vmem:[#allocation7 + $0x1c4] ss:$16 sps:$4 sm:$0xff]   ;;  %v2651_v31 = vld [vmem:[#allocation7 + $0x1c0] ss:$16 sps:$4 sm:$0xff]   ;;  %v2678_v50 = vld [vmem:[#allocation7 + $0xec] ss:$16 sps:$4 sm:$0xff]  }
 0x173   :  { %v2652_v32 = vld [vmem:[#allocation7 + $0x1e4] ss:$16 sps:$4 sm:$0xff]   ;;  %v2654_v33 = vld [vmem:[#allocation7 + $0x1e0] ss:$16 sps:$4 sm:$0xff]   ;;  %v2676_v51 = vld [vmem:[#allocation7 + $0xe8] ss:$16 sps:$4 sm:$0xff]  }
 0x174   :  { %v2681_v52 = vld [vmem:[#allocation7 + $0x10c] ss:$16 sps:$4 sm:$0xff]   ;;  %v2679_v53 = vld [vmem:[#allocation7 + $0x108] ss:$16 sps:$4 sm:$0xff]   ;;  %s3393_s17 = smov 126   ;;  %vm2217_vm2 = vcmask 31744  }
 0x175   :  { %705 = vmatpush1.bf16.msra.mxu0 %v2621_v9  ;;  %v2684_v54 = vld [vmem:[#allocation7 + $0x12c] ss:$16 sps:$4 sm:$0xff]   ;;  %v2682_v55 = vld [vmem:[#allocation7 + $0x128] ss:$16 sps:$4 sm:$0xff]   ;;  %vm2219_vm3 = vcmask 48128   ;;  %vm2221_vm4 = vcmask 64512  }
 0x176   :  { %706 = vmatprep.subr.bf16.mxu0 %v2622_v10  ;;  %v2687_v56 = vld [vmem:[#allocation7 + $0x14c] ss:$16 sps:$4 sm:$0xff]   ;;  %v2685_v57 = vld [vmem:[#allocation7 + $0x148] ss:$16 sps:$4 sm:$0xff]  }
 0x177   :  { %v2690_v58 = vld [vmem:[#allocation7 + $0x16c] ss:$16 sps:$4 sm:$0xff]   ;;  %v2688_v59 = vld [vmem:[#allocation7 + $0x168] ss:$16 sps:$4 sm:$0xff]  }
 0x178   :  { %v2693_v60 = vld [vmem:[#allocation7 + $0x18c] ss:$16 sps:$4 sm:$0xff]   ;;  %v2691_v61 = vld [vmem:[#allocation7 + $0x188] ss:$16 sps:$4 sm:$0xff]  }
 0x179   :  { %707 = vmatpush1.bf16.msra.mxu0 %v2624_v11  ;;  %v2696_v62 = vld [vmem:[#allocation7 + $0x1ac] ss:$16 sps:$4 sm:$0xff]   ;;  %v2694_v63 = vld [vmem:[#allocation7 + $0x1a8] ss:$16 sps:$4 sm:$0xff]  }
 0x17a   :  { %708 = vmatprep.subr.bf16.mxu0 %v2625_v12  ;;  %v2699_v0 = vld [vmem:[#allocation7 + $0x1cc] ss:$16 sps:$4 sm:$0xff]   ;;  %v2697_v1 = vld [vmem:[#allocation7 + $0x1c8] ss:$16 sps:$4 sm:$0xff]  }
 0x17b   :  { %v2702_v2 = vld [vmem:[#allocation7 + $0x1ec] ss:$16 sps:$4 sm:$0xff]   ;;  %v2700_v3 = vld [vmem:[#allocation7 + $0x1e8] ss:$16 sps:$4 sm:$0xff]  }
 0x17c   :  { %v2703_v4 = vld [vmem:[#allocation10 + $0x40] sm:$0xff]   ;;  %v2705_v6 = vld [vmem:[#allocation10 + $0x48] sm:$0xff]   ;;  %v2707_v8 = vld [vmem:[#allocation10 + $0x50] sm:$0xff]  }
 0x17d   :  { %709 = vmatpush1.bf16.msra.mxu0 %v2627_v15  ;;  %v2704_v5 = vld [vmem:[#allocation10] sm:$0xff]   ;;  %v2706_v7 = vld [vmem:[#allocation10 + $0x8] sm:$0xff]   ;;  %v2708_v9 = vld [vmem:[#allocation10 + $0x10] sm:$0xff]  }
 0x17e   :  { %710 = vmatprep.subr.bf16.mxu0 %v2628_v16  ;;  %v2709_v10 = vld [vmem:[#allocation10 + $0x58] sm:$0xff]   ;;  %v2711_v12 = vld [vmem:[#allocation10 + $0x60] sm:$0xff]   ;;  %v2714_v15 = vld [vmem:[#allocation10 + $0x28] sm:$0xff]  }
 0x17f   :  { %v2710_v11 = vld [vmem:[#allocation10 + $0x18] sm:$0xff]   ;;  %v2712_v13 = vld [vmem:[#allocation10 + $0x20] sm:$0xff]   ;;  %v2715_v16 = vld [vmem:[#allocation10 + $0x70] sm:$0xff]  }
 0x180   :  { %v2733_v34 = vld [vmem:[#allocation10 + $0xf8] sm:$0xff]  }
 0x181   :  { %711 = vmatpush1.bf16.msra.mxu0 %v2630_v17  ;;  %v2716_v17 = vld [vmem:[#allocation10 + $0x30] sm:$0xff]  }
 0x182   :  { %712 = vmatprep.subr.bf16.mxu0 %v2631_v18  ;;  %v2717_v18 = vld [vmem:[#allocation10 + $0x78] sm:$0xff]  }
 0x185   :  { %713 = vmatpush1.bf16.msra.mxu0 %v2633_v19  ;;  %v2718_v19 = vld [vmem:[#allocation10 + $0x38] sm:$0xff]  }
 0x186   :  { %714 = vmatprep.subr.bf16.mxu0 %v2634_v20  ;;  %v2719_v20 = vld [vmem:[#allocation10 + $0xc0] sm:$0xff]  }
 0x187   :  { %2494 = vmatprep.subr.bf16.mxu1 %v2719_v20 }
 0x189   :  { %715 = vmatpush1.bf16.msra.mxu0 %v2636_v21  ;;  %v2720_v21 = vld [vmem:[#allocation10 + $0x80] sm:$0xff]  }
 0x18a   :  { %716 = vmatprep.subr.bf16.mxu0 %v2637_v22  ;;  %v2721_v22 = vld [vmem:[#allocation10 + $0xc8] sm:$0xff]   ;;  %2495 = vmatpush3.bf16.msra.mxu1 %v2720_v21 }
 0x18b   :  { %2496 = vmatprep.subr.bf16.mxu1 %v2721_v22 }
 0x18d   :  { %717 = vmatpush1.bf16.msra.mxu0 %v2639_v23  ;;  %v2722_v23 = vld [vmem:[#allocation10 + $0x88] sm:$0xff]  }
 0x18e   :  { %718 = vmatprep.subr.bf16.mxu0 %v2640_v24  ;;  %v2723_v24 = vld [vmem:[#allocation10 + $0xd0] sm:$0xff]   ;;  %2497 = vmatpush3.bf16.msra.mxu1 %v2722_v23 }
 0x18f   :  { %2498 = vmatprep.subr.bf16.mxu1 %v2723_v24 }
 0x191   :  { %719 = vmatpush1.bf16.msra.mxu0 %v2642_v25  ;;  %v2724_v25 = vld [vmem:[#allocation10 + $0x90] sm:$0xff]  }
 0x192   :  { %720 = vmatprep.subr.bf16.mxu0 %v2643_v26  ;;  %v2725_v26 = vld [vmem:[#allocation10 + $0xd8] sm:$0xff]   ;;  %2499 = vmatpush3.bf16.msra.mxu1 %v2724_v25 }
 0x193   :  { %2500 = vmatprep.subr.bf16.mxu1 %v2725_v26 }
 0x195   :  { %721 = vmatpush1.bf16.msra.mxu0 %v2645_v27  ;;  %v2726_v27 = vld [vmem:[#allocation10 + $0x98] sm:$0xff]  }
 0x196   :  { %722 = vmatprep.subr.bf16.mxu0 %v2646_v28  ;;  %v2727_v28 = vld [vmem:[#allocation10 + $0xe0] sm:$0xff]   ;;  %2501 = vmatpush3.bf16.msra.mxu1 %v2726_v27 }
 0x197   :  { %2502 = vmatprep.subr.bf16.mxu1 %v2727_v28  ;;  %v2744_v28 = vld [vmem:[#allocation16 + $0x8] sm:$0xff]  }
 0x199   :  { %723 = vmatpush1.bf16.msra.mxu0 %v2648_v29  ;;  %v2728_v29 = vld [vmem:[#allocation10 + $0xa0] sm:$0xff]  }
 0x19a   :  { %724 = vmatprep.subr.bf16.mxu0 %v2649_v30  ;;  %v2729_v30 = vld [vmem:[#allocation10 + $0xe8] sm:$0xff]   ;;  %2503 = vmatpush3.bf16.msra.mxu1 %v2728_v29  ;;  %v2358_v29 = vld [vmem:[#allocation14] ss:$0 sm:$0xff] }
 0x19b   :  { %2504 = vmatprep.subr.bf16.mxu1 %v2729_v30 }
 0x19d   :  { %725 = vmatpush1.bf16.msra.mxu0 %v2651_v31  ;;  %v2730_v31 = vld [vmem:[#allocation10 + $0xa8] sm:$0xff]  }
 0x19e   :  { %726 = vmatprep.subr.bf16.mxu0 %v2652_v32  ;;  %2505 = vmatpush3.bf16.msra.mxu1 %v2730_v31  ;;  %v2731_v32 = vld [vmem:[#allocation10 + $0xf0] sm:$0xff]  }
 0x19f   :  { %2506 = vmatprep.subr.bf16.mxu1 %v2731_v32 }
 0x1a1   :  { %727 = vmatpush1.bf16.msra.mxu0 %v2654_v33  ;;  %v2732_v33 = vld [vmem:[#allocation10 + $0xb0] sm:$0xff]  }
 0x1a2   :  { %737 = vmatprep.subr.bf16.mxu0 %v2657_v35  ;;  %2507 = vmatpush3.bf16.msra.mxu1 %v2732_v33  ;;  %v2734_v35 = vld [vmem:[#allocation10 + $0xb8] sm:$0xff]  }
 0x1a3   :  { %2508 = vmatprep.subr.bf16.mxu1 %v2733_v34 }
 0x1a4   :  { %729 = vmatmul.mubr.bf16.vlgmr.msra.gmra.mrb[0].mxu0 %v3737_v37 }
 0x1a5   :  { %738 = vmatpush1.bf16.msra.mxu0 %v2655_v36  ;;  %769 = vmatprep.mubr.bf16.mxu0 %v289_v14  ;;  %v2713_v14 = vld [vmem:[#allocation10 + $0x68] sm:$0xff]   ;;  %v356_v36 = vlaneseq }
 0x1a6   :  { %739 = vmatprep.subr.bf16.mxu0 %v2660_v38  ;;  %2509 = vmatpush3.bf16.msra.mxu1 %v2734_v35 }
 0x1a9   :  { %740 = vmatpush1.bf16.msra.mxu0 %v2658_v39  ;;  %v354_v39 = vld [vmem:[#allocation8] sm:$0xf] }
 0x1aa   :  { %741 = vmatprep.subr.bf16.mxu0 %v2663_v40 }
 0x1ad   :  { %742 = vmatpush1.bf16.msra.mxu0 %v2661_v41 }
 0x1ae   :  { %743 = vmatprep.subr.bf16.mxu0 %v2666_v42 }
 0x1b1   :  { %744 = vmatpush1.bf16.msra.mxu0 %v2664_v43 }
 0x1b2   :  { %745 = vmatprep.subr.bf16.mxu0 %v2669_v44 }
 0x1b5   :  { %746 = vmatpush1.bf16.msra.mxu0 %v2667_v45 }
 0x1b6   :  { %747 = vmatprep.subr.bf16.mxu0 %v2672_v46 }
 0x1b9   :  { %748 = vmatpush1.bf16.msra.mxu0 %v2670_v47 }
 0x1ba   :  { %749 = vmatprep.subr.bf16.mxu0 %v2675_v48 }
 0x1bd   :  { %750 = vmatpush1.bf16.msra.mxu0 %v2673_v49 }
 0x1be   :  { %751 = vmatprep.subr.bf16.mxu0 %v2678_v50 }
 0x1c1   :  { %752 = vmatpush1.bf16.msra.mxu0 %v2676_v51 }
 0x1c2   :  { %753 = vmatprep.subr.bf16.mxu0 %v2681_v52 }
 0x1c5   :  { %754 = vmatpush1.bf16.msra.mxu0 %v2679_v53 }
 0x1c6   :  { %755 = vmatprep.subr.bf16.mxu0 %v2684_v54 }
 0x1c9   :  { %756 = vmatpush1.bf16.msra.mxu0 %v2682_v55 }
 0x1ca   :  { %757 = vmatprep.subr.bf16.mxu0 %v2687_v56 }
 0x1cd   :  { %758 = vmatpush1.bf16.msra.mxu0 %v2685_v57 }
 0x1ce   :  { %759 = vmatprep.subr.bf16.mxu0 %v2690_v58 }
 0x1d1   :  { %760 = vmatpush1.bf16.msra.mxu0 %v2688_v59 }
 0x1d2   :  { %761 = vmatprep.subr.bf16.mxu0 %v2693_v60 }
 0x1d5   :  { %762 = vmatpush1.bf16.msra.mxu0 %v2691_v61 }
 0x1d6   :  { %763 = vmatprep.subr.bf16.mxu0 %v2696_v62 }
 0x1d9   :  { %764 = vmatpush1.bf16.msra.mxu0 %v2694_v63 }
 0x1da   :  { %765 = vmatprep.subr.bf16.mxu0 %v2699_v0 }
 0x1dd   :  { %766 = vmatpush1.bf16.msra.mxu0 %v2697_v1 }
 0x1de   :  { %767 = vmatprep.subr.bf16.mxu0 %v2702_v2 }
 0x1e1   :  { %768 = vmatpush1.bf16.msra.mxu0 %v2700_v3  ;;  %v2735_v3 = vld [vmem:[#allocation13] sm:$0xff]  }
 0x1e2   :  { %2472 = vmatprep.subr.bf16.mxu0 %v2703_v4  ;;  %v3389_v4 = vmov 0.0  }
 0x1e3   :  { %2551 = vmatprep.subr.bf16.mxu1 %v3389_v4 }
 0x1e4   :  { %770 = vmatmul.mubr.bf16.vlgmr.msra.gmra.mrb[4].mxu0 %v3737_v37  ;;  %v3741_v37 = vshrl.u32 %v356_v36, 7 }
 0x1e5   :  { %2473 = vmatpush3.bf16.msra.mxu0 %v2704_v5  ;;  %v2736_v5 = vld [vmem:[#allocation13 + $0x8] sm:$0xff]  }
 0x1e6   :  { %2474 = vmatprep.subr.bf16.mxu0 %v2705_v6  ;;  %v3744_v38 = vsub.s32 0, %v3741_v37  ;;  %v3747_v40 = vsub.s32 1, %v3741_v37  ;;  %v366_v53 = vsub.s32 2, %v3741_v37  ;;  %v370_v54 = vsub.s32 3, %v3741_v37  ;;  %v2737_v6 = vld [vmem:[#allocation13 + $0x10] sm:$0xff]  }
 0x1e8   :  { %v359_v41 = vrot.slane %v354_v39, %v3744_v38  ;;  %v363_v42 = vrot.slane %v354_v39, %v3747_v40  ;;  %v367_v55 = vrot.slane %v354_v39, %v366_v53  ;;  %v371_v56 = vrot.slane %v354_v39, %v370_v54  ;;  %v2367_v39 = vld [vmem:[#allocation17] ss:$0 sm:$0xff] }
 0x1e9   :  { %2475 = vmatpush3.bf16.msra.mxu0 %v2706_v7  ;;  %v2738_v7 = vld [vmem:[#allocation13 + $0x18] sm:$0xff]  }
 0x1ea   :  { %2476 = vmatprep.subr.bf16.mxu0 %v2707_v8  ;;  %v2739_v8 = vld [vmem:[#allocation13 + $0x20] sm:$0xff]  }
 0x1ed   :  { %2477 = vmatpush3.bf16.msra.mxu0 %v2708_v9  ;;  %v2740_v9 = vld [vmem:[#allocation13 + $0x28] sm:$0xff]  }
 0x1ee   :  { %2478 = vmatprep.subr.bf16.mxu0 %v2709_v10  ;;  %v2741_v10 = vld [vmem:[#allocation13 + $0x30] sm:$0xff]  }
 0x1f1   :  { %2479 = vmatpush3.bf16.msra.mxu0 %v2710_v11  ;;  %v2742_v11 = vld [vmem:[#allocation13 + $0x38] sm:$0xff]  }
 0x1f2   :  { %2480 = vmatprep.subr.bf16.mxu0 %v2711_v12  ;;  %v2743_v12 = vld [vmem:[#allocation16] sm:$0xff]  }
 0x1f5   :  { %2481 = vmatpush3.bf16.msra.mxu0 %v2712_v13 }
 0x1f6   :  { %2482 = vmatprep.subr.bf16.mxu0 %v2713_v14 }
 0x1f9   :  { %2483 = vmatpush3.bf16.msra.mxu0 %v2714_v15 }
 0x1fa   :  { %2484 = vmatprep.subr.bf16.mxu0 %v2715_v16 }
 0x1fd   :  { %2485 = vmatpush3.bf16.msra.mxu0 %v2716_v17 }
 0x1fe   :  { %2486 = vmatprep.subr.bf16.mxu0 %v2717_v18  ;;  %v2325_v18 = vld [vmem:[#allocation11] ss:$0 sm:$0xff] }
 0x201   :  { %2487 = vmatpush3.bf16.msra.mxu0 %v2718_v19 }
 0x202   :  { %2531 = vmatprep.subr.bf16.mxu0 %v3389_v4 }
 0x277   :  { %v730_v43 = vpop.f32.mrb[0].mxu0 }
 0x278   :  { %v731_v44 = vadd.f32 %v730_v43, %v359_v41  ;;  %v732_v45 = vpop.f32.mrb[1].mxu0 }
 0x279   :  { %v733_v46 = vadd.f32 %v732_v45, %v363_v42  ;;  %v734_v47 = vpop.f32.mrb[2].mxu0 }
 0x27a   :  { %v778_v48 = vmax.f32 %v731_v44, 0.0  ;;  %v735_v49 = vpop.f32.mrb[3].mxu0 }
 0x27b   :  { %v779_v50 = vmax.f32 %v733_v46, 0.0  ;;  %v3392_v49 = vmov 0  }
 0x27c   :  { %v782_v51 = vpack.c.bf16 %v778_v48, %v778_v48  ;;  %v3391_v48 = vmov 1   ;;  %2604 = vset.pattern.permute.xlu0 %v3392_v49 }
 0x27d   :  { %v783_v52 = vpack.c.bf16 %v779_v50, %v779_v50  ;;  %2605 = vset.pattern.permute.xlu1 %v3391_v48 }
 0x27f   :  { %1081 = vmatprep.mubr.bf16.mxu0 %v783_v52 }
 0x280   :  { %1082 = vmatmul.mubr.bf16.vlgmr.msra.gmra.mrb[8].mxu0 %v782_v51  ;;  %v1314_v51 = vld [vmem:[#allocation5] sm:$0xff] }
 0x281   :  { %2532 = vmatpush3.bf16.msra.mxu0 %v2735_v3  ;;  %2547 = vmatprep.mubr.msk.bf16.mxu0 %vm3390_vm0, %v3389_v4  ;;  %v2768_v3 = vld [vmem:[#allocation25 + $0x68] ss:$16 sps:$4 sm:$0xff]  }
 0x282   :  { %2533 = vmatprep.subr.bf16.mxu0 %v3389_v4 }
 0x285   :  { %2534 = vmatpush3.bf16.msra.mxu0 %v2736_v5  ;;  %v2774_v5 = vld [vmem:[#allocation25 + $0x88] ss:$16 sps:$4 sm:$0xff]  }
 0x286   :  { %2535 = vmatprep.subr.bf16.mxu0 %v3389_v4 }
 0x289   :  { %2536 = vmatpush3.bf16.msra.mxu0 %v2737_v6  ;;  %v2782_v6 = vld [vmem:[#allocation25 + $0xac] ss:$16 sps:$4 sm:$0xff]  }
 0x28a   :  { %2537 = vmatprep.subr.bf16.mxu0 %v3389_v4 }
 0x28d   :  { %2538 = vmatpush3.bf16.msra.mxu0 %v2738_v7  ;;  %v2780_v7 = vld [vmem:[#allocation25 + $0xa8] ss:$16 sps:$4 sm:$0xff]  }
 0x28e   :  { %2539 = vmatprep.subr.bf16.mxu0 %v3389_v4 }
 0x291   :  { %2540 = vmatpush3.bf16.msra.mxu0 %v2739_v8  ;;  %v2788_v8 = vld [vmem:[#allocation25 + $0xcc] ss:$16 sps:$4 sm:$0xff]  }
 0x292   :  { %2541 = vmatprep.subr.bf16.mxu0 %v3389_v4 }
 0x295   :  { %2542 = vmatpush3.bf16.msra.mxu0 %v2740_v9  ;;  %v2786_v9 = vld [vmem:[#allocation25 + $0xc8] ss:$16 sps:$4 sm:$0xff]  }
 0x296   :  { %2543 = vmatprep.subr.bf16.mxu0 %v3389_v4 }
 0x299   :  { %2544 = vmatpush3.bf16.msra.mxu0 %v2741_v10  ;;  %v1321_v10 = vld [vmem:[#allocation19] sm:$0x3] }
 0x29a   :  { %2545 = vmatprep.subr.bf16.mxu0 %v3389_v4 }
 0x29d   :  { %2546 = vmatpush3.bf16.msra.mxu0 %v2742_v11  ;;  %v1339_v11 = vrot.slane %v1321_v10, %v3747_v40 }
 0x2b7   :  { %v771_v57 = vpop.f32.mrb[4].mxu0 }
 0x2b8   :  { %v772_v58 = vadd.f32 %v771_v57, %v367_v55  ;;  %v773_v59 = vpop.f32.mrb[5].mxu0  ;;  %v2745_v57 = vld [vmem:[#allocation22] sm:$0xff]  }
 0x2b9   :  { %v774_v60 = vadd.f32 %v773_v59, %v371_v56  ;;  %v775_v61 = vpop.f32.mrb[6].mxu0  ;;  %v2749_v59 = vld [vmem:[#allocation25 + $0x4] ss:$16 sps:$4 sm:$0xff]  }
 0x2ba   :  { %v780_v62 = vmax.f32 %v772_v58, 0.0  ;;  %v776_v63 = vpop.f32.mrb[7].mxu0  ;;  %v2746_v58 = vld [vmem:[#allocation22 + $0x8] sm:$0xff]  }
 0x2bb   :  { %v781_v0 = vmax.f32 %v774_v60, 0.0  ;;  %v2750_v60 = vld [vmem:[#allocation25 + $0x8] ss:$16 sps:$4 sm:$0xff]   ;;  %v2752_v61 = vld [vmem:[#allocation25 + $0xc] ss:$16 sps:$4 sm:$0xff]  }
 0x2bc   :  { %v784_v2 = vpack.c.bf16 %v780_v62, %v780_v62  ;;  %v2758_v62 = vld [vmem:[#allocation25 + $0x2c] ss:$16 sps:$4 sm:$0xff]   ;;  %1675 = vmatprep.subr.bf16.mxu0 %v2752_v61  ;;  %v2756_v63 = vld [vmem:[#allocation25 + $0x28] ss:$16 sps:$4 sm:$0xff]  }
 0x2bd   :  { %v785_v1 = vpack.c.bf16 %v781_v0, %v781_v0  ;;  %v2764_v0 = vld [vmem:[#allocation25 + $0x4c] ss:$16 sps:$4 sm:$0xff]   ;;  %v2806_v61 = vld [vmem:[#allocation28 + $0x34] ss:$8 sps:$4 sm:$0xff]  }
 0x2bf   :  { %1121 = vmatprep.mubr.bf16.mxu1 %v785_v1  ;;  %v2762_v1 = vld [vmem:[#allocation25 + $0x48] ss:$16 sps:$4 sm:$0xff]  }
 0x2c0   :  { %1122 = vmatmul.mubr.bf16.vlgmr.msra.gmra.mrb[0].mxu1 %v784_v2  ;;  %v2770_v2 = vld [vmem:[#allocation25 + $0x6c] ss:$16 sps:$4 sm:$0xff]  }
 0x2c1   :  { %2555 = vmatprep.mubr.msk.bf16.mxu1 %vm3390_vm0, %v3389_v4  ;;  %2552 = vmatpush3.bf16.msra.mxu1 %v2743_v12  ;;  %v1330_v12 = vrot.slane %v1321_v10, %v3744_v38  ;;  %v2822_v10 = vld [vmem:[#allocation28 + $0x90] ss:$8 sps:$4 sm:$0xff]  }
 0x2c2   :  { %2553 = vmatprep.subr.bf16.mxu1 %v3389_v4 }
 0x2c5   :  { %2554 = vmatpush3.bf16.msra.mxu1 %v2744_v28  ;;  %v2761_v28 = vld [vmem:[#allocation25 + $0x44] ss:$16 sps:$4 sm:$0xff]  }
 0x2c6   :  { %2559 = vmatprep.subr.bf16.mxu1 %v3389_v4 }
 0x353   :  { %v2488_v13 = vpop.f32.mrb[8].mxu0 }
 0x354   :  { %v2489_v14 = vpop.f32.mrb[9].mxu0 }
 0x355   :  { %v2490_v15 = vadd.f32 %v2489_v14, %v2488_v13  ;;  %v2491_v16 = vpop.f32.mrb[10].mxu0 }
 0x356   :  { %v2492_v17 = vpop.f32.mrb[11].mxu0 }
 0x357   :  { %v1084_v21 = vadd.f32 %v2490_v15, %v2325_v18  ;;  %v2371_v17 = vld [vmem:[#allocation20] ss:$0 sm:$0xff] }
 0x393   :  { %v2510_v19 = vpop.f32.mrb[0].mxu1 }
 0x394   :  { %v2511_v20 = vpop.f32.mrb[1].mxu1 }
 0x395   :  { %v2512_v22 = vadd.f32 %v2511_v20, %v2510_v19  ;;  %v2513_v23 = vpop.f32.mrb[2].mxu1 }
 0x396   :  { %v2514_v24 = vpop.f32.mrb[3].mxu1 }
 0x397   :  { %v1124_v25 = vadd.f32 %v2512_v22, %v1084_v21  ;;  %v2747_v24 = vld [vmem:[#allocation25] ss:$16 sps:$4 sm:$0xff]  }
 0x399   :  { %v1129_v26 = vmax.f32 %v1124_v25, 0.0 }
 0x39b   :  { %v1130_v27 = vpack.c.bf16 %v1129_v26, %v1129_v26  ;;  %v2755_v26 = vld [vmem:[#allocation25 + $0x24] ss:$16 sps:$4 sm:$0xff]  }
 0x39d   :  { %2548 = vmatmul.mubr.bf16.vlgmr.msra.gmra.mrb[12].mxu0 %v1130_v27  ;;  %v2753_v27 = vld [vmem:[#allocation25 + $0x20] ss:$16 sps:$4 sm:$0xff]  }
 0x39e   :  { %1707 = vmatprep.mubr.bf16.mxu0 %v3392_v49  ;;  %1676 = vmatpush1.bf16.msra.mxu0 %v2750_v60  ;;  %v2801_v60 = vld [vmem:[#allocation28 + $0x20] ss:$8 sps:$4 sm:$0xff]  }
 0x39f   :  { %1677 = vmatprep.subr.bf16.mxu0 %v2758_v62  ;;  %v2804_v62 = vld [vmem:[#allocation28 + $0x30] ss:$8 sps:$4 sm:$0xff]  }
 0x3a2   :  { %1678 = vmatpush1.bf16.msra.mxu0 %v2756_v63  ;;  %v2809_v63 = vld [vmem:[#allocation28 + $0x44] ss:$8 sps:$4 sm:$0xff]  }
 0x3a3   :  { %1679 = vmatprep.subr.bf16.mxu0 %v2764_v0  ;;  %v2807_v0 = vld [vmem:[#allocation28 + $0x40] ss:$8 sps:$4 sm:$0xff]  }
 0x3a6   :  { %1680 = vmatpush1.bf16.msra.mxu0 %v2762_v1  ;;  %v2812_v1 = vld [vmem:[#allocation28 + $0x54] ss:$8 sps:$4 sm:$0xff]  }
 0x3a7   :  { %1681 = vmatprep.subr.bf16.mxu0 %v2770_v2  ;;  %v2810_v2 = vld [vmem:[#allocation28 + $0x50] ss:$8 sps:$4 sm:$0xff]  }
 0x3aa   :  { %1682 = vmatpush1.bf16.msra.mxu0 %v2768_v3  ;;  %v2815_v3 = vld [vmem:[#allocation28 + $0x64] ss:$8 sps:$4 sm:$0xff]  }
 0x470   :  { %v1236_v30 = vpop.f32.mrb[12].mxu0 }
 0x471   :  { %v1237_v31 = vadd.f32 %v2358_v29, %v1236_v30  ;;  %v2549_v32 = vpop.f32.mrb[13].mxu0  ;;  %v2759_v29 = vld [vmem:[#allocation25 + $0x40] ss:$16 sps:$4 sm:$0xff]   ;;  %v2767_v30 = vld [vmem:[#allocation25 + $0x64] ss:$16 sps:$4 sm:$0xff]  }
 0x472   :  { %v1239_v33 = vpop.f32.mrb[14].mxu0  ;;  %v2773_v32 = vld [vmem:[#allocation25 + $0x84] ss:$16 sps:$4 sm:$0xff]  }
 0x473   :  { %v1242_v34 = vmax.f32 %v1237_v31, 0.0  ;;  %v2550_v35 = vpop.f32.mrb[15].mxu0  ;;  %v2765_v31 = vld [vmem:[#allocation25 + $0x60] ss:$16 sps:$4 sm:$0xff]  }
 0x474   :  { %v2771_v33 = vld [vmem:[#allocation25 + $0x80] ss:$16 sps:$4 sm:$0xff]  }
 0x475   :  { %v1243_v36 = vpack.c.bf16 %v1242_v34, %v1242_v34  ;;  %v2779_v34 = vld [vmem:[#allocation25 + $0xa4] ss:$16 sps:$4 sm:$0xff]   ;;  %v2777_v35 = vld [vmem:[#allocation25 + $0xa0] ss:$16 sps:$4 sm:$0xff]  }
 0x477   :  { %2556 = vmatmul.mubr.msk.bf16.vlgmr.msra.gmra.mrb[4].mxu1 %vm1267_vm1, %v1243_v36  ;;  %v2785_v36 = vld [vmem:[#allocation25 + $0xc4] ss:$16 sps:$4 sm:$0xff]  }
 0x478   :  { %2563 = vmatprep.mubr.msk.bf16.mxu1 %vm3390_vm0, %v3389_v4  ;;  %2560 = vmatpush3.bf16.msra.mxu1 %v2745_v57  ;;  %v2800_v57 = vld [vmem:[#allocation28 + $0x14] ss:$8 sps:$4 sm:$0xff]  }
 0x479   :  { %2561 = vmatprep.subr.bf16.mxu1 %v3389_v4  ;;  %v2776_v4 = vld [vmem:[#allocation25 + $0x8c] ss:$16 sps:$4 sm:$0xff]  }
 0x47a   :  { %1683 = vmatprep.subr.bf16.mxu0 %v2776_v4  ;;  %v2813_v4 = vld [vmem:[#allocation28 + $0x60] ss:$8 sps:$4 sm:$0xff]  }
 0x47b   :  { %1684 = vmatpush1.bf16.msra.mxu0 %v2774_v5  ;;  %v2818_v5 = vld [vmem:[#allocation28 + $0x74] ss:$8 sps:$4 sm:$0xff]  }
 0x47c   :  { %2562 = vmatpush3.bf16.msra.mxu1 %v2746_v58  ;;  %1685 = vmatprep.subr.bf16.mxu0 %v2782_v6  ;;  %v2798_v58 = vld [vmem:[#allocation28 + $0x10] ss:$8 sps:$4 sm:$0xff]  }
 0x47d   :  { %1634 = vmatprep.subr.bf16.mxu1 %v2749_v59  ;;  %v2803_v59 = vld [vmem:[#allocation28 + $0x24] ss:$8 sps:$4 sm:$0xff]   ;;  %v2816_v6 = vld [vmem:[#allocation28 + $0x70] ss:$8 sps:$4 sm:$0xff]  }
 0x47f   :  { %1686 = vmatpush1.bf16.msra.mxu0 %v2780_v7  ;;  %v2821_v7 = vld [vmem:[#allocation28 + $0x84] ss:$8 sps:$4 sm:$0xff]  }
 0x480   :  { %1687 = vmatprep.subr.bf16.mxu0 %v2788_v8  ;;  %v2819_v8 = vld [vmem:[#allocation28 + $0x80] ss:$8 sps:$4 sm:$0xff]  }
 0x483   :  { %1688 = vmatpush1.bf16.msra.mxu0 %v2786_v9  ;;  %v2824_v9 = vld [vmem:[#allocation28 + $0x94] ss:$8 sps:$4 sm:$0xff]  }
 0x54a   :  { %v1305_v41 = vpop.f32.mrb[4].mxu1 }
 0x54b   :  { %v3775_v42 = vadd.f32 %v2367_v39, %v1305_v41  ;;  %v2557_v43 = vpop.f32.mrb[5].mxu1  ;;  %v2783_v39 = vld [vmem:[#allocation25 + $0xc0] ss:$16 sps:$4 sm:$0xff]   ;;  %v2791_v41 = vld [vmem:[#allocation25 + $0xe4] ss:$16 sps:$4 sm:$0xff]  }
 0x54c   :  { %v1308_v44 = vpop.f32.mrb[6].mxu1  ;;  %v2789_v43 = vld [vmem:[#allocation25 + $0xe0] ss:$16 sps:$4 sm:$0xff]  }
 0x54d   :  { %v1311_v45 = vmul.f32 0.5, %v3775_v42  ;;  %v2558_v46 = vpop.f32.mrb[7].mxu1  ;;  %v2792_v44 = vld [vmem:[#allocation25 + $0xe8] ss:$16 sps:$4 sm:$0xff]  }
 0x54e   :  { %v2372_v46 = vld [vmem:[#allocation23] ss:$0 sm:$0xff] }
 0x54f   :  { %v1312_v47 = vmul.f32 1.442695, %v1311_v45  ;;  %v2797_v45 = vld [vmem:[#allocation28 + $0x4] ss:$8 sps:$4 sm:$0xff]  }
 0x551   :  { %2891 = vpow2.f32 %v1312_v47 }
 0x55b   :  { %v2892_v50 = vpop.eup %2891 }
 0x55c   :  { %1316 = vrot.lane.b32.xlu0 %v2892_v50, %s3393_s17 }
 0x5ce   :  { %v1317_v52 = vpop.permute.xlu0 %1316 }
 0x5cf   :  { %v1319_v55 = vmul.f32 %v1317_v52, %v1314_v51 }
 0x5d1   :  { %v1320_v56 = vadd.f32 %v1319_v55, %v3775_v42  ;;  %v2795_v55 = vld [vmem:[#allocation28] ss:$8 sps:$4 sm:$0xff]  }
 0x5d3   :  { %1333 = vperm.xlu1 %2605, %v1320_v56   ;;  %1324 = vperm.xlu0 %2604, %v1320_v56  }
 0x5d7   :  { %2214 = vrot.lane.b32.xlu1 %v1320_v56, %s3379_s3  ;;  %2606 = vset.pattern.permute.xlu0 %v3391_v48  ;;  %s3394_s3 = smov [#allocation32]  }
 0x5d8   :  { %s2239_s12 = sshll.u32 %s3394_s3, 4  ;;  %s2240_s12 = int_to_ptr.vmem [resolvable:$true] %s2239_s12 }
 0x5d9   :  { %s3297_s30 = scalar_lea.vmem %s2240_s12, 128  ;;  %p3302_p5 = scmp.lt.s32.totalorder %s2240_s12, %s2240_s12 }
 0x5da   :  { %p3298_p4 = scmp.ne.s32.totalorder %s2240_s12, %s3297_s30  ;;  %p3303_p6 = scmp.lt.s32.totalorder %s3297_s30, %s3297_s30 }
 0x5dc   :  { %p3304_p7 = por %p3303_p6, %p3302_p5 }
 0x5de   :  { %p3305_p8 = pnand %p3304_p7, %p3298_p4 }
 0x652   :  { %v1334_v13 = vpop.permute.xlu1 %1333  ;;  %v1325_v14 = vpop.permute.xlu0 %1324 }
 0x653   :  { %v1340_v15 = vmul.f32 %v1339_v11, %v1334_v13  ;;  %v1331_v16 = vmul.f32 %v1330_v12, %v1325_v14  ;;  %v2827_v11 = vld [vmem:[#allocation28 + $0xa4] ss:$8 sps:$4 sm:$0xff]   ;;  %v2825_v12 = vld [vmem:[#allocation28 + $0xa0] ss:$8 sps:$4 sm:$0xff]   ;;  %v2830_v13 = vld [vmem:[#allocation28 + $0xb4] ss:$8 sps:$4 sm:$0xff]  }
 0x654   :  { %v2828_v14 = vld [vmem:[#allocation28 + $0xb0] ss:$8 sps:$4 sm:$0xff]  }
 0x655   :  { %v1341_v18 = vadd.f32 %v1340_v15, %v1331_v16  ;;  %v2833_v15 = vld [vmem:[#allocation28 + $0xc4] ss:$8 sps:$4 sm:$0xff]   ;;  %v2831_v16 = vld [vmem:[#allocation28 + $0xc0] ss:$8 sps:$4 sm:$0xff]  }
 0x656   :  { %v2215_v19 = vpop.permute.xlu1 %2214 }
 0x657   :  { %v1349_v20 = vadd.f32 %v2371_v17, %v1341_v18  ;;  %v2218_v21 = vsel %vm2217_vm2, %v3775_v42, %v2215_v19  ;;  %v2794_v42 = vld [vmem:[#allocation25 + $0xec] ss:$16 sps:$4 sm:$0xff]   ;;  %v2836_v17 = vld [vmem:[#allocation28 + $0xd4] ss:$8 sps:$4 sm:$0xff]   ;;  %v2839_v19 = vld [vmem:[#allocation28 + $0xe4] ss:$8 sps:$4 sm:$0xff]  }
 0x658   :  { %v2220_v22 = vsel %vm2219_vm3, %v2218_v21, 0.0  ;;  %1689 = vmatprep.subr.bf16.mxu0 %v2794_v42  ;;  %v2834_v18 = vld [vmem:[#allocation28 + $0xd0] ss:$8 sps:$4 sm:$0xff]   ;;  %v2842_v21 = vld [vmem:[#allocation28 + $0xf4] ss:$8 sps:$4 sm:$0xff]  }
 0x659   :  { %v1350_v23 = vmax.f32 %v1349_v20, 0.0  ;;  %2222 = vst.msk [vmem:[#allocation32] sm:$0xff] %vm2221_vm4, %v2220_v22  ;;  %1690 = vmatpush1.bf16.msra.mxu0 %v2792_v44  ;;  %v2837_v20 = vld [vmem:[#allocation28 + $0xe0] ss:$8 sps:$4 sm:$0xff]   ;;  %v2840_v22 = vld [vmem:[#allocation28 + $0xf0] ss:$8 sps:$4 sm:$0xff]  }
 0x65b   :  { %v1351_v25 = vpack.c.bf16 %v1350_v23, %v1350_v23  ;;  %v2845_v23 = vld [vmem:[#allocation28 + $0x104] ss:$8 sps:$4 sm:$0xff]  }
 0x65d   :  { %2564 = vmatmul.mubr.msk.bf16.vlgmr.msra.gmra.mrb[8].mxu1 %vm1267_vm1, %v1351_v25 }
 0x65e   :  { %1635 = vmatpush1.bf16.msra.mxu1 %v2747_v24  ;;  %1666 = vmatprep.mubr.bf16.mxu1 %v3392_v49  ;;  %v3788_v24 = vld [vmem:[#allocation26] sm:$0xf] }
 0x65f   :  { %1636 = vmatprep.subr.bf16.mxu1 %v2755_v26  ;;  %v1457_v25 = vrot.slane %v3788_v24, %v3744_v38  ;;  %v1461_v26 = vrot.slane %v3788_v24, %v3747_v40 }
 0x662   :  { %1637 = vmatpush1.bf16.msra.mxu1 %v2753_v27  ;;  %v1469_v27 = vrot.slane %v3788_v24, %v370_v54 }
 0x663   :  { %1638 = vmatprep.subr.bf16.mxu1 %v2761_v28 }
 0x666   :  { %1639 = vmatpush1.bf16.msra.mxu1 %v2759_v29 }
 0x667   :  { %1640 = vmatprep.subr.bf16.mxu1 %v2767_v30 }
 0x66a   :  { %1641 = vmatpush1.bf16.msra.mxu1 %v2765_v31 }
 0x66b   :  { %1642 = vmatprep.subr.bf16.mxu1 %v2773_v32 }
 0x66e   :  { %1643 = vmatpush1.bf16.msra.mxu1 %v2771_v33 }
 0x66f   :  { %1644 = vmatprep.subr.bf16.mxu1 %v2779_v34 }
 0x672   :  { %1645 = vmatpush1.bf16.msra.mxu1 %v2777_v35 }
 0x673   :  { %1646 = vmatprep.subr.bf16.mxu1 %v2785_v36 }
 0x676   :  { %1647 = vmatpush1.bf16.msra.mxu1 %v2783_v39 }
 0x677   :  { %1648 = vmatprep.subr.bf16.mxu1 %v2791_v41 }
 0x67a   :  { %1649 = vmatpush1.bf16.msra.mxu1 %v2789_v43 }
 0x67b   :  { %2120 = vmatprep.subr.bf16.mxu1 %v2797_v45 }
 0x730   :  { %v1412_v47 = vpop.f32.mrb[8].mxu1 }
 0x731   :  { %v1413_v48 = vadd.f32 %v2372_v46, %v1412_v47  ;;  %v2565_v49 = vpop.f32.mrb[9].mxu1  ;;  %v2843_v46 = vld [vmem:[#allocation28 + $0x100] ss:$8 sps:$4 sm:$0xff]  }
 0x732   :  { %v1415_v50 = vpop.f32.mrb[10].mxu1  ;;  %v2846_v49 = vld [vmem:[#allocation28 + $0x110] ss:$8 sps:$4 sm:$0xff]  }
 0x733   :  { %v1418_v51 = vmax.f32 %v1413_v48, 0.0  ;;  %v2566_v52 = vpop.f32.mrb[11].mxu1  ;;  %v2848_v48 = vld [vmem:[#allocation28 + $0x114] ss:$8 sps:$4 sm:$0xff]   ;;  %v2851_v50 = vld [vmem:[#allocation28 + $0x124] ss:$8 sps:$4 sm:$0xff]  }
 0x734   :  { %v2854_v52 = vld [vmem:[#allocation28 + $0x134] ss:$8 sps:$4 sm:$0xff]  }
 0x735   :  { %v1419_v56 = vpack.c.bf16 %v1418_v51, %v1418_v51  ;;  %v2849_v51 = vld [vmem:[#allocation28 + $0x120] ss:$8 sps:$4 sm:$0xff]  }
 0x737   :  { %1667 = vmatmul.mubr.bf16.vlgmr.msra.gmra.mrb[12].mxu1 %v1419_v56  ;;  %1708 = vmatmul.mubr.bf16.vlgmr.msra.gmra.mrb[16].mxu0 %v1419_v56  ;;  %v2857_v56 = vld [vmem:[#allocation28 + $0x144] ss:$8 sps:$4 sm:$0xff]  }
 0x738   :  { %2121 = vmatpush1.bf16.msra.mxu1 %v2795_v55  ;;  %v2852_v55 = vld [vmem:[#allocation28 + $0x130] ss:$8 sps:$4 sm:$0xff]  }
 0x739   :  { %2122 = vmatprep.subr.bf16.mxu1 %v2800_v57  ;;  %v2855_v57 = vld [vmem:[#allocation28 + $0x140] ss:$8 sps:$4 sm:$0xff]  }
 0x73c   :  { %2123 = vmatpush1.bf16.msra.mxu1 %v2798_v58  ;;  %v2860_v58 = vld [vmem:[#allocation28 + $0x154] ss:$8 sps:$4 sm:$0xff]  }
 0x73d   :  { %2124 = vmatprep.subr.bf16.mxu1 %v2803_v59  ;;  %v2858_v59 = vld [vmem:[#allocation28 + $0x150] ss:$8 sps:$4 sm:$0xff]  }
 0x740   :  { %2125 = vmatpush1.bf16.msra.mxu1 %v2801_v60  ;;  %v2863_v60 = vld [vmem:[#allocation28 + $0x164] ss:$8 sps:$4 sm:$0xff]  }
 0x741   :  { %2126 = vmatprep.subr.bf16.mxu1 %v2806_v61  ;;  %v2861_v61 = vld [vmem:[#allocation28 + $0x160] ss:$8 sps:$4 sm:$0xff]  }
 0x744   :  { %2127 = vmatpush1.bf16.msra.mxu1 %v2804_v62  ;;  %v2866_v62 = vld [vmem:[#allocation28 + $0x174] ss:$8 sps:$4 sm:$0xff]  }
 0x745   :  { %2128 = vmatprep.subr.bf16.mxu1 %v2809_v63  ;;  %v2864_v63 = vld [vmem:[#allocation28 + $0x170] ss:$8 sps:$4 sm:$0xff]  }
 0x748   :  { %2129 = vmatpush1.bf16.msra.mxu1 %v2807_v0  ;;  %v2869_v0 = vld [vmem:[#allocation28 + $0x184] ss:$8 sps:$4 sm:$0xff]  }
 0x749   :  { %2130 = vmatprep.subr.bf16.mxu1 %v2812_v1  ;;  %v2867_v1 = vld [vmem:[#allocation28 + $0x180] ss:$8 sps:$4 sm:$0xff]  }
 0x74c   :  { %2131 = vmatpush1.bf16.msra.mxu1 %v2810_v2  ;;  %v2872_v2 = vld [vmem:[#allocation28 + $0x194] ss:$8 sps:$4 sm:$0xff]  }
 0x74d   :  { %2132 = vmatprep.subr.bf16.mxu1 %v2815_v3  ;;  %v2870_v3 = vld [vmem:[#allocation28 + $0x190] ss:$8 sps:$4 sm:$0xff]  }
 0x750   :  { %2133 = vmatpush1.bf16.msra.mxu1 %v2813_v4  ;;  %v2875_v4 = vld [vmem:[#allocation28 + $0x1a4] ss:$8 sps:$4 sm:$0xff]  }
 0x751   :  { %2134 = vmatprep.subr.bf16.mxu1 %v2818_v5  ;;  %v2873_v5 = vld [vmem:[#allocation28 + $0x1a0] ss:$8 sps:$4 sm:$0xff]  }
 0x754   :  { %2135 = vmatpush1.bf16.msra.mxu1 %v2816_v6  ;;  %v2878_v6 = vld [vmem:[#allocation28 + $0x1b4] ss:$8 sps:$4 sm:$0xff]  }
 0x755   :  { %2136 = vmatprep.subr.bf16.mxu1 %v2821_v7  ;;  %v2876_v7 = vld [vmem:[#allocation28 + $0x1b0] ss:$8 sps:$4 sm:$0xff]  }
 0x758   :  { %2137 = vmatpush1.bf16.msra.mxu1 %v2819_v8  ;;  %v2881_v8 = vld [vmem:[#allocation28 + $0x1c4] ss:$8 sps:$4 sm:$0xff]  }
 0x759   :  { %2138 = vmatprep.subr.bf16.mxu1 %v2824_v9  ;;  %v2879_v9 = vld [vmem:[#allocation28 + $0x1c0] ss:$8 sps:$4 sm:$0xff]  }
 0x75c   :  { %2139 = vmatpush1.bf16.msra.mxu1 %v2822_v10  ;;  %v2884_v10 = vld [vmem:[#allocation28 + $0x1d4] ss:$8 sps:$4 sm:$0xff]  }
 0x75d   :  { %2140 = vmatprep.subr.bf16.mxu1 %v2827_v11  ;;  %v2882_v11 = vld [vmem:[#allocation28 + $0x1d0] ss:$8 sps:$4 sm:$0xff]  }
 0x760   :  { %2141 = vmatpush1.bf16.msra.mxu1 %v2825_v12  ;;  %v1465_v12 = vrot.slane %v3788_v24, %v366_v53 }
 0x761   :  { %2142 = vmatprep.subr.bf16.mxu1 %v2830_v13  ;;  %v2887_v13 = vld [vmem:[#allocation28 + $0x1e4] ss:$8 sps:$4 sm:$0xff]  }
 0x764   :  { %2143 = vmatpush1.bf16.msra.mxu1 %v2828_v14  ;;  %v2885_v14 = vld [vmem:[#allocation28 + $0x1e0] ss:$8 sps:$4 sm:$0xff]  }
 0x765   :  { %2144 = vmatprep.subr.bf16.mxu1 %v2833_v15 }
 0x768   :  { %2145 = vmatpush1.bf16.msra.mxu1 %v2831_v16  ;;  %v2890_v16 = vld [vmem:[#allocation28 + $0x1f4] ss:$8 sps:$4 sm:$0xff]  }
 0x769   :  { %2146 = vmatprep.subr.bf16.mxu1 %v2836_v17  ;;  %v2888_v17 = vld [vmem:[#allocation28 + $0x1f0] ss:$8 sps:$4 sm:$0xff]  }
 0x76c   :  { %2147 = vmatpush1.bf16.msra.mxu1 %v2834_v18 }
 0x76d   :  { %2148 = vmatprep.subr.bf16.mxu1 %v2839_v19 }
 0x770   :  { %2149 = vmatpush1.bf16.msra.mxu1 %v2837_v20 }
 0x771   :  { %2150 = vmatprep.subr.bf16.mxu1 %v2842_v21 }
 0x774   :  { %2151 = vmatpush1.bf16.msra.mxu1 %v2840_v22 }
 0x775   :  { %2161 = vmatprep.subr.bf16.mxu1 %v2845_v23 }
 0x80a   :  { %v1668_v28 = vpop.f32.mrb[12].mxu1  ;;  %v3797_v29 = vpop.f32.mrb[16].mxu0 }
 0x80b   :  { %v1669_v30 = vadd.f32 %v1668_v28, %v1457_v25  ;;  %v1670_v31 = vpop.f32.mrb[13].mxu1  ;;  %v1711_v32 = vpop.f32.mrb[17].mxu0  ;;  %v1710_v15 = vadd.f32 %v3797_v29, %v1465_v12 }
 0x80c   :  { %v1671_v33 = vadd.f32 %v1670_v31, %v1461_v26  ;;  %v1712_v34 = vadd.f32 %v1711_v32, %v1469_v27  ;;  %v1672_v35 = vpop.f32.mrb[14].mxu1  ;;  %v1713_v36 = vpop.f32.mrb[18].mxu0 }
 0x80d   :  { %v1716_v39 = vmax.f32 %v1669_v30, 0.0  ;;  %v1673_v41 = vpop.f32.mrb[15].mxu1  ;;  %v1714_v42 = vpop.f32.mrb[19].mxu0  ;;  %v1718_v18 = vmax.f32 %v1710_v15, 0.0 }
 0x80e   :  { %v1717_v43 = vmax.f32 %v1671_v33, 0.0  ;;  %v1719_v44 = vmax.f32 %v1712_v34, 0.0 }
 0x80f   :  { %v1720_v47 = vpack.c.bf16 %v1716_v39, %v1716_v39  ;;  %v1722_v19 = vpack.c.bf16 %v1718_v18, %v1718_v18 }
 0x810   :  { %v1721_v45 = vpack.c.bf16 %v1717_v43, %v1717_v43  ;;  %v1723_v54 = vpack.c.bf16 %v1719_v44, %v1719_v44 }
 0x812   :  { %2152 = vmatprep.mubr.bf16.mxu1 %v1721_v45 }
 0x813   :  { %2153 = vmatmul.mubr.bf16.vlgmr.msra.gmra.mrb[16].mxu1 %v1720_v47 }
 0x814   :  { %2162 = vmatpush1.bf16.msra.mxu1 %v2843_v46  ;;  %2193 = vmatprep.mubr.bf16.mxu1 %v1723_v54 }
 0x815   :  { %2163 = vmatprep.subr.bf16.mxu1 %v2848_v48 }
 0x818   :  { %2164 = vmatpush1.bf16.msra.mxu1 %v2846_v49 }
 0x819   :  { %2165 = vmatprep.subr.bf16.mxu1 %v2851_v50 }
 0x81c   :  { %2166 = vmatpush1.bf16.msra.mxu1 %v2849_v51 }
 0x81d   :  { %2167 = vmatprep.subr.bf16.mxu1 %v2854_v52 }
 0x820   :  { %2168 = vmatpush1.bf16.msra.mxu1 %v2852_v55 }
 0x821   :  { %2169 = vmatprep.subr.bf16.mxu1 %v2857_v56 }
 0x824   :  { %2170 = vmatpush1.bf16.msra.mxu1 %v2855_v57 }
 0x825   :  { %2171 = vmatprep.subr.bf16.mxu1 %v2860_v58 }
 0x828   :  { %2172 = vmatpush1.bf16.msra.mxu1 %v2858_v59 }
 0x829   :  { %2173 = vmatprep.subr.bf16.mxu1 %v2863_v60 }
 0x82c   :  { %2174 = vmatpush1.bf16.msra.mxu1 %v2861_v61 }
 0x82d   :  { %2175 = vmatprep.subr.bf16.mxu1 %v2866_v62 }
 0x830   :  { %2176 = vmatpush1.bf16.msra.mxu1 %v2864_v63 }
 0x831   :  { %2177 = vmatprep.subr.bf16.mxu1 %v2869_v0 }
 0x834   :  { %2178 = vmatpush1.bf16.msra.mxu1 %v2867_v1 }
 0x835   :  { %2179 = vmatprep.subr.bf16.mxu1 %v2872_v2 }
 0x838   :  { %2180 = vmatpush1.bf16.msra.mxu1 %v2870_v3 }
 0x839   :  { %2181 = vmatprep.subr.bf16.mxu1 %v2875_v4 }
 0x83c   :  { %2182 = vmatpush1.bf16.msra.mxu1 %v2873_v5 }
 0x83d   :  { %2183 = vmatprep.subr.bf16.mxu1 %v2878_v6 }
 0x840   :  { %2184 = vmatpush1.bf16.msra.mxu1 %v2876_v7 }
 0x841   :  { %2185 = vmatprep.subr.bf16.mxu1 %v2881_v8 }
 0x844   :  { %2186 = vmatpush1.bf16.msra.mxu1 %v2879_v9 }
 0x845   :  { %2187 = vmatprep.subr.bf16.mxu1 %v2884_v10 }
 0x848   :  { %2188 = vmatpush1.bf16.msra.mxu1 %v2882_v11 }
 0x849   :  { %2189 = vmatprep.subr.bf16.mxu1 %v2887_v13 }
 0x84c   :  { %2190 = vmatpush1.bf16.msra.mxu1 %v2885_v14 }
 0x84d   :  { %2191 = vmatprep.subr.bf16.mxu1 %v2890_v16 }
 0x850   :  { %2192 = vmatpush1.bf16.msra.mxu1 %v2888_v17 }
 0x853   :  { %2194 = vmatmul.mubr.bf16.vlgmr.msra.gmra.mrb[16].mxu1 %v1722_v19 }
 0x854   :  { %3308 = shalt.err (!%p3305_p8)
}
 0x855   :  { %s3309_s29 = scalar_lea.hbm %s3848_s19, 128 }
 0x856   :  { %p3310_p9 = scmp.ne.s32.totalorder %s3848_s19, %s3309_s29  ;;  %p3313_p10 = scmp.lt.u32.totalorder %s3309_s29, %s3848_s19 }
 0x858   :  { %p3315_p11 = pnand %p3313_p10, %p3310_p9 }
 0x85a   :  { %3318 = shalt.err (!%p3315_p11)
}
 0x85b   :  { %2242 = dma.vmem_to_hbm [thread:$0]  %s2240_s12, 128, %s3848_s19, [#allocation33]   ;;  %v1788_v37 = vld [vmem:[#allocation29] sm:$0x3] }
 0x85c   :  { %v1793_v53 = vrot.slane %v1788_v37, %v3744_v38  ;;  %v1797_v20 = vrot.slane %v1788_v37, %v3747_v40  ;;  %s3395_s19 = smov [#allocation31]  }
 0x85d   :  { %s2229_s14 = sshll.u32 %s3395_s19, 4  ;;  %s2230_s14 = int_to_ptr.vmem [resolvable:$true] %s2229_s14 }
 0x85e   :  { %s3319_s28 = scalar_lea.vmem %s2230_s14, 256  ;;  %p3324_p13 = scmp.lt.s32.totalorder %s2230_s14, %s2230_s14 }
 0x85f   :  { %p3320_p12 = scmp.ne.s32.totalorder %s2230_s14, %s3319_s28  ;;  %p3325_p0 = scmp.lt.s32.totalorder %s3319_s28, %s3319_s28 }
 0x861   :  { %p3326_p1 = por %p3325_p0, %p3324_p13 }
 0x863   :  { %p3327_p2 = pnand %p3326_p1, %p3320_p12 }
 0x926   :  { %v2195_v21 = vpop.f32.mrb[16].mxu1 }
 0x927   :  { %v2567_v22 = vadd.f32 %v2195_v21, %v1793_v53  ;;  %v2197_v23 = vpop.f32.mrb[17].mxu1 }
 0x928   :  { %v2568_v24 = vadd.f32 %v2197_v23, %v1797_v20  ;;  %v2199_v25 = vpop.f32.mrb[18].mxu1 }
 0x929   :  { %v2202_v26 = vsub.f32 0.0, %v2567_v22  ;;  %v2200_v27 = vpop.f32.mrb[19].mxu1 }
 0x92a   :  { %v2203_v28 = vsub.f32 0.0, %v2568_v24 }
 0x92b   :  { %v2204_v29 = vmul.f32 1.442695, %v2202_v26 }
 0x92c   :  { %v2206_v30 = vmul.f32 1.442695, %v2203_v28 }
 0x92d   :  { %2893 = vpow2.f32 %v2204_v29 }
 0x92e   :  { %2895 = vpow2.f32 %v2206_v30 }
 0x937   :  { %v2894_v31 = vpop.eup %2893 }
 0x938   :  { %v2896_v32 = vpop.eup %2895  ;;  %v2208_v33 = vadd.f32 1.0, %v2894_v31 }
 0x939   :  { %v2209_v34 = vadd.f32 1.0, %v2896_v32 }
 0x93a   :  { %2897 = vrcp.f32 %v2208_v33 }
 0x93b   :  { %2899 = vrcp.f32 %v2209_v34 }
 0x944   :  { %v2898_v38 = vpop.eup %2897 }
 0x945   :  { %v2900_v40 = vpop.eup %2899  ;;  %2212 = vst [vmem:[#allocation31] sm:$0xff] %v2898_v38 }
 0x946   :  { %2213 = vst [vmem:[#allocation31 + $0x8] sm:$0xff] %v2900_v40 }
 0x947   :  { %3330 = shalt.err (!%p3327_p2)
}
 0x948   :  { %s3331_s1 = scalar_lea.hbm %s3847_s18, 256 }
 0x949   :  { %p3332_p3 = scmp.ne.s32.totalorder %s3847_s18, %s3331_s1  ;;  %p3335_p4 = scmp.lt.u32.totalorder %s3331_s1, %s3847_s18 }
 0x94b   :  { %p3337_p5 = pnand %p3335_p4, %p3332_p3 }
 0x94d   :  { %3340 = shalt.err (!%p3337_p5)
}
 0x94e   :  { %2232 = dma.vmem_to_hbm [thread:$0]  %s2230_s14, 256, %s3847_s18, [#allocation4]  }
 0x94f   :  { %3361 = dma.done.wait [#allocation4], 256  }
 0x950   :  { %3362 = vsyncadd [#allocation4], 4294967040 }
 0x951   :  { %3363 = dma.done.wait [#allocation33], 128  }
 0x952   :  { %3364 = vsyncadd [#allocation33], 4294967168 }
 0x953   :  { %2249 = vsyncpa [#allocation3], 1 }
 0x954   :  { %2250 = vsyncpa [#allocation6], 1 }
 0x955   :  { %2251 = vsyncpa [#allocation9], 1 }
 0x956   :  { %2252 = vsyncpa [#allocation12], 1 }
 0x957   :  { %2253 = vsyncpa [#allocation15], 1 }
 0x958   :  { %2254 = vsyncpa [#allocation18], 1 }
 0x959   :  { %2255 = vsyncpa [#allocation21], 1 }
 0x95a   :  { %2256 = vsyncpa [#allocation24], 1 }
 0x95b   :  { %2257 = vsyncpa [#allocation27], 1 }
 0x95c   :  { %2258 = vsyncpa [#allocation30], 1 }
 0x95d   :  { %2259 = vsyncpa [#allocation4], 1 }
 0x95e   :  { %2260 = vsyncpa [#allocation33], 1 }

// kernel: _vae2d_impl.1
= control target key start
LH: loop header
LB: loop body
LE: loop exit
PB: predicated region body
PF: predicated region fallthrough
CT: control target
= control target key end

     0   :  { %s3829_s0 = inlined_call_operand.hbm [shape: f32[8,256], index: 0, kind: input, shape index: {}]   ;;  %s3830_s1 = inlined_call_operand.hbm [shape: f32[8,2], index: 1, kind: input, shape index: {}]   ;;  %s3831_s2 = inlined_call_operand.hbm [shape: bf16[256,512], index: 2, kind: input, shape index: {}]   ;;  %s3832_s3 = inlined_call_operand.hbm [shape: f32[1,512], index: 3, kind: input, shape index: {}]   ;;  %s3833_s4 = inlined_call_operand.hbm [shape: bf16[512,128], index: 4, kind: input, shape index: {}]   ;;  %s3834_s5 = inlined_call_operand.hbm [shape: f32[1,128], index: 5, kind: input, shape index: {}]   ;;  %s3835_s6 = inlined_call_operand.hbm [shape: bf16[128,32], index: 6, kind: input, shape index: {}]   ;;  %s3836_s7 = inlined_call_operand.hbm [shape: f32[1,32], index: 7, kind: input, shape index: {}]   ;;  %s3837_s8 = inlined_call_operand.hbm [shape: bf16[32,4], index: 8, kind: input, shape index: {}]   ;;  %s3838_s9 = inlined_call_operand.hbm [shape: f32[1,4], index: 9, kind: input, shape index: {}]   ;;  %s3839_s10 = inlined_call_operand.hbm [shape: f32[2,32], index: 10, kind: input, shape index: {}]   ;;  %s3840_s11 = inlined_call_operand.hbm [shape: f32[1,32], index: 11, kind: input, shape index: {}]   ;;  %s3841_s12 = inlined_call_operand.hbm [shape: bf16[32,128], index: 12, kind: input, shape index: {}]   ;;  %s3842_s13 = inlined_call_operand.hbm [shape: f32[1,128], index: 13, kind: input, shape index: {}]   ;;  %s3843_s14 = inlined_call_operand.hbm [shape: bf16[128,512], index: 14, kind: input, shape index: {}]   ;;  %s3844_s15 = inlined_call_operand.hbm [shape: f32[1,512], index: 15, kind: input, shape index: {}]   ;;  %s3845_s16 = inlined_call_operand.hbm [shape: bf16[512,256], index: 16, kind: input, shape index: {}]   ;;  %s3846_s17 = inlined_call_operand.hbm [shape: f32[1,256], index: 17, kind: input, shape index: {}]   ;;  %s3847_s18 = inlined_call_operand.hbm [shape: f32[8,256], index: 18, kind: output, shape index: {0}]   ;;  %s3848_s19 = inlined_call_operand.hbm [shape: f32[8,8], index: 19, kind: output, shape index: {1}]  }
   0x1   :  { %3853 = sst [smem:[#allocation46_spill]] %s3829_s0 }
   0x2   :  { %3854 = sst [smem:[#allocation47_spill]] %s3830_s1 }
   0x3   :  { %3855 = sst [smem:[#allocation48_spill]] %s3831_s2 }
   0x4   :  { %3856 = sst [smem:[#allocation49_spill]] %s3832_s3 }
   0x5   :  { %25 = vsyncpa [#allocation3], 0 }
   0x6   :  { %26 = vsyncpa [#allocation6], 0 }
   0x7   :  { %27 = vsyncpa [#allocation9], 0 }
   0x8   :  { %28 = vsyncpa [#allocation12], 0 }
   0x9   :  { %29 = vsyncpa [#allocation15], 0 }
   0xa   :  { %30 = vsyncpa [#allocation18], 0 }
   0xb   :  { %31 = vsyncpa [#allocation21], 0 }
   0xc   :  { %32 = vsyncpa [#allocation24], 0 }
   0xd   :  { %33 = vsyncpa [#allocation27], 0 }
   0xe   :  { %34 = vsyncpa [#allocation30], 0 }
   0xf   :  { %35 = vsyncpa [#allocation4], 0 }
  0x10   :  { %36 = vsyncpa [#allocation33], 0  ;;  %s3365_s0 = smov [#allocation5]   ;;  %s3366_s20 = smov [#allocation8]  }
  0x11   :  { %s53_s30 = sshll.u32 %s3365_s0, 4  ;;  %s75_s21 = sshll.u32 %s3366_s20, 4  ;;  %s54_s30 = int_to_ptr.vmem [resolvable:$true] %s53_s30  ;;  %s76_s21 = int_to_ptr.vmem [resolvable:$true] %s75_s21 }
  0x12   :  { %s3857_s2 = sld [smem:[#allocation47_spill]] }
  0x18   :  { %s2901_s23 = scalar_lea.hbm %s3857_s2, 128 }
  0x19   :  { %p2902_p0 = scmp.ne.s32.totalorder %s3857_s2, %s2901_s23  ;;  %p2905_p1 = scmp.lt.u32.totalorder %s2901_s23, %s3857_s2 }
  0x1b   :  { %p2907_p2 = pnand %p2905_p1, %p2902_p0 }
  0x1d   :  { %2910 = shalt.err (!%p2907_p2)
}
  0x1e   :  { %s2911_s27 = scalar_lea.vmem %s54_s30, 128  ;;  %p2916_p4 = scmp.lt.s32.totalorder %s54_s30, %s54_s30 }
  0x1f   :  { %p2912_p3 = scmp.ne.s32.totalorder %s54_s30, %s2911_s27  ;;  %p2917_p5 = scmp.lt.s32.totalorder %s2911_s27, %s2911_s27 }
  0x21   :  { %p2918_p6 = por %p2917_p5, %p2916_p4 }
  0x23   :  { %p2919_p7 = pnand %p2918_p6, %p2912_p3 }
  0x25   :  { %2922 = shalt.err (!%p2919_p7)
}
  0x26   :  { %56 = dma.hbm_to_vmem [thread:$0]  %s3857_s2, 128, %s54_s30, [#allocation6]  }
  0x27   :  { %s3858_s1 = sld [smem:[#allocation49_spill]] }
  0x2d   :  { %s2923_s22 = scalar_lea.hbm %s3858_s1, 64 }
  0x2e   :  { %p2924_p8 = scmp.ne.s32.totalorder %s3858_s1, %s2923_s22  ;;  %p2927_p9 = scmp.lt.u32.totalorder %s2923_s22, %s3858_s1 }
  0x30   :  { %p2929_p10 = pnand %p2927_p9, %p2924_p8 }
  0x32   :  { %2932 = shalt.err (!%p2929_p10)
}
  0x33   :  { %s2933_s26 = scalar_lea.vmem %s76_s21, 64  ;;  %p2938_p12 = scmp.lt.s32.totalorder %s76_s21, %s76_s21 }
  0x34   :  { %p2934_p11 = scmp.ne.s32.totalorder %s76_s21, %s2933_s26  ;;  %p2939_p13 = scmp.lt.s32.totalorder %s2933_s26, %s2933_s26 }
  0x36   :  { %p2940_p0 = por %p2939_p13, %p2938_p12 }
  0x38   :  { %p2941_p1 = pnand %p2940_p0, %p2934_p11 }
  0x3a   :  { %2944 = shalt.err (!%p2941_p1)
}
  0x3b   :  { %78 = dma.hbm_to_vmem [thread:$0]  %s3858_s1, 64, %s76_s21, [#allocation9]  }
  0x3c   :  { %s3367_s27 = smov [#allocation11]   ;;  %s3368_s29 = smov [#allocation14]  }
  0x3d   :  { %s97_s28 = sshll.u32 %s3367_s27, 4  ;;  %s119_s0 = sshll.u32 %s3368_s29, 4  ;;  %s98_s28 = int_to_ptr.vmem [resolvable:$true] %s97_s28  ;;  %s120_s0 = int_to_ptr.vmem [resolvable:$true] %s119_s0 }
  0x3e   :  { %s2945_s24 = scalar_lea.hbm %s3834_s5, 16 }
  0x3f   :  { %p2946_p2 = scmp.ne.s32.totalorder %s3834_s5, %s2945_s24  ;;  %p2949_p3 = scmp.lt.u32.totalorder %s2945_s24, %s3834_s5 }
  0x41   :  { %p2951_p4 = pnand %p2949_p3, %p2946_p2 }
  0x43   :  { %2954 = shalt.err (!%p2951_p4)
}
  0x44   :  { %s2955_s21 = scalar_lea.vmem %s98_s28, 16  ;;  %s2959_s1 = scalar_lea.vmem %s98_s28, 32 }
  0x45   :  { %p2956_p5 = scmp.ne.s32.totalorder %s98_s28, %s2955_s21  ;;  %p2960_p6 = scmp.lt.s32.totalorder %s98_s28, %s98_s28 }
  0x46   :  { %p2961_p7 = scmp.lt.s32.totalorder %s2959_s1, %s2955_s21 }
  0x48   :  { %p2962_p8 = por %p2961_p7, %p2960_p6 }
  0x4a   :  { %p2963_p9 = pnand %p2962_p8, %p2956_p5 }
  0x4c   :  { %2966 = shalt.err (!%p2963_p9)
}
  0x4d   :  { %100 = dma.hbm_to_vmem [thread:$0]  %s3834_s5, 16, %s98_s28, [#allocation12]  }
  0x4e   :  { %s2967_s20 = scalar_lea.hbm %s3836_s7, 16 }
  0x4f   :  { %p2968_p10 = scmp.ne.s32.totalorder %s3836_s7, %s2967_s20  ;;  %p2971_p11 = scmp.lt.u32.totalorder %s2967_s20, %s3836_s7 }
  0x51   :  { %p2973_p12 = pnand %p2971_p11, %p2968_p10 }
  0x53   :  { %2976 = shalt.err (!%p2973_p12)
}
  0x54   :  { %s2977_s3 = scalar_lea.vmem %s120_s0, 16  ;;  %s2981_s26 = scalar_lea.vmem %s120_s0, 32 }
  0x55   :  { %p2978_p13 = scmp.ne.s32.totalorder %s120_s0, %s2977_s3  ;;  %p2982_p0 = scmp.lt.s32.totalorder %s120_s0, %s120_s0 }
  0x56   :  { %p2983_p1 = scmp.lt.s32.totalorder %s2981_s26, %s2977_s3 }
  0x58   :  { %p2984_p2 = por %p2983_p1, %p2982_p0 }
  0x5a   :  { %p2985_p3 = pnand %p2984_p2, %p2978_p13 }
  0x5c   :  { %2988 = shalt.err (!%p2985_p3)
}
  0x5d   :  { %122 = dma.hbm_to_vmem [thread:$0]  %s3836_s7, 16, %s120_s0, [#allocation15]  }
  0x5e   :  { %s3369_s21 = smov [#allocation17]   ;;  %s3370_s30 = smov [#allocation20]  }
  0x5f   :  { %s141_s1 = sshll.u32 %s3369_s21, 4  ;;  %s161_s2 = sshll.u32 %s3370_s30, 4  ;;  %s142_s1 = int_to_ptr.vmem [resolvable:$true] %s141_s1  ;;  %s162_s2 = int_to_ptr.vmem [resolvable:$true] %s161_s2 }
  0x60   :  { %s2989_s20 = scalar_lea.hbm %s3838_s9, 16 }
  0x61   :  { %p2990_p4 = scmp.ne.s32.totalorder %s3838_s9, %s2989_s20  ;;  %p2993_p5 = scmp.lt.u32.totalorder %s2989_s20, %s3838_s9 }
  0x63   :  { %p2995_p6 = pnand %p2993_p5, %p2990_p4 }
  0x65   :  { %2998 = shalt.err (!%p2995_p6)
}
  0x66   :  { %s2999_s7 = scalar_lea.vmem %s142_s1, 16  ;;  %s3003_s0 = scalar_lea.vmem %s142_s1, 32 }
  0x67   :  { %p3000_p7 = scmp.ne.s32.totalorder %s142_s1, %s2999_s7  ;;  %p3004_p8 = scmp.lt.s32.totalorder %s142_s1, %s142_s1 }
  0x68   :  { %p3005_p9 = scmp.lt.s32.totalorder %s3003_s0, %s2999_s7 }
  0x6a   :  { %p3006_p10 = por %p3005_p9, %p3004_p8 }
  0x6c   :  { %p3007_p11 = pnand %p3006_p10, %p3000_p7 }
  0x6e   :  { %3010 = shalt.err (!%p3007_p11)
}
  0x6f   :  { %144 = dma.hbm_to_vmem [thread:$0]  %s3838_s9, 16, %s142_s1, [#allocation18]  }
  0x70   :  { %s3011_s21 = scalar_lea.hbm %s3840_s11, 16 }
  0x71   :  { %p3012_p12 = scmp.ne.s32.totalorder %s3840_s11, %s3011_s21  ;;  %p3015_p13 = scmp.lt.u32.totalorder %s3011_s21, %s3840_s11 }
  0x73   :  { %p3017_p0 = pnand %p3015_p13, %p3012_p12 }
  0x75   :  { %3020 = shalt.err (!%p3017_p0)
}
  0x76   :  { %s3021_s22 = scalar_lea.vmem %s162_s2, 16  ;;  %s3025_s24 = scalar_lea.vmem %s162_s2, 32 }
  0x77   :  { %p3022_p1 = scmp.ne.s32.totalorder %s162_s2, %s3021_s22  ;;  %p3026_p2 = scmp.lt.s32.totalorder %s162_s2, %s162_s2 }
  0x78   :  { %p3027_p3 = scmp.lt.s32.totalorder %s3025_s24, %s3021_s22 }
  0x7a   :  { %p3028_p4 = por %p3027_p3, %p3026_p2 }
  0x7c   :  { %p3029_p5 = pnand %p3028_p4, %p3022_p1 }
  0x7e   :  { %3032 = shalt.err (!%p3029_p5)
}
  0x7f   :  { %164 = dma.hbm_to_vmem [thread:$0]  %s3840_s11, 16, %s162_s2, [#allocation21]  }
  0x80   :  { %s3371_s25 = smov [#allocation23]   ;;  %s3372_s7 = smov [#allocation26]  }
  0x81   :  { %s183_s23 = sshll.u32 %s3371_s25, 4  ;;  %s205_s0 = sshll.u32 %s3372_s7, 4  ;;  %s184_s23 = int_to_ptr.vmem [resolvable:$true] %s183_s23  ;;  %s206_s0 = int_to_ptr.vmem [resolvable:$true] %s205_s0 }
  0x82   :  { %s3033_s5 = scalar_lea.hbm %s3842_s13, 16 }
  0x83   :  { %p3034_p6 = scmp.ne.s32.totalorder %s3842_s13, %s3033_s5  ;;  %p3037_p7 = scmp.lt.u32.totalorder %s3033_s5, %s3842_s13 }
  0x85   :  { %p3039_p8 = pnand %p3037_p7, %p3034_p6 }
  0x87   :  { %3042 = shalt.err (!%p3039_p8)
}
  0x88   :  { %s3043_s11 = scalar_lea.vmem %s184_s23, 16  ;;  %s3047_s2 = scalar_lea.vmem %s184_s23, 32 }
  0x89   :  { %p3044_p9 = scmp.ne.s32.totalorder %s184_s23, %s3043_s11  ;;  %p3048_p10 = scmp.lt.s32.totalorder %s184_s23, %s184_s23 }
  0x8a   :  { %p3049_p11 = scmp.lt.s32.totalorder %s3047_s2, %s3043_s11 }
  0x8c   :  { %p3050_p12 = por %p3049_p11, %p3048_p10 }
  0x8e   :  { %p3051_p13 = pnand %p3050_p12, %p3044_p9 }
  0x90   :  { %3054 = shalt.err (!%p3051_p13)
}
  0x91   :  { %186 = dma.hbm_to_vmem [thread:$0]  %s3842_s13, 16, %s184_s23, [#allocation24]  }
  0x92   :  { %s3055_s9 = scalar_lea.hbm %s3844_s15, 64 }
  0x93   :  { %p3056_p0 = scmp.ne.s32.totalorder %s3844_s15, %s3055_s9  ;;  %p3059_p1 = scmp.lt.u32.totalorder %s3055_s9, %s3844_s15 }
  0x95   :  { %p3061_p2 = pnand %p3059_p1, %p3056_p0 }
  0x97   :  { %3064 = shalt.err (!%p3061_p2)
}
  0x98   :  { %s3065_s26 = scalar_lea.vmem %s206_s0, 64  ;;  %p3070_p4 = scmp.lt.s32.totalorder %s206_s0, %s206_s0 }
  0x99   :  { %p3066_p3 = scmp.ne.s32.totalorder %s206_s0, %s3065_s26  ;;  %p3071_p5 = scmp.lt.s32.totalorder %s3065_s26, %s3065_s26 }
  0x9b   :  { %p3072_p6 = por %p3071_p5, %p3070_p4 }
  0x9d   :  { %p3073_p7 = pnand %p3072_p6, %p3066_p3 }
  0x9f   :  { %3076 = shalt.err (!%p3073_p7)
}
  0xa0   :  { %208 = dma.hbm_to_vmem [thread:$0]  %s3844_s15, 64, %s206_s0, [#allocation27]  }
  0xa1   :  { %s3373_s5 = smov [#allocation2]   ;;  %s3374_s21 = smov [#allocation7]  }
  0xa2   :  { %s43_s28 = sshll.u32 %s3373_s5, 4  ;;  %s62_s30 = sshll.u32 %s3374_s21, 4  ;;  %s44_s28 = int_to_ptr.vmem [resolvable:$true] %s43_s28  ;;  %s3592_s30 = int_to_ptr.vmem [resolvable:$true] %s62_s30 }
  0xa3   :  { %s3859_s2 = sld [smem:[#allocation46_spill]] }
  0xa9   :  { %s3077_s29 = scalar_lea.hbm %s3859_s2, 256 }
  0xaa   :  { %p3078_p8 = scmp.ne.s32.totalorder %s3859_s2, %s3077_s29  ;;  %p3081_p9 = scmp.lt.u32.totalorder %s3077_s29, %s3859_s2 }
  0xac   :  { %p3083_p10 = pnand %p3081_p9, %p3078_p8 }
  0xae   :  { %3086 = shalt.err (!%p3083_p10)
}
  0xaf   :  { %s3087_s15 = scalar_lea.vmem %s44_s28, 256  ;;  %p3092_p12 = scmp.lt.s32.totalorder %s44_s28, %s44_s28 }
  0xb0   :  { %p3088_p11 = scmp.ne.s32.totalorder %s44_s28, %s3087_s15  ;;  %p3093_p13 = scmp.lt.s32.totalorder %s3087_s15, %s3087_s15 }
  0xb2   :  { %p3094_p0 = por %p3093_p13, %p3092_p12 }
  0xb4   :  { %p3095_p1 = pnand %p3094_p0, %p3088_p11 }
  0xb6   :  { %3098 = shalt.err (!%p3095_p1)
}
  0xb7   :  { %46 = dma.hbm_to_vmem [thread:$0]  %s3859_s2, 256, %s44_s28, [#allocation3]  }
  0xb8   :  { %s3860_s3 = sld [smem:[#allocation48_spill]] }
  0xbe   :  { %s3099_s26 = scalar_lea.hbm %s3860_s3, 8192 }
  0xbf   :  { %p3100_p2 = scmp.ne.s32.totalorder %s3860_s3, %s3099_s26  ;;  %p3103_p3 = scmp.lt.u32.totalorder %s3099_s26, %s3860_s3 }
  0xc1   :  { %p3105_p4 = pnand %p3103_p3, %p3100_p2 }
  0xc3   :  { %3108 = shalt.err (!%p3105_p4)
}
  0xc4   :  { %s3109_s27 = scalar_lea.vmem %s3592_s30, 8192  ;;  %p3114_p6 = scmp.lt.s32.totalorder %s3592_s30, %s3592_s30 }
  0xc5   :  { %p3110_p5 = scmp.ne.s32.totalorder %s3592_s30, %s3109_s27  ;;  %p3115_p7 = scmp.lt.s32.totalorder %s3109_s27, %s3109_s27 }
  0xc7   :  { %p3116_p8 = por %p3115_p7, %p3114_p6 }
  0xc9   :  { %p3117_p9 = pnand %p3116_p8, %p3110_p5 }
  0xcb   :  { %3120 = shalt.err (!%p3117_p9)
}
  0xcc   :  { %s3375_s28 = smov 256   ;;  %s3376_s11 = smov 16  }
  0xcd   :  { %68 = dma.hbm_to_vmem [thread:$0]  %s3860_s3, 8192, %s3592_s30, [#allocation6], %s3375_s28, %s3375_s28, %s3376_s11  }
  0xce   :  { %s3377_s20 = smov [#allocation10]   ;;  %s3121_s15 = scalar_lea.hbm %s3833_s4, 4096 }
  0xcf   :  { %s84_s22 = sshll.u32 %s3377_s20, 4  ;;  %p3122_p10 = scmp.ne.s32.totalorder %s3833_s4, %s3121_s15  ;;  %s85_s22 = int_to_ptr.vmem [resolvable:$true] %s84_s22 }
  0xd0   :  { %p3125_p11 = scmp.lt.u32.totalorder %s3121_s15, %s3833_s4 }
  0xd2   :  { %p3127_p12 = pnand %p3125_p11, %p3122_p10 }
  0xd4   :  { %3130 = shalt.err (!%p3127_p12)
}
  0xd5   :  { %s3131_s26 = scalar_lea.vmem %s85_s22, 4096  ;;  %p3136_p0 = scmp.lt.s32.totalorder %s85_s22, %s85_s22 }
  0xd6   :  { %p3132_p13 = scmp.ne.s32.totalorder %s85_s22, %s3131_s26  ;;  %p3137_p1 = scmp.lt.s32.totalorder %s3131_s26, %s3131_s26 }
  0xd8   :  { %p3138_p2 = por %p3137_p1, %p3136_p0 }
  0xda   :  { %p3139_p3 = pnand %p3138_p2, %p3132_p13 }
  0xdc   :  { %3142 = shalt.err (!%p3139_p3)
}
  0xdd   :  { %s3378_s30 = smov 64   ;;  %s3379_s3 = smov 4  }
  0xde   :  { %90 = dma.hbm_to_vmem [thread:$0]  %s3833_s4, 4096, %s85_s22, [#allocation9], %s3378_s30, %s3378_s30, %s3379_s3  }
  0xdf   :  { %s3380_s5 = smov [#allocation13]   ;;  %s3381_s27 = smov [#allocation16]  }
  0xe0   :  { %s106_s21 = sshll.u32 %s3380_s5, 4  ;;  %s128_s2 = sshll.u32 %s3381_s27, 4  ;;  %s107_s21 = int_to_ptr.vmem [resolvable:$true] %s106_s21  ;;  %s129_s2 = int_to_ptr.vmem [resolvable:$true] %s128_s2 }
  0xe1   :  { %s3143_s24 = scalar_lea.hbm %s3835_s6, 1024 }
  0xe2   :  { %p3144_p4 = scmp.ne.s32.totalorder %s3835_s6, %s3143_s24  ;;  %p3147_p5 = scmp.lt.u32.totalorder %s3143_s24, %s3835_s6 }
  0xe4   :  { %p3149_p6 = pnand %p3147_p5, %p3144_p4 }
  0xe6   :  { %3152 = shalt.err (!%p3149_p6)
}
  0xe7   :  { %s3153_s4 = scalar_lea.vmem %s107_s21, 1024  ;;  %p3158_p8 = scmp.lt.s32.totalorder %s107_s21, %s107_s21 }
  0xe8   :  { %p3154_p7 = scmp.ne.s32.totalorder %s107_s21, %s3153_s4  ;;  %p3159_p9 = scmp.lt.s32.totalorder %s3153_s4, %s3153_s4 }
  0xea   :  { %p3160_p10 = por %p3159_p9, %p3158_p8 }
  0xec   :  { %p3161_p11 = pnand %p3160_p10, %p3154_p7 }
  0xee   :  { %3164 = shalt.err (!%p3161_p11)
}
  0xef   :  { %112 = dma.hbm_to_vmem [thread:$0]  %s3835_s6, 1024, %s107_s21, [#allocation12], %s3378_s30, %s3378_s30, %s3379_s3  }
  0xf0   :  { %s3165_s13 = scalar_lea.hbm %s3837_s8, 256 }
  0xf1   :  { %p3166_p12 = scmp.ne.s32.totalorder %s3837_s8, %s3165_s13  ;;  %p3169_p13 = scmp.lt.u32.totalorder %s3165_s13, %s3837_s8 }
  0xf3   :  { %p3171_p0 = pnand %p3169_p13, %p3166_p12 }
  0xf5   :  { %3174 = shalt.err (!%p3171_p0)
}
  0xf6   :  { %s3175_s20 = scalar_lea.vmem %s129_s2, 256  ;;  %p3180_p2 = scmp.lt.s32.totalorder %s129_s2, %s129_s2 }
  0xf7   :  { %p3176_p1 = scmp.ne.s32.totalorder %s129_s2, %s3175_s20  ;;  %p3181_p3 = scmp.lt.s32.totalorder %s3175_s20, %s3175_s20 }
  0xf9   :  { %p3182_p4 = por %p3181_p3, %p3180_p2 }
  0xfb   :  { %p3183_p5 = pnand %p3182_p4, %p3176_p1 }
  0xfd   :  { %3186 = shalt.err (!%p3183_p5)
}
  0xfe   :  { %134 = dma.hbm_to_vmem [thread:$0]  %s3837_s8, 256, %s129_s2, [#allocation15], %s3378_s30, %s3378_s30, %s3379_s3  }
  0xff   :  { %s3382_s24 = smov [#allocation19]   ;;  %s3383_s15 = smov [#allocation22]  }
 0x100   :  { %s151_s9 = sshll.u32 %s3382_s24, 4  ;;  %s170_s0 = sshll.u32 %s3383_s15, 4  ;;  %s152_s9 = int_to_ptr.vmem [resolvable:$true] %s151_s9  ;;  %s171_s0 = int_to_ptr.vmem [resolvable:$true] %s170_s0 }
 0x101   :  { %s3187_s22 = scalar_lea.hbm %s3839_s10, 32 }
 0x102   :  { %p3188_p6 = scmp.ne.s32.totalorder %s3839_s10, %s3187_s22  ;;  %p3191_p7 = scmp.lt.u32.totalorder %s3187_s22, %s3839_s10 }
 0x104   :  { %p3193_p8 = pnand %p3191_p7, %p3188_p6 }
 0x106   :  { %3196 = shalt.err (!%p3193_p8)
}
 0x107   :  { %s3197_s8 = scalar_lea.vmem %s152_s9, 32  ;;  %p3202_p10 = scmp.lt.s32.totalorder %s152_s9, %s152_s9 }
 0x108   :  { %p3198_p9 = scmp.ne.s32.totalorder %s152_s9, %s3197_s8  ;;  %p3203_p11 = scmp.lt.s32.totalorder %s3197_s8, %s3197_s8 }
 0x10a   :  { %p3204_p12 = por %p3203_p11, %p3202_p10 }
 0x10c   :  { %p3205_p13 = pnand %p3204_p12, %p3198_p9 }
 0x10e   :  { %3208 = shalt.err (!%p3205_p13)
}
 0x10f   :  { %154 = dma.hbm_to_vmem [thread:$0]  %s3839_s10, 32, %s152_s9, [#allocation18]  }
 0x110   :  { %s3209_s29 = scalar_lea.hbm %s3841_s12, 256 }
 0x111   :  { %p3210_p0 = scmp.ne.s32.totalorder %s3841_s12, %s3209_s29  ;;  %p3213_p1 = scmp.lt.u32.totalorder %s3209_s29, %s3841_s12 }
 0x113   :  { %p3215_p2 = pnand %p3213_p1, %p3210_p0 }
 0x115   :  { %3218 = shalt.err (!%p3215_p2)
}
 0x116   :  { %s3219_s15 = scalar_lea.vmem %s171_s0, 256  ;;  %p3224_p4 = scmp.lt.s32.totalorder %s171_s0, %s171_s0 }
 0x117   :  { %p3220_p3 = scmp.ne.s32.totalorder %s171_s0, %s3219_s15  ;;  %p3225_p5 = scmp.lt.s32.totalorder %s3219_s15, %s3219_s15 }
 0x119   :  { %p3226_p6 = por %p3225_p5, %p3224_p4 }
 0x11b   :  { %p3227_p7 = pnand %p3226_p6, %p3220_p3 }
 0x11d   :  { %3230 = shalt.err (!%p3227_p7)
}
 0x11e   :  { %176 = dma.hbm_to_vmem [thread:$0]  %s3841_s12, 256, %s171_s0, [#allocation21], %s3378_s30, %s3378_s30, %s3379_s3  }
 0x11f   :  { %s3384_s1 = smov [#allocation25]   ;;  %s3385_s22 = smov [#allocation28]  }
 0x120   :  { %s192_s4 = sshll.u32 %s3384_s1, 4  ;;  %s214_s25 = sshll.u32 %s3385_s22, 4  ;;  %s193_s4 = int_to_ptr.vmem [resolvable:$true] %s192_s4  ;;  %s215_s25 = int_to_ptr.vmem [resolvable:$true] %s214_s25 }
 0x121   :  { %s3231_s13 = scalar_lea.hbm %s3843_s14, 4096 }
 0x122   :  { %p3232_p8 = scmp.ne.s32.totalorder %s3843_s14, %s3231_s13  ;;  %p3235_p9 = scmp.lt.u32.totalorder %s3231_s13, %s3843_s14 }
 0x124   :  { %p3237_p10 = pnand %p3235_p9, %p3232_p8 }
 0x126   :  { %3240 = shalt.err (!%p3237_p10)
}
 0x127   :  { %s3241_s12 = scalar_lea.vmem %s193_s4, 4096  ;;  %p3246_p12 = scmp.lt.s32.totalorder %s193_s4, %s193_s4 }
 0x128   :  { %p3242_p11 = scmp.ne.s32.totalorder %s193_s4, %s3241_s12  ;;  %p3247_p13 = scmp.lt.s32.totalorder %s3241_s12, %s3241_s12 }
 0x12a   :  { %p3248_p0 = por %p3247_p13, %p3246_p12 }
 0x12c   :  { %p3249_p1 = pnand %p3248_p0, %p3242_p11 }
 0x12e   :  { %3252 = shalt.err (!%p3249_p1)
}
 0x12f   :  { %198 = dma.hbm_to_vmem [thread:$0]  %s3843_s14, 4096, %s193_s4, [#allocation24], %s3375_s28, %s3375_s28, %s3376_s11  }
 0x130   :  { %s3253_s20 = scalar_lea.hbm %s3845_s16, 8192 }
 0x131   :  { %p3254_p2 = scmp.ne.s32.totalorder %s3845_s16, %s3253_s20  ;;  %p3257_p3 = scmp.lt.u32.totalorder %s3253_s20, %s3845_s16 }
 0x133   :  { %p3259_p4 = pnand %p3257_p3, %p3254_p2 }
 0x135   :  { %3262 = shalt.err (!%p3259_p4)
}
 0x136   :  { %s3263_s10 = scalar_lea.vmem %s215_s25, 8192  ;;  %p3268_p6 = scmp.lt.s32.totalorder %s215_s25, %s215_s25 }
 0x137   :  { %p3264_p5 = scmp.ne.s32.totalorder %s215_s25, %s3263_s10  ;;  %p3269_p7 = scmp.lt.s32.totalorder %s3263_s10, %s3263_s10 }
 0x139   :  { %p3270_p8 = por %p3269_p7, %p3268_p6 }
 0x13b   :  { %p3271_p9 = pnand %p3270_p8, %p3264_p5 }
 0x13d   :  { %3274 = shalt.err (!%p3271_p9)
}
 0x13e   :  { %s3386_s14 = smov 128   ;;  %s3387_s28 = smov 8  }
 0x13f   :  { %220 = dma.hbm_to_vmem [thread:$0]  %s3845_s16, 8192, %s215_s25, [#allocation27], %s3386_s14, %s3386_s14, %s3387_s28  }
 0x140   :  { %s3388_s1 = smov [#allocation29]   ;;  %s3275_s26 = scalar_lea.hbm %s3846_s17, 32 }
 0x141   :  { %s227_s4 = sshll.u32 %s3388_s1, 4  ;;  %p3276_p10 = scmp.ne.s32.totalorder %s3846_s17, %s3275_s26  ;;  %s228_s4 = int_to_ptr.vmem [resolvable:$true] %s227_s4 }
 0x142   :  { %p3279_p11 = scmp.lt.u32.totalorder %s3275_s26, %s3846_s17 }
 0x144   :  { %p3281_p12 = pnand %p3279_p11, %p3276_p10 }
 0x146   :  { %3284 = shalt.err (!%p3281_p12)
}
 0x147   :  { %s3285_s5 = scalar_lea.vmem %s228_s4, 32  ;;  %p3290_p0 = scmp.lt.s32.totalorder %s228_s4, %s228_s4 }
 0x148   :  { %p3286_p13 = scmp.ne.s32.totalorder %s228_s4, %s3285_s5  ;;  %p3291_p1 = scmp.lt.s32.totalorder %s3285_s5, %s3285_s5 }
 0x14a   :  { %p3292_p2 = por %p3291_p1, %p3290_p0 }
 0x14c   :  { %p3293_p3 = pnand %p3292_p2, %p3286_p13 }
 0x14e   :  { %3296 = shalt.err (!%p3293_p3)
}
 0x14f   :  { %230 = dma.hbm_to_vmem [thread:$0]  %s3846_s17, 32, %s228_s4, [#allocation30]  }
 0x150   :  { %3341 = dma.done.wait [#allocation3], 256  }
 0x151   :  { %3342 = vsyncadd [#allocation3], 4294967040 }
 0x152   :  { %3343 = dma.done.wait [#allocation6], 8320  }
 0x153   :  { %3344 = vsyncadd [#allocation6], 4294958976 }
 0x154   :  { %3345 = dma.done.wait [#allocation9], 4160  }
 0x155   :  { %3346 = vsyncadd [#allocation9], 4294963136 }
 0x156   :  { %3347 = dma.done.wait [#allocation12], 1040  }
 0x157   :  { %3348 = vsyncadd [#allocation12], 4294966256 }
 0x158   :  { %3349 = dma.done.wait [#allocation15], 272  }
 0x159   :  { %3350 = vsyncadd [#allocation15], 4294967024 }
 0x15a   :  { %3351 = dma.done.wait [#allocation18], 48  }
 0x15b   :  { %3352 = vsyncadd [#allocation18], 4294967248 }
 0x15c   :  { %3353 = dma.done.wait [#allocation21], 272  }
 0x15d   :  { %3354 = vsyncadd [#allocation21], 4294967024 }
 0x15e   :  { %3355 = dma.done.wait [#allocation24], 4112  }
 0x15f   :  { %3356 = vsyncadd [#allocation24], 4294963184 }
 0x160   :  { %3357 = dma.done.wait [#allocation27], 8256  }
 0x161   :  { %3358 = vsyncadd [#allocation27], 4294959040 }
 0x162   :  { %3359 = dma.done.wait [#allocation30], 32  }
 0x163   :  { %3360 = vsyncadd [#allocation30], 4294967264  ;;  %v2607_v0 = vld [vmem:[#allocation7 + $0x4] ss:$16 sps:$4 sm:$0xff]   ;;  %v2609_v1 = vld [vmem:[#allocation7] ss:$16 sps:$4 sm:$0xff]  }
 0x164   :  { %696 = vmatprep.subr.bf16.mxu0 %v2607_v0  ;;  %v2610_v2 = vld [vmem:[#allocation7 + $0x24] ss:$16 sps:$4 sm:$0xff]   ;;  %v2612_v3 = vld [vmem:[#allocation7 + $0x20] ss:$16 sps:$4 sm:$0xff]   ;;  %v286_v34 = vld [vmem:[#allocation2] sm:$0xff]  ;;  %vm3390_vm0 = vmmov 0  }
 0x165   :  { %697 = vmatpush1.bf16.msra.mxu0 %v2609_v1  ;;  %v2613_v4 = vld [vmem:[#allocation7 + $0x44] ss:$16 sps:$4 sm:$0xff]   ;;  %v2615_v5 = vld [vmem:[#allocation7 + $0x40] ss:$16 sps:$4 sm:$0xff]   ;;  %v2657_v35 = vld [vmem:[#allocation7 + $0xc] ss:$16 sps:$4 sm:$0xff]   ;;  %v3737_v37 = vpack.c.bf16 %v286_v34, %v286_v34 }
 0x166   :  { %698 = vmatprep.subr.bf16.mxu0 %v2610_v2  ;;  %v2616_v6 = vld [vmem:[#allocation7 + $0x64] ss:$16 sps:$4 sm:$0xff]   ;;  %v2618_v7 = vld [vmem:[#allocation7 + $0x60] ss:$16 sps:$4 sm:$0xff]   ;;  %v2655_v36 = vld [vmem:[#allocation7 + $0x8] ss:$16 sps:$4 sm:$0xff]  }
 0x167   :  { %v2619_v8 = vld [vmem:[#allocation7 + $0x84] ss:$16 sps:$4 sm:$0xff]   ;;  %v2621_v9 = vld [vmem:[#allocation7 + $0x80] ss:$16 sps:$4 sm:$0xff]   ;;  %v2660_v38 = vld [vmem:[#allocation7 + $0x2c] ss:$16 sps:$4 sm:$0xff]  }
 0x168   :  { %v2622_v10 = vld [vmem:[#allocation7 + $0xa4] ss:$16 sps:$4 sm:$0xff]   ;;  %v2624_v11 = vld [vmem:[#allocation7 + $0xa0] ss:$16 sps:$4 sm:$0xff]   ;;  %v2658_v39 = vld [vmem:[#allocation7 + $0x28] ss:$16 sps:$4 sm:$0xff]  }
 0x169   :  { %699 = vmatpush1.bf16.msra.mxu0 %v2612_v3  ;;  %v2625_v12 = vld [vmem:[#allocation7 + $0xc4] ss:$16 sps:$4 sm:$0xff]   ;;  %v2627_v15 = vld [vmem:[#allocation7 + $0xc0] ss:$16 sps:$4 sm:$0xff]   ;;  %v2663_v40 = vld [vmem:[#allocation7 + $0x4c] ss:$16 sps:$4 sm:$0xff]  }
 0x16a   :  { %700 = vmatprep.subr.bf16.mxu0 %v2613_v4  ;;  %v287_v13 = vld [vmem:[#allocation2 + $0x8] sm:$0xff]  ;;  %v2661_v41 = vld [vmem:[#allocation7 + $0x48] ss:$16 sps:$4 sm:$0xff]   ;;  %v2666_v42 = vld [vmem:[#allocation7 + $0x6c] ss:$16 sps:$4 sm:$0xff]   ;;  %vm1267_vm1 = vcmask 261120  }
 0x16b   :  { %v289_v14 = vpack.c.bf16 %v287_v13, %v287_v13  ;;  %v2628_v16 = vld [vmem:[#allocation7 + $0xe4] ss:$16 sps:$4 sm:$0xff]   ;;  %v2630_v17 = vld [vmem:[#allocation7 + $0xe0] ss:$16 sps:$4 sm:$0xff]   ;;  %v2664_v43 = vld [vmem:[#allocation7 + $0x68] ss:$16 sps:$4 sm:$0xff]  }
 0x16c   :  { %v2631_v18 = vld [vmem:[#allocation7 + $0x104] ss:$16 sps:$4 sm:$0xff]   ;;  %v2633_v19 = vld [vmem:[#allocation7 + $0x100] ss:$16 sps:$4 sm:$0xff]   ;;  %v2669_v44 = vld [vmem:[#allocation7 + $0x8c] ss:$16 sps:$4 sm:$0xff]  }
 0x16d   :  { %701 = vmatpush1.bf16.msra.mxu0 %v2615_v5  ;;  %728 = vmatprep.mubr.bf16.mxu0 %v289_v14  ;;  %v2634_v20 = vld [vmem:[#allocation7 + $0x124] ss:$16 sps:$4 sm:$0xff]   ;;  %v2636_v21 = vld [vmem:[#allocation7 + $0x120] ss:$16 sps:$4 sm:$0xff]   ;;  %v2667_v45 = vld [vmem:[#allocation7 + $0x88] ss:$16 sps:$4 sm:$0xff]  }
 0x16e   :  { %702 = vmatprep.subr.bf16.mxu0 %v2616_v6  ;;  %v2637_v22 = vld [vmem:[#allocation7 + $0x144] ss:$16 sps:$4 sm:$0xff]   ;;  %v2639_v23 = vld [vmem:[#allocation7 + $0x140] ss:$16 sps:$4 sm:$0xff]   ;;  %v2672_v46 = vld [vmem:[#allocation7 + $0xac] ss:$16 sps:$4 sm:$0xff]  }
 0x16f   :  { %v2640_v24 = vld [vmem:[#allocation7 + $0x164] ss:$16 sps:$4 sm:$0xff]   ;;  %v2642_v25 = vld [vmem:[#allocation7 + $0x160] ss:$16 sps:$4 sm:$0xff]   ;;  %v2670_v47 = vld [vmem:[#allocation7 + $0xa8] ss:$16 sps:$4 sm:$0xff]  }
 0x170   :  { %v2643_v26 = vld [vmem:[#allocation7 + $0x184] ss:$16 sps:$4 sm:$0xff]   ;;  %v2645_v27 = vld [vmem:[#allocation7 + $0x180] ss:$16 sps:$4 sm:$0xff]   ;;  %v2675_v48 = vld [vmem:[#allocation7 + $0xcc] ss:$16 sps:$4 sm:$0xff]  }
 0x171   :  { %703 = vmatpush1.bf16.msra.mxu0 %v2618_v7  ;;  %v2646_v28 = vld [vmem:[#allocation7 + $0x1a4] ss:$16 sps:$4 sm:$0xff]   ;;  %v2648_v29 = vld [vmem:[#allocation7 + $0x1a0] ss:$16 sps:$4 sm:$0xff]   ;;  %v2673_v49 = vld [vmem:[#allocation7 + $0xc8] ss:$16 sps:$4 sm:$0xff]  }
 0x172   :  { %704 = vmatprep.subr.bf16.mxu0 %v2619_v8  ;;  %v2649_v30 = vld [vmem:[#allocation7 + $0x1c4] ss:$16 sps:$4 sm:$0xff]   ;;  %v2651_v31 = vld [vmem:[#allocation7 + $0x1c0] ss:$16 sps:$4 sm:$0xff]   ;;  %v2678_v50 = vld [vmem:[#allocation7 + $0xec] ss:$16 sps:$4 sm:$0xff]  }
 0x173   :  { %v2652_v32 = vld [vmem:[#allocation7 + $0x1e4] ss:$16 sps:$4 sm:$0xff]   ;;  %v2654_v33 = vld [vmem:[#allocation7 + $0x1e0] ss:$16 sps:$4 sm:$0xff]   ;;  %v2676_v51 = vld [vmem:[#allocation7 + $0xe8] ss:$16 sps:$4 sm:$0xff]  }
 0x174   :  { %v2681_v52 = vld [vmem:[#allocation7 + $0x10c] ss:$16 sps:$4 sm:$0xff]   ;;  %v2679_v53 = vld [vmem:[#allocation7 + $0x108] ss:$16 sps:$4 sm:$0xff]   ;;  %s3393_s17 = smov 126   ;;  %vm2217_vm2 = vcmask 31744  }
 0x175   :  { %705 = vmatpush1.bf16.msra.mxu0 %v2621_v9  ;;  %v2684_v54 = vld [vmem:[#allocation7 + $0x12c] ss:$16 sps:$4 sm:$0xff]   ;;  %v2682_v55 = vld [vmem:[#allocation7 + $0x128] ss:$16 sps:$4 sm:$0xff]   ;;  %vm2219_vm3 = vcmask 48128   ;;  %vm2221_vm4 = vcmask 64512  }
 0x176   :  { %706 = vmatprep.subr.bf16.mxu0 %v2622_v10  ;;  %v2687_v56 = vld [vmem:[#allocation7 + $0x14c] ss:$16 sps:$4 sm:$0xff]   ;;  %v2685_v57 = vld [vmem:[#allocation7 + $0x148] ss:$16 sps:$4 sm:$0xff]  }
 0x177   :  { %v2690_v58 = vld [vmem:[#allocation7 + $0x16c] ss:$16 sps:$4 sm:$0xff]   ;;  %v2688_v59 = vld [vmem:[#allocation7 + $0x168] ss:$16 sps:$4 sm:$0xff]  }
 0x178   :  { %v2693_v60 = vld [vmem:[#allocation7 + $0x18c] ss:$16 sps:$4 sm:$0xff]   ;;  %v2691_v61 = vld [vmem:[#allocation7 + $0x188] ss:$16 sps:$4 sm:$0xff]  }
 0x179   :  { %707 = vmatpush1.bf16.msra.mxu0 %v2624_v11  ;;  %v2696_v62 = vld [vmem:[#allocation7 + $0x1ac] ss:$16 sps:$4 sm:$0xff]   ;;  %v2694_v63 = vld [vmem:[#allocation7 + $0x1a8] ss:$16 sps:$4 sm:$0xff]  }
 0x17a   :  { %708 = vmatprep.subr.bf16.mxu0 %v2625_v12  ;;  %v2699_v0 = vld [vmem:[#allocation7 + $0x1cc] ss:$16 sps:$4 sm:$0xff]   ;;  %v2697_v1 = vld [vmem:[#allocation7 + $0x1c8] ss:$16 sps:$4 sm:$0xff]  }
 0x17b   :  { %v2702_v2 = vld [vmem:[#allocation7 + $0x1ec] ss:$16 sps:$4 sm:$0xff]   ;;  %v2700_v3 = vld [vmem:[#allocation7 + $0x1e8] ss:$16 sps:$4 sm:$0xff]  }
 0x17c   :  { %v2703_v4 = vld [vmem:[#allocation10 + $0x40] sm:$0xff]   ;;  %v2705_v6 = vld [vmem:[#allocation10 + $0x48] sm:$0xff]   ;;  %v2707_v8 = vld [vmem:[#allocation10 + $0x50] sm:$0xff]  }
 0x17d   :  { %709 = vmatpush1.bf16.msra.mxu0 %v2627_v15  ;;  %v2704_v5 = vld [vmem:[#allocation10] sm:$0xff]   ;;  %v2706_v7 = vld [vmem:[#allocation10 + $0x8] sm:$0xff]   ;;  %v2708_v9 = vld [vmem:[#allocation10 + $0x10] sm:$0xff]  }
 0x17e   :  { %710 = vmatprep.subr.bf16.mxu0 %v2628_v16  ;;  %v2709_v10 = vld [vmem:[#allocation10 + $0x58] sm:$0xff]   ;;  %v2711_v12 = vld [vmem:[#allocation10 + $0x60] sm:$0xff]   ;;  %v2714_v15 = vld [vmem:[#allocation10 + $0x28] sm:$0xff]  }
 0x17f   :  { %v2710_v11 = vld [vmem:[#allocation10 + $0x18] sm:$0xff]   ;;  %v2712_v13 = vld [vmem:[#allocation10 + $0x20] sm:$0xff]   ;;  %v2715_v16 = vld [vmem:[#allocation10 + $0x70] sm:$0xff]  }
 0x180   :  { %v2733_v34 = vld [vmem:[#allocation10 + $0xf8] sm:$0xff]  }
 0x181   :  { %711 = vmatpush1.bf16.msra.mxu0 %v2630_v17  ;;  %v2716_v17 = vld [vmem:[#allocation10 + $0x30] sm:$0xff]  }
 0x182   :  { %712 = vmatprep.subr.bf16.mxu0 %v2631_v18  ;;  %v2717_v18 = vld [vmem:[#allocation10 + $0x78] sm:$0xff]  }
 0x185   :  { %713 = vmatpush1.bf16.msra.mxu0 %v2633_v19  ;;  %v2718_v19 = vld [vmem:[#allocation10 + $0x38] sm:$0xff]  }
 0x186   :  { %714 = vmatprep.subr.bf16.mxu0 %v2634_v20  ;;  %v2719_v20 = vld [vmem:[#allocation10 + $0xc0] sm:$0xff]  }
 0x187   :  { %2494 = vmatprep.subr.bf16.mxu1 %v2719_v20 }
 0x189   :  { %715 = vmatpush1.bf16.msra.mxu0 %v2636_v21  ;;  %v2720_v21 = vld [vmem:[#allocation10 + $0x80] sm:$0xff]  }
 0x18a   :  { %716 = vmatprep.subr.bf16.mxu0 %v2637_v22  ;;  %v2721_v22 = vld [vmem:[#allocation10 + $0xc8] sm:$0xff]   ;;  %2495 = vmatpush3.bf16.msra.mxu1 %v2720_v21 }
 0x18b   :  { %2496 = vmatprep.subr.bf16.mxu1 %v2721_v22 }
 0x18d   :  { %717 = vmatpush1.bf16.msra.mxu0 %v2639_v23  ;;  %v2722_v23 = vld [vmem:[#allocation10 + $0x88] sm:$0xff]  }
 0x18e   :  { %718 = vmatprep.subr.bf16.mxu0 %v2640_v24  ;;  %v2723_v24 = vld [vmem:[#allocation10 + $0xd0] sm:$0xff]   ;;  %2497 = vmatpush3.bf16.msra.mxu1 %v2722_v23 }
 0x18f   :  { %2498 = vmatprep.subr.bf16.mxu1 %v2723_v24 }
 0x191   :  { %719 = vmatpush1.bf16.msra.mxu0 %v2642_v25  ;;  %v2724_v25 = vld [vmem:[#allocation10 + $0x90] sm:$0xff]  }
 0x192   :  { %720 = vmatprep.subr.bf16.mxu0 %v2643_v26  ;;  %v2725_v26 = vld [vmem:[#allocation10 + $0xd8] sm:$0xff]   ;;  %2499 = vmatpush3.bf16.msra.mxu1 %v2724_v25 }
 0x193   :  { %2500 = vmatprep.subr.bf16.mxu1 %v2725_v26 }
 0x195   :  { %721 = vmatpush1.bf16.msra.mxu0 %v2645_v27  ;;  %v2726_v27 = vld [vmem:[#allocation10 + $0x98] sm:$0xff]  }
 0x196   :  { %722 = vmatprep.subr.bf16.mxu0 %v2646_v28  ;;  %v2727_v28 = vld [vmem:[#allocation10 + $0xe0] sm:$0xff]   ;;  %2501 = vmatpush3.bf16.msra.mxu1 %v2726_v27 }
 0x197   :  { %2502 = vmatprep.subr.bf16.mxu1 %v2727_v28  ;;  %v2744_v28 = vld [vmem:[#allocation16 + $0x8] sm:$0xff]  }
 0x199   :  { %723 = vmatpush1.bf16.msra.mxu0 %v2648_v29  ;;  %v2728_v29 = vld [vmem:[#allocation10 + $0xa0] sm:$0xff]  }
 0x19a   :  { %724 = vmatprep.subr.bf16.mxu0 %v2649_v30  ;;  %v2729_v30 = vld [vmem:[#allocation10 + $0xe8] sm:$0xff]   ;;  %2503 = vmatpush3.bf16.msra.mxu1 %v2728_v29  ;;  %v2358_v29 = vld [vmem:[#allocation14] ss:$0 sm:$0xff] }
 0x19b   :  { %2504 = vmatprep.subr.bf16.mxu1 %v2729_v30 }
 0x19d   :  { %725 = vmatpush1.bf16.msra.mxu0 %v2651_v31  ;;  %v2730_v31 = vld [vmem:[#allocation10 + $0xa8] sm:$0xff]  }
 0x19e   :  { %726 = vmatprep.subr.bf16.mxu0 %v2652_v32  ;;  %2505 = vmatpush3.bf16.msra.mxu1 %v2730_v31  ;;  %v2731_v32 = vld [vmem:[#allocation10 + $0xf0] sm:$0xff]  }
 0x19f   :  { %2506 = vmatprep.subr.bf16.mxu1 %v2731_v32 }
 0x1a1   :  { %727 = vmatpush1.bf16.msra.mxu0 %v2654_v33  ;;  %v2732_v33 = vld [vmem:[#allocation10 + $0xb0] sm:$0xff]  }
 0x1a2   :  { %737 = vmatprep.subr.bf16.mxu0 %v2657_v35  ;;  %2507 = vmatpush3.bf16.msra.mxu1 %v2732_v33  ;;  %v2734_v35 = vld [vmem:[#allocation10 + $0xb8] sm:$0xff]  }
 0x1a3   :  { %2508 = vmatprep.subr.bf16.mxu1 %v2733_v34 }
 0x1a4   :  { %729 = vmatmul.mubr.bf16.vlgmr.msra.gmra.mrb[0].mxu0 %v3737_v37 }
 0x1a5   :  { %738 = vmatpush1.bf16.msra.mxu0 %v2655_v36  ;;  %769 = vmatprep.mubr.bf16.mxu0 %v289_v14  ;;  %v2713_v14 = vld [vmem:[#allocation10 + $0x68] sm:$0xff]   ;;  %v356_v36 = vlaneseq }
 0x1a6   :  { %739 = vmatprep.subr.bf16.mxu0 %v2660_v38  ;;  %2509 = vmatpush3.bf16.msra.mxu1 %v2734_v35 }
 0x1a9   :  { %740 = vmatpush1.bf16.msra.mxu0 %v2658_v39  ;;  %v354_v39 = vld [vmem:[#allocation8] sm:$0xf] }
 0x1aa   :  { %741 = vmatprep.subr.bf16.mxu0 %v2663_v40 }
 0x1ad   :  { %742 = vmatpush1.bf16.msra.mxu0 %v2661_v41 }
 0x1ae   :  { %743 = vmatprep.subr.bf16.mxu0 %v2666_v42 }
 0x1b1   :  { %744 = vmatpush1.bf16.msra.mxu0 %v2664_v43 }
 0x1b2   :  { %745 = vmatprep.subr.bf16.mxu0 %v2669_v44 }
 0x1b5   :  { %746 = vmatpush1.bf16.msra.mxu0 %v2667_v45 }
 0x1b6   :  { %747 = vmatprep.subr.bf16.mxu0 %v2672_v46 }
 0x1b9   :  { %748 = vmatpush1.bf16.msra.mxu0 %v2670_v47 }
 0x1ba   :  { %749 = vmatprep.subr.bf16.mxu0 %v2675_v48 }
 0x1bd   :  { %750 = vmatpush1.bf16.msra.mxu0 %v2673_v49 }
 0x1be   :  { %751 = vmatprep.subr.bf16.mxu0 %v2678_v50 }
 0x1c1   :  { %752 = vmatpush1.bf16.msra.mxu0 %v2676_v51 }
 0x1c2   :  { %753 = vmatprep.subr.bf16.mxu0 %v2681_v52 }
 0x1c5   :  { %754 = vmatpush1.bf16.msra.mxu0 %v2679_v53 }
 0x1c6   :  { %755 = vmatprep.subr.bf16.mxu0 %v2684_v54 }
 0x1c9   :  { %756 = vmatpush1.bf16.msra.mxu0 %v2682_v55 }
 0x1ca   :  { %757 = vmatprep.subr.bf16.mxu0 %v2687_v56 }
 0x1cd   :  { %758 = vmatpush1.bf16.msra.mxu0 %v2685_v57 }
 0x1ce   :  { %759 = vmatprep.subr.bf16.mxu0 %v2690_v58 }
 0x1d1   :  { %760 = vmatpush1.bf16.msra.mxu0 %v2688_v59 }
 0x1d2   :  { %761 = vmatprep.subr.bf16.mxu0 %v2693_v60 }
 0x1d5   :  { %762 = vmatpush1.bf16.msra.mxu0 %v2691_v61 }
 0x1d6   :  { %763 = vmatprep.subr.bf16.mxu0 %v2696_v62 }
 0x1d9   :  { %764 = vmatpush1.bf16.msra.mxu0 %v2694_v63 }
 0x1da   :  { %765 = vmatprep.subr.bf16.mxu0 %v2699_v0 }
 0x1dd   :  { %766 = vmatpush1.bf16.msra.mxu0 %v2697_v1 }
 0x1de   :  { %767 = vmatprep.subr.bf16.mxu0 %v2702_v2 }
 0x1e1   :  { %768 = vmatpush1.bf16.msra.mxu0 %v2700_v3  ;;  %v2735_v3 = vld [vmem:[#allocation13] sm:$0xff]  }
 0x1e2   :  { %2472 = vmatprep.subr.bf16.mxu0 %v2703_v4  ;;  %v3389_v4 = vmov 0.0  }
 0x1e3   :  { %2551 = vmatprep.subr.bf16.mxu1 %v3389_v4 }
 0x1e4   :  { %770 = vmatmul.mubr.bf16.vlgmr.msra.gmra.mrb[4].mxu0 %v3737_v37  ;;  %v3741_v37 = vshrl.u32 %v356_v36, 7 }
 0x1e5   :  { %2473 = vmatpush3.bf16.msra.mxu0 %v2704_v5  ;;  %v2736_v5 = vld [vmem:[#allocation13 + $0x8] sm:$0xff]  }
 0x1e6   :  { %2474 = vmatprep.subr.bf16.mxu0 %v2705_v6  ;;  %v3744_v38 = vsub.s32 0, %v3741_v37  ;;  %v3747_v40 = vsub.s32 1, %v3741_v37  ;;  %v366_v53 = vsub.s32 2, %v3741_v37  ;;  %v370_v54 = vsub.s32 3, %v3741_v37  ;;  %v2737_v6 = vld [vmem:[#allocation13 + $0x10] sm:$0xff]  }
 0x1e8   :  { %v359_v41 = vrot.slane %v354_v39, %v3744_v38  ;;  %v363_v42 = vrot.slane %v354_v39, %v3747_v40  ;;  %v367_v55 = vrot.slane %v354_v39, %v366_v53  ;;  %v371_v56 = vrot.slane %v354_v39, %v370_v54  ;;  %v2367_v39 = vld [vmem:[#allocation17] ss:$0 sm:$0xff] }
 0x1e9   :  { %2475 = vmatpush3.bf16.msra.mxu0 %v2706_v7  ;;  %v2738_v7 = vld [vmem:[#allocation13 + $0x18] sm:$0xff]  }
 0x1ea   :  { %2476 = vmatprep.subr.bf16.mxu0 %v2707_v8  ;;  %v2739_v8 = vld [vmem:[#allocation13 + $0x20] sm:$0xff]  }
 0x1ed   :  { %2477 = vmatpush3.bf16.msra.mxu0 %v2708_v9  ;;  %v2740_v9 = vld [vmem:[#allocation13 + $0x28] sm:$0xff]  }
 0x1ee   :  { %2478 = vmatprep.subr.bf16.mxu0 %v2709_v10  ;;  %v2741_v10 = vld [vmem:[#allocation13 + $0x30] sm:$0xff]  }
 0x1f1   :  { %2479 = vmatpush3.bf16.msra.mxu0 %v2710_v11  ;;  %v2742_v11 = vld [vmem:[#allocation13 + $0x38] sm:$0xff]  }
 0x1f2   :  { %2480 = vmatprep.subr.bf16.mxu0 %v2711_v12  ;;  %v2743_v12 = vld [vmem:[#allocation16] sm:$0xff]  }
 0x1f5   :  { %2481 = vmatpush3.bf16.msra.mxu0 %v2712_v13 }
 0x1f6   :  { %2482 = vmatprep.subr.bf16.mxu0 %v2713_v14 }
 0x1f9   :  { %2483 = vmatpush3.bf16.msra.mxu0 %v2714_v15 }
 0x1fa   :  { %2484 = vmatprep.subr.bf16.mxu0 %v2715_v16 }
 0x1fd   :  { %2485 = vmatpush3.bf16.msra.mxu0 %v2716_v17 }
 0x1fe   :  { %2486 = vmatprep.subr.bf16.mxu0 %v2717_v18  ;;  %v2325_v18 = vld [vmem:[#allocation11] ss:$0 sm:$0xff] }
 0x201   :  { %2487 = vmatpush3.bf16.msra.mxu0 %v2718_v19 }
 0x202   :  { %2531 = vmatprep.subr.bf16.mxu0 %v3389_v4 }
 0x277   :  { %v730_v43 = vpop.f32.mrb[0].mxu0 }
 0x278   :  { %v731_v44 = vadd.f32 %v730_v43, %v359_v41  ;;  %v732_v45 = vpop.f32.mrb[1].mxu0 }
 0x279   :  { %v733_v46 = vadd.f32 %v732_v45, %v363_v42  ;;  %v734_v47 = vpop.f32.mrb[2].mxu0 }
 0x27a   :  { %v778_v48 = vmax.f32 %v731_v44, 0.0  ;;  %v735_v49 = vpop.f32.mrb[3].mxu0 }
 0x27b   :  { %v779_v50 = vmax.f32 %v733_v46, 0.0  ;;  %v3392_v49 = vmov 0  }
 0x27c   :  { %v782_v51 = vpack.c.bf16 %v778_v48, %v778_v48  ;;  %v3391_v48 = vmov 1   ;;  %2604 = vset.pattern.permute.xlu0 %v3392_v49 }
 0x27d   :  { %v783_v52 = vpack.c.bf16 %v779_v50, %v779_v50  ;;  %2605 = vset.pattern.permute.xlu1 %v3391_v48 }
 0x27f   :  { %1081 = vmatprep.mubr.bf16.mxu0 %v783_v52 }
 0x280   :  { %1082 = vmatmul.mubr.bf16.vlgmr.msra.gmra.mrb[8].mxu0 %v782_v51  ;;  %v1314_v51 = vld [vmem:[#allocation5] sm:$0xff] }
 0x281   :  { %2532 = vmatpush3.bf16.msra.mxu0 %v2735_v3  ;;  %2547 = vmatprep.mubr.msk.bf16.mxu0 %vm3390_vm0, %v3389_v4  ;;  %v2768_v3 = vld [vmem:[#allocation25 + $0x68] ss:$16 sps:$4 sm:$0xff]  }
 0x282   :  { %2533 = vmatprep.subr.bf16.mxu0 %v3389_v4 }
 0x285   :  { %2534 = vmatpush3.bf16.msra.mxu0 %v2736_v5  ;;  %v2774_v5 = vld [vmem:[#allocation25 + $0x88] ss:$16 sps:$4 sm:$0xff]  }
 0x286   :  { %2535 = vmatprep.subr.bf16.mxu0 %v3389_v4 }
 0x289   :  { %2536 = vmatpush3.bf16.msra.mxu0 %v2737_v6  ;;  %v2782_v6 = vld [vmem:[#allocation25 + $0xac] ss:$16 sps:$4 sm:$0xff]  }
 0x28a   :  { %2537 = vmatprep.subr.bf16.mxu0 %v3389_v4 }
 0x28d   :  { %2538 = vmatpush3.bf16.msra.mxu0 %v2738_v7  ;;  %v2780_v7 = vld [vmem:[#allocation25 + $0xa8] ss:$16 sps:$4 sm:$0xff]  }
 0x28e   :  { %2539 = vmatprep.subr.bf16.mxu0 %v3389_v4 }
 0x291   :  { %2540 = vmatpush3.bf16.msra.mxu0 %v2739_v8  ;;  %v2788_v8 = vld [vmem:[#allocation25 + $0xcc] ss:$16 sps:$4 sm:$0xff]  }
 0x292   :  { %2541 = vmatprep.subr.bf16.mxu0 %v3389_v4 }
 0x295   :  { %2542 = vmatpush3.bf16.msra.mxu0 %v2740_v9  ;;  %v2786_v9 = vld [vmem:[#allocation25 + $0xc8] ss:$16 sps:$4 sm:$0xff]  }
 0x296   :  { %2543 = vmatprep.subr.bf16.mxu0 %v3389_v4 }
 0x299   :  { %2544 = vmatpush3.bf16.msra.mxu0 %v2741_v10  ;;  %v1321_v10 = vld [vmem:[#allocation19] sm:$0x3] }
 0x29a   :  { %2545 = vmatprep.subr.bf16.mxu0 %v3389_v4 }
 0x29d   :  { %2546 = vmatpush3.bf16.msra.mxu0 %v2742_v11  ;;  %v1339_v11 = vrot.slane %v1321_v10, %v3747_v40 }
 0x2b7   :  { %v771_v57 = vpop.f32.mrb[4].mxu0 }
 0x2b8   :  { %v772_v58 = vadd.f32 %v771_v57, %v367_v55  ;;  %v773_v59 = vpop.f32.mrb[5].mxu0  ;;  %v2745_v57 = vld [vmem:[#allocation22] sm:$0xff]  }
 0x2b9   :  { %v774_v60 = vadd.f32 %v773_v59, %v371_v56  ;;  %v775_v61 = vpop.f32.mrb[6].mxu0  ;;  %v2749_v59 = vld [vmem:[#allocation25 + $0x4] ss:$16 sps:$4 sm:$0xff]  }
 0x2ba   :  { %v780_v62 = vmax.f32 %v772_v58, 0.0  ;;  %v776_v63 = vpop.f32.mrb[7].mxu0  ;;  %v2746_v58 = vld [vmem:[#allocation22 + $0x8] sm:$0xff]  }
 0x2bb   :  { %v781_v0 = vmax.f32 %v774_v60, 0.0  ;;  %v2750_v60 = vld [vmem:[#allocation25 + $0x8] ss:$16 sps:$4 sm:$0xff]   ;;  %v2752_v61 = vld [vmem:[#allocation25 + $0xc] ss:$16 sps:$4 sm:$0xff]  }
 0x2bc   :  { %v784_v2 = vpack.c.bf16 %v780_v62, %v780_v62  ;;  %v2758_v62 = vld [vmem:[#allocation25 + $0x2c] ss:$16 sps:$4 sm:$0xff]   ;;  %1675 = vmatprep.subr.bf16.mxu0 %v2752_v61  ;;  %v2756_v63 = vld [vmem:[#allocation25 + $0x28] ss:$16 sps:$4 sm:$0xff]  }
 0x2bd   :  { %v785_v1 = vpack.c.bf16 %v781_v0, %v781_v0  ;;  %v2764_v0 = vld [vmem:[#allocation25 + $0x4c] ss:$16 sps:$4 sm:$0xff]   ;;  %v2806_v61 = vld [vmem:[#allocation28 + $0x34] ss:$8 sps:$4 sm:$0xff]  }
 0x2bf   :  { %1121 = vmatprep.mubr.bf16.mxu1 %v785_v1  ;;  %v2762_v1 = vld [vmem:[#allocation25 + $0x48] ss:$16 sps:$4 sm:$0xff]  }
 0x2c0   :  { %1122 = vmatmul.mubr.bf16.vlgmr.msra.gmra.mrb[0].mxu1 %v784_v2  ;;  %v2770_v2 = vld [vmem:[#allocation25 + $0x6c] ss:$16 sps:$4 sm:$0xff]  }
 0x2c1   :  { %2555 = vmatprep.mubr.msk.bf16.mxu1 %vm3390_vm0, %v3389_v4  ;;  %2552 = vmatpush3.bf16.msra.mxu1 %v2743_v12  ;;  %v1330_v12 = vrot.slane %v1321_v10, %v3744_v38  ;;  %v2822_v10 = vld [vmem:[#allocation28 + $0x90] ss:$8 sps:$4 sm:$0xff]  }
 0x2c2   :  { %2553 = vmatprep.subr.bf16.mxu1 %v3389_v4 }
 0x2c5   :  { %2554 = vmatpush3.bf16.msra.mxu1 %v2744_v28  ;;  %v2761_v28 = vld [vmem:[#allocation25 + $0x44] ss:$16 sps:$4 sm:$0xff]  }
 0x2c6   :  { %2559 = vmatprep.subr.bf16.mxu1 %v3389_v4 }
 0x353   :  { %v2488_v13 = vpop.f32.mrb[8].mxu0 }
 0x354   :  { %v2489_v14 = vpop.f32.mrb[9].mxu0 }
 0x355   :  { %v2490_v15 = vadd.f32 %v2489_v14, %v2488_v13  ;;  %v2491_v16 = vpop.f32.mrb[10].mxu0 }
 0x356   :  { %v2492_v17 = vpop.f32.mrb[11].mxu0 }
 0x357   :  { %v1084_v21 = vadd.f32 %v2490_v15, %v2325_v18  ;;  %v2371_v17 = vld [vmem:[#allocation20] ss:$0 sm:$0xff] }
 0x393   :  { %v2510_v19 = vpop.f32.mrb[0].mxu1 }
 0x394   :  { %v2511_v20 = vpop.f32.mrb[1].mxu1 }
 0x395   :  { %v2512_v22 = vadd.f32 %v2511_v20, %v2510_v19  ;;  %v2513_v23 = vpop.f32.mrb[2].mxu1 }
 0x396   :  { %v2514_v24 = vpop.f32.mrb[3].mxu1 }
 0x397   :  { %v1124_v25 = vadd.f32 %v2512_v22, %v1084_v21  ;;  %v2747_v24 = vld [vmem:[#allocation25] ss:$16 sps:$4 sm:$0xff]  }
 0x399   :  { %v1129_v26 = vmax.f32 %v1124_v25, 0.0 }
 0x39b   :  { %v1130_v27 = vpack.c.bf16 %v1129_v26, %v1129_v26  ;;  %v2755_v26 = vld [vmem:[#allocation25 + $0x24] ss:$16 sps:$4 sm:$0xff]  }
 0x39d   :  { %2548 = vmatmul.mubr.bf16.vlgmr.msra.gmra.mrb[12].mxu0 %v1130_v27  ;;  %v2753_v27 = vld [vmem:[#allocation25 + $0x20] ss:$16 sps:$4 sm:$0xff]  }
 0x39e   :  { %1707 = vmatprep.mubr.bf16.mxu0 %v3392_v49  ;;  %1676 = vmatpush1.bf16.msra.mxu0 %v2750_v60  ;;  %v2801_v60 = vld [vmem:[#allocation28 + $0x20] ss:$8 sps:$4 sm:$0xff]  }
 0x39f   :  { %1677 = vmatprep.subr.bf16.mxu0 %v2758_v62  ;;  %v2804_v62 = vld [vmem:[#allocation28 + $0x30] ss:$8 sps:$4 sm:$0xff]  }
 0x3a2   :  { %1678 = vmatpush1.bf16.msra.mxu0 %v2756_v63  ;;  %v2809_v63 = vld [vmem:[#allocation28 + $0x44] ss:$8 sps:$4 sm:$0xff]  }
 0x3a3   :  { %1679 = vmatprep.subr.bf16.mxu0 %v2764_v0  ;;  %v2807_v0 = vld [vmem:[#allocation28 + $0x40] ss:$8 sps:$4 sm:$0xff]  }
 0x3a6   :  { %1680 = vmatpush1.bf16.msra.mxu0 %v2762_v1  ;;  %v2812_v1 = vld [vmem:[#allocation28 + $0x54] ss:$8 sps:$4 sm:$0xff]  }
 0x3a7   :  { %1681 = vmatprep.subr.bf16.mxu0 %v2770_v2  ;;  %v2810_v2 = vld [vmem:[#allocation28 + $0x50] ss:$8 sps:$4 sm:$0xff]  }
 0x3aa   :  { %1682 = vmatpush1.bf16.msra.mxu0 %v2768_v3  ;;  %v2815_v3 = vld [vmem:[#allocation28 + $0x64] ss:$8 sps:$4 sm:$0xff]  }
 0x470   :  { %v1236_v30 = vpop.f32.mrb[12].mxu0 }
 0x471   :  { %v1237_v31 = vadd.f32 %v2358_v29, %v1236_v30  ;;  %v2549_v32 = vpop.f32.mrb[13].mxu0  ;;  %v2759_v29 = vld [vmem:[#allocation25 + $0x40] ss:$16 sps:$4 sm:$0xff]   ;;  %v2767_v30 = vld [vmem:[#allocation25 + $0x64] ss:$16 sps:$4 sm:$0xff]  }
 0x472   :  { %v1239_v33 = vpop.f32.mrb[14].mxu0  ;;  %v2773_v32 = vld [vmem:[#allocation25 + $0x84] ss:$16 sps:$4 sm:$0xff]  }
 0x473   :  { %v1242_v34 = vmax.f32 %v1237_v31, 0.0  ;;  %v2550_v35 = vpop.f32.mrb[15].mxu0  ;;  %v2765_v31 = vld [vmem:[#allocation25 + $0x60] ss:$16 sps:$4 sm:$0xff]  }
 0x474   :  { %v2771_v33 = vld [vmem:[#allocation25 + $0x80] ss:$16 sps:$4 sm:$0xff]  }
 0x475   :  { %v1243_v36 = vpack.c.bf16 %v1242_v34, %v1242_v34  ;;  %v2779_v34 = vld [vmem:[#allocation25 + $0xa4] ss:$16 sps:$4 sm:$0xff]   ;;  %v2777_v35 = vld [vmem:[#allocation25 + $0xa0] ss:$16 sps:$4 sm:$0xff]  }
 0x477   :  { %2556 = vmatmul.mubr.msk.bf16.vlgmr.msra.gmra.mrb[4].mxu1 %vm1267_vm1, %v1243_v36  ;;  %v2785_v36 = vld [vmem:[#allocation25 + $0xc4] ss:$16 sps:$4 sm:$0xff]  }
 0x478   :  { %2563 = vmatprep.mubr.msk.bf16.mxu1 %vm3390_vm0, %v3389_v4  ;;  %2560 = vmatpush3.bf16.msra.mxu1 %v2745_v57  ;;  %v2800_v57 = vld [vmem:[#allocation28 + $0x14] ss:$8 sps:$4 sm:$0xff]  }
 0x479   :  { %2561 = vmatprep.subr.bf16.mxu1 %v3389_v4  ;;  %v2776_v4 = vld [vmem:[#allocation25 + $0x8c] ss:$16 sps:$4 sm:$0xff]  }
 0x47a   :  { %1683 = vmatprep.subr.bf16.mxu0 %v2776_v4  ;;  %v2813_v4 = vld [vmem:[#allocation28 + $0x60] ss:$8 sps:$4 sm:$0xff]  }
 0x47b   :  { %1684 = vmatpush1.bf16.msra.mxu0 %v2774_v5  ;;  %v2818_v5 = vld [vmem:[#allocation28 + $0x74] ss:$8 sps:$4 sm:$0xff]  }
 0x47c   :  { %2562 = vmatpush3.bf16.msra.mxu1 %v2746_v58  ;;  %1685 = vmatprep.subr.bf16.mxu0 %v2782_v6  ;;  %v2798_v58 = vld [vmem:[#allocation28 + $0x10] ss:$8 sps:$4 sm:$0xff]  }
 0x47d   :  { %1634 = vmatprep.subr.bf16.mxu1 %v2749_v59  ;;  %v2803_v59 = vld [vmem:[#allocation28 + $0x24] ss:$8 sps:$4 sm:$0xff]   ;;  %v2816_v6 = vld [vmem:[#allocation28 + $0x70] ss:$8 sps:$4 sm:$0xff]  }
 0x47f   :  { %1686 = vmatpush1.bf16.msra.mxu0 %v2780_v7  ;;  %v2821_v7 = vld [vmem:[#allocation28 + $0x84] ss:$8 sps:$4 sm:$0xff]  }
 0x480   :  { %1687 = vmatprep.subr.bf16.mxu0 %v2788_v8  ;;  %v2819_v8 = vld [vmem:[#allocation28 + $0x80] ss:$8 sps:$4 sm:$0xff]  }
 0x483   :  { %1688 = vmatpush1.bf16.msra.mxu0 %v2786_v9  ;;  %v2824_v9 = vld [vmem:[#allocation28 + $0x94] ss:$8 sps:$4 sm:$0xff]  }
 0x54a   :  { %v1305_v41 = vpop.f32.mrb[4].mxu1 }
 0x54b   :  { %v3775_v42 = vadd.f32 %v2367_v39, %v1305_v41  ;;  %v2557_v43 = vpop.f32.mrb[5].mxu1  ;;  %v2783_v39 = vld [vmem:[#allocation25 + $0xc0] ss:$16 sps:$4 sm:$0xff]   ;;  %v2791_v41 = vld [vmem:[#allocation25 + $0xe4] ss:$16 sps:$4 sm:$0xff]  }
 0x54c   :  { %v1308_v44 = vpop.f32.mrb[6].mxu1  ;;  %v2789_v43 = vld [vmem:[#allocation25 + $0xe0] ss:$16 sps:$4 sm:$0xff]  }
 0x54d   :  { %v1311_v45 = vmul.f32 0.5, %v3775_v42  ;;  %v2558_v46 = vpop.f32.mrb[7].mxu1  ;;  %v2792_v44 = vld [vmem:[#allocation25 + $0xe8] ss:$16 sps:$4 sm:$0xff]  }
 0x54e   :  { %v2372_v46 = vld [vmem:[#allocation23] ss:$0 sm:$0xff] }
 0x54f   :  { %v1312_v47 = vmul.f32 1.442695, %v1311_v45  ;;  %v2797_v45 = vld [vmem:[#allocation28 + $0x4] ss:$8 sps:$4 sm:$0xff]  }
 0x551   :  { %2891 = vpow2.f32 %v1312_v47 }
 0x55b   :  { %v2892_v50 = vpop.eup %2891 }
 0x55c   :  { %1316 = vrot.lane.b32.xlu0 %v2892_v50, %s3393_s17 }
 0x5ce   :  { %v1317_v52 = vpop.permute.xlu0 %1316 }
 0x5cf   :  { %v1319_v55 = vmul.f32 %v1317_v52, %v1314_v51 }
 0x5d1   :  { %v1320_v56 = vadd.f32 %v1319_v55, %v3775_v42  ;;  %v2795_v55 = vld [vmem:[#allocation28] ss:$8 sps:$4 sm:$0xff]  }
 0x5d3   :  { %1333 = vperm.xlu1 %2605, %v1320_v56   ;;  %1324 = vperm.xlu0 %2604, %v1320_v56  }
 0x5d7   :  { %2214 = vrot.lane.b32.xlu1 %v1320_v56, %s3379_s3  ;;  %2606 = vset.pattern.permute.xlu0 %v3391_v48  ;;  %s3394_s3 = smov [#allocation32]  }
 0x5d8   :  { %s2239_s12 = sshll.u32 %s3394_s3, 4  ;;  %s2240_s12 = int_to_ptr.vmem [resolvable:$true] %s2239_s12 }
 0x5d9   :  { %s3297_s30 = scalar_lea.vmem %s2240_s12, 128  ;;  %p3302_p5 = scmp.lt.s32.totalorder %s2240_s12, %s2240_s12 }
 0x5da   :  { %p3298_p4 = scmp.ne.s32.totalorder %s2240_s12, %s3297_s30  ;;  %p3303_p6 = scmp.lt.s32.totalorder %s3297_s30, %s3297_s30 }
 0x5dc   :  { %p3304_p7 = por %p3303_p6, %p3302_p5 }
 0x5de   :  { %p3305_p8 = pnand %p3304_p7, %p3298_p4 }
 0x652   :  { %v1334_v13 = vpop.permute.xlu1 %1333  ;;  %v1325_v14 = vpop.permute.xlu0 %1324 }
 0x653   :  { %v1340_v15 = vmul.f32 %v1339_v11, %v1334_v13  ;;  %v1331_v16 = vmul.f32 %v1330_v12, %v1325_v14  ;;  %v2827_v11 = vld [vmem:[#allocation28 + $0xa4] ss:$8 sps:$4 sm:$0xff]   ;;  %v2825_v12 = vld [vmem:[#allocation28 + $0xa0] ss:$8 sps:$4 sm:$0xff]   ;;  %v2830_v13 = vld [vmem:[#allocation28 + $0xb4] ss:$8 sps:$4 sm:$0xff]  }
 0x654   :  { %v2828_v14 = vld [vmem:[#allocation28 + $0xb0] ss:$8 sps:$4 sm:$0xff]  }
 0x655   :  { %v1341_v18 = vadd.f32 %v1340_v15, %v1331_v16  ;;  %v2833_v15 = vld [vmem:[#allocation28 + $0xc4] ss:$8 sps:$4 sm:$0xff]   ;;  %v2831_v16 = vld [vmem:[#allocation28 + $0xc0] ss:$8 sps:$4 sm:$0xff]  }
 0x656   :  { %v2215_v19 = vpop.permute.xlu1 %2214 }
 0x657   :  { %v1349_v20 = vadd.f32 %v2371_v17, %v1341_v18  ;;  %v2218_v21 = vsel %vm2217_vm2, %v3775_v42, %v2215_v19  ;;  %v2794_v42 = vld [vmem:[#allocation25 + $0xec] ss:$16 sps:$4 sm:$0xff]   ;;  %v2836_v17 = vld [vmem:[#allocation28 + $0xd4] ss:$8 sps:$4 sm:$0xff]   ;;  %v2839_v19 = vld [vmem:[#allocation28 + $0xe4] ss:$8 sps:$4 sm:$0xff]  }
 0x658   :  { %v2220_v22 = vsel %vm2219_vm3, %v2218_v21, 0.0  ;;  %1689 = vmatprep.subr.bf16.mxu0 %v2794_v42  ;;  %v2834_v18 = vld [vmem:[#allocation28 + $0xd0] ss:$8 sps:$4 sm:$0xff]   ;;  %v2842_v21 = vld [vmem:[#allocation28 + $0xf4] ss:$8 sps:$4 sm:$0xff]  }
 0x659   :  { %v1350_v23 = vmax.f32 %v1349_v20, 0.0  ;;  %2222 = vst.msk [vmem:[#allocation32] sm:$0xff] %vm2221_vm4, %v2220_v22  ;;  %1690 = vmatpush1.bf16.msra.mxu0 %v2792_v44  ;;  %v2837_v20 = vld [vmem:[#allocation28 + $0xe0] ss:$8 sps:$4 sm:$0xff]   ;;  %v2840_v22 = vld [vmem:[#allocation28 + $0xf0] ss:$8 sps:$4 sm:$0xff]  }
 0x65b   :  { %v1351_v25 = vpack.c.bf16 %v1350_v23, %v1350_v23  ;;  %v2845_v23 = vld [vmem:[#allocation28 + $0x104] ss:$8 sps:$4 sm:$0xff]  }
 0x65d   :  { %2564 = vmatmul.mubr.msk.bf16.vlgmr.msra.gmra.mrb[8].mxu1 %vm1267_vm1, %v1351_v25 }
 0x65e   :  { %1635 = vmatpush1.bf16.msra.mxu1 %v2747_v24  ;;  %1666 = vmatprep.mubr.bf16.mxu1 %v3392_v49  ;;  %v3788_v24 = vld [vmem:[#allocation26] sm:$0xf] }
 0x65f   :  { %1636 = vmatprep.subr.bf16.mxu1 %v2755_v26  ;;  %v1457_v25 = vrot.slane %v3788_v24, %v3744_v38  ;;  %v1461_v26 = vrot.slane %v3788_v24, %v3747_v40 }
 0x662   :  { %1637 = vmatpush1.bf16.msra.mxu1 %v2753_v27  ;;  %v1469_v27 = vrot.slane %v3788_v24, %v370_v54 }
 0x663   :  { %1638 = vmatprep.subr.bf16.mxu1 %v2761_v28 }
 0x666   :  { %1639 = vmatpush1.bf16.msra.mxu1 %v2759_v29 }
 0x667   :  { %1640 = vmatprep.subr.bf16.mxu1 %v2767_v30 }
 0x66a   :  { %1641 = vmatpush1.bf16.msra.mxu1 %v2765_v31 }
 0x66b   :  { %1642 = vmatprep.subr.bf16.mxu1 %v2773_v32 }
 0x66e   :  { %1643 = vmatpush1.bf16.msra.mxu1 %v2771_v33 }
 0x66f   :  { %1644 = vmatprep.subr.bf16.mxu1 %v2779_v34 }
 0x672   :  { %1645 = vmatpush1.bf16.msra.mxu1 %v2777_v35 }
 0x673   :  { %1646 = vmatprep.subr.bf16.mxu1 %v2785_v36 }
 0x676   :  { %1647 = vmatpush1.bf16.msra.mxu1 %v2783_v39 }
 0x677   :  { %1648 = vmatprep.subr.bf16.mxu1 %v2791_v41 }
 0x67a   :  { %1649 = vmatpush1.bf16.msra.mxu1 %v2789_v43 }
 0x67b   :  { %2120 = vmatprep.subr.bf16.mxu1 %v2797_v45 }
 0x730   :  { %v1412_v47 = vpop.f32.mrb[8].mxu1 }
 0x731   :  { %v1413_v48 = vadd.f32 %v2372_v46, %v1412_v47  ;;  %v2565_v49 = vpop.f32.mrb[9].mxu1  ;;  %v2843_v46 = vld [vmem:[#allocation28 + $0x100] ss:$8 sps:$4 sm:$0xff]  }
 0x732   :  { %v1415_v50 = vpop.f32.mrb[10].mxu1  ;;  %v2846_v49 = vld [vmem:[#allocation28 + $0x110] ss:$8 sps:$4 sm:$0xff]  }
 0x733   :  { %v1418_v51 = vmax.f32 %v1413_v48, 0.0  ;;  %v2566_v52 = vpop.f32.mrb[11].mxu1  ;;  %v2848_v48 = vld [vmem:[#allocation28 + $0x114] ss:$8 sps:$4 sm:$0xff]   ;;  %v2851_v50 = vld [vmem:[#allocation28 + $0x124] ss:$8 sps:$4 sm:$0xff]  }
 0x734   :  { %v2854_v52 = vld [vmem:[#allocation28 + $0x134] ss:$8 sps:$4 sm:$0xff]  }
 0x735   :  { %v1419_v56 = vpack.c.bf16 %v1418_v51, %v1418_v51  ;;  %v2849_v51 = vld [vmem:[#allocation28 + $0x120] ss:$8 sps:$4 sm:$0xff]  }
 0x737   :  { %1667 = vmatmul.mubr.bf16.vlgmr.msra.gmra.mrb[12].mxu1 %v1419_v56  ;;  %1708 = vmatmul.mubr.bf16.vlgmr.msra.gmra.mrb[16].mxu0 %v1419_v56  ;;  %v2857_v56 = vld [vmem:[#allocation28 + $0x144] ss:$8 sps:$4 sm:$0xff]  }
 0x738   :  { %2121 = vmatpush1.bf16.msra.mxu1 %v2795_v55  ;;  %v2852_v55 = vld [vmem:[#allocation28 + $0x130] ss:$8 sps:$4 sm:$0xff]  }
 0x739   :  { %2122 = vmatprep.subr.bf16.mxu1 %v2800_v57  ;;  %v2855_v57 = vld [vmem:[#allocation28 + $0x140] ss:$8 sps:$4 sm:$0xff]  }
 0x73c   :  { %2123 = vmatpush1.bf16.msra.mxu1 %v2798_v58  ;;  %v2860_v58 = vld [vmem:[#allocation28 + $0x154] ss:$8 sps:$4 sm:$0xff]  }
 0x73d   :  { %2124 = vmatprep.subr.bf16.mxu1 %v2803_v59  ;;  %v2858_v59 = vld [vmem:[#allocation28 + $0x150] ss:$8 sps:$4 sm:$0xff]  }
 0x740   :  { %2125 = vmatpush1.bf16.msra.mxu1 %v2801_v60  ;;  %v2863_v60 = vld [vmem:[#allocation28 + $0x164] ss:$8 sps:$4 sm:$0xff]  }
 0x741   :  { %2126 = vmatprep.subr.bf16.mxu1 %v2806_v61  ;;  %v2861_v61 = vld [vmem:[#allocation28 + $0x160] ss:$8 sps:$4 sm:$0xff]  }
 0x744   :  { %2127 = vmatpush1.bf16.msra.mxu1 %v2804_v62  ;;  %v2866_v62 = vld [vmem:[#allocation28 + $0x174] ss:$8 sps:$4 sm:$0xff]  }
 0x745   :  { %2128 = vmatprep.subr.bf16.mxu1 %v2809_v63  ;;  %v2864_v63 = vld [vmem:[#allocation28 + $0x170] ss:$8 sps:$4 sm:$0xff]  }
 0x748   :  { %2129 = vmatpush1.bf16.msra.mxu1 %v2807_v0  ;;  %v2869_v0 = vld [vmem:[#allocation28 + $0x184] ss:$8 sps:$4 sm:$0xff]  }
 0x749   :  { %2130 = vmatprep.subr.bf16.mxu1 %v2812_v1  ;;  %v2867_v1 = vld [vmem:[#allocation28 + $0x180] ss:$8 sps:$4 sm:$0xff]  }
 0x74c   :  { %2131 = vmatpush1.bf16.msra.mxu1 %v2810_v2  ;;  %v2872_v2 = vld [vmem:[#allocation28 + $0x194] ss:$8 sps:$4 sm:$0xff]  }
 0x74d   :  { %2132 = vmatprep.subr.bf16.mxu1 %v2815_v3  ;;  %v2870_v3 = vld [vmem:[#allocation28 + $0x190] ss:$8 sps:$4 sm:$0xff]  }
 0x750   :  { %2133 = vmatpush1.bf16.msra.mxu1 %v2813_v4  ;;  %v2875_v4 = vld [vmem:[#allocation28 + $0x1a4] ss:$8 sps:$4 sm:$0xff]  }
 0x751   :  { %2134 = vmatprep.subr.bf16.mxu1 %v2818_v5  ;;  %v2873_v5 = vld [vmem:[#allocation28 + $0x1a0] ss:$8 sps:$4 sm:$0xff]  }
 0x754   :  { %2135 = vmatpush1.bf16.msra.mxu1 %v2816_v6  ;;  %v2878_v6 = vld [vmem:[#allocation28 + $0x1b4] ss:$8 sps:$4 sm:$0xff]  }
 0x755   :  { %2136 = vmatprep.subr.bf16.mxu1 %v2821_v7  ;;  %v2876_v7 = vld [vmem:[#allocation28 + $0x1b0] ss:$8 sps:$4 sm:$0xff]  }
 0x758   :  { %2137 = vmatpush1.bf16.msra.mxu1 %v2819_v8  ;;  %v2881_v8 = vld [vmem:[#allocation28 + $0x1c4] ss:$8 sps:$4 sm:$0xff]  }
 0x759   :  { %2138 = vmatprep.subr.bf16.mxu1 %v2824_v9  ;;  %v2879_v9 = vld [vmem:[#allocation28 + $0x1c0] ss:$8 sps:$4 sm:$0xff]  }
 0x75c   :  { %2139 = vmatpush1.bf16.msra.mxu1 %v2822_v10  ;;  %v2884_v10 = vld [vmem:[#allocation28 + $0x1d4] ss:$8 sps:$4 sm:$0xff]  }
 0x75d   :  { %2140 = vmatprep.subr.bf16.mxu1 %v2827_v11  ;;  %v2882_v11 = vld [vmem:[#allocation28 + $0x1d0] ss:$8 sps:$4 sm:$0xff]  }
 0x760   :  { %2141 = vmatpush1.bf16.msra.mxu1 %v2825_v12  ;;  %v1465_v12 = vrot.slane %v3788_v24, %v366_v53 }
 0x761   :  { %2142 = vmatprep.subr.bf16.mxu1 %v2830_v13  ;;  %v2887_v13 = vld [vmem:[#allocation28 + $0x1e4] ss:$8 sps:$4 sm:$0xff]  }
 0x764   :  { %2143 = vmatpush1.bf16.msra.mxu1 %v2828_v14  ;;  %v2885_v14 = vld [vmem:[#allocation28 + $0x1e0] ss:$8 sps:$4 sm:$0xff]  }
 0x765   :  { %2144 = vmatprep.subr.bf16.mxu1 %v2833_v15 }
 0x768   :  { %2145 = vmatpush1.bf16.msra.mxu1 %v2831_v16  ;;  %v2890_v16 = vld [vmem:[#allocation28 + $0x1f4] ss:$8 sps:$4 sm:$0xff]  }
 0x769   :  { %2146 = vmatprep.subr.bf16.mxu1 %v2836_v17  ;;  %v2888_v17 = vld [vmem:[#allocation28 + $0x1f0] ss:$8 sps:$4 sm:$0xff]  }
 0x76c   :  { %2147 = vmatpush1.bf16.msra.mxu1 %v2834_v18 }
 0x76d   :  { %2148 = vmatprep.subr.bf16.mxu1 %v2839_v19 }
 0x770   :  { %2149 = vmatpush1.bf16.msra.mxu1 %v2837_v20 }
 0x771   :  { %2150 = vmatprep.subr.bf16.mxu1 %v2842_v21 }
 0x774   :  { %2151 = vmatpush1.bf16.msra.mxu1 %v2840_v22 }
 0x775   :  { %2161 = vmatprep.subr.bf16.mxu1 %v2845_v23 }
 0x80a   :  { %v1668_v28 = vpop.f32.mrb[12].mxu1  ;;  %v3797_v29 = vpop.f32.mrb[16].mxu0 }
 0x80b   :  { %v1669_v30 = vadd.f32 %v1668_v28, %v1457_v25  ;;  %v1670_v31 = vpop.f32.mrb[13].mxu1  ;;  %v1711_v32 = vpop.f32.mrb[17].mxu0  ;;  %v1710_v15 = vadd.f32 %v3797_v29, %v1465_v12 }
 0x80c   :  { %v1671_v33 = vadd.f32 %v1670_v31, %v1461_v26  ;;  %v1712_v34 = vadd.f32 %v1711_v32, %v1469_v27  ;;  %v1672_v35 = vpop.f32.mrb[14].mxu1  ;;  %v1713_v36 = vpop.f32.mrb[18].mxu0 }
 0x80d   :  { %v1716_v39 = vmax.f32 %v1669_v30, 0.0  ;;  %v1673_v41 = vpop.f32.mrb[15].mxu1  ;;  %v1714_v42 = vpop.f32.mrb[19].mxu0  ;;  %v1718_v18 = vmax.f32 %v1710_v15, 0.0 }
 0x80e   :  { %v1717_v43 = vmax.f32 %v1671_v33, 0.0  ;;  %v1719_v44 = vmax.f32 %v1712_v34, 0.0 }
 0x80f   :  { %v1720_v47 = vpack.c.bf16 %v1716_v39, %v1716_v39  ;;  %v1722_v19 = vpack.c.bf16 %v1718_v18, %v1718_v18 }
 0x810   :  { %v1721_v45 = vpack.c.bf16 %v1717_v43, %v1717_v43  ;;  %v1723_v54 = vpack.c.bf16 %v1719_v44, %v1719_v44 }
 0x812   :  { %2152 = vmatprep.mubr.bf16.mxu1 %v1721_v45 }
 0x813   :  { %2153 = vmatmul.mubr.bf16.vlgmr.msra.gmra.mrb[16].mxu1 %v1720_v47 }
 0x814   :  { %2162 = vmatpush1.bf16.msra.mxu1 %v2843_v46  ;;  %2193 = vmatprep.mubr.bf16.mxu1 %v1723_v54 }
 0x815   :  { %2163 = vmatprep.subr.bf16.mxu1 %v2848_v48 }
 0x818   :  { %2164 = vmatpush1.bf16.msra.mxu1 %v2846_v49 }
 0x819   :  { %2165 = vmatprep.subr.bf16.mxu1 %v2851_v50 }
 0x81c   :  { %2166 = vmatpush1.bf16.msra.mxu1 %v2849_v51 }
 0x81d   :  { %2167 = vmatprep.subr.bf16.mxu1 %v2854_v52 }
 0x820   :  { %2168 = vmatpush1.bf16.msra.mxu1 %v2852_v55 }
 0x821   :  { %2169 = vmatprep.subr.bf16.mxu1 %v2857_v56 }
 0x824   :  { %2170 = vmatpush1.bf16.msra.mxu1 %v2855_v57 }
 0x825   :  { %2171 = vmatprep.subr.bf16.mxu1 %v2860_v58 }
 0x828   :  { %2172 = vmatpush1.bf16.msra.mxu1 %v2858_v59 }
 0x829   :  { %2173 = vmatprep.subr.bf16.mxu1 %v2863_v60 }
 0x82c   :  { %2174 = vmatpush1.bf16.msra.mxu1 %v2861_v61 }
 0x82d   :  { %2175 = vmatprep.subr.bf16.mxu1 %v2866_v62 }
 0x830   :  { %2176 = vmatpush1.bf16.msra.mxu1 %v2864_v63 }
 0x831   :  { %2177 = vmatprep.subr.bf16.mxu1 %v2869_v0 }
 0x834   :  { %2178 = vmatpush1.bf16.msra.mxu1 %v2867_v1 }
 0x835   :  { %2179 = vmatprep.subr.bf16.mxu1 %v2872_v2 }
 0x838   :  { %2180 = vmatpush1.bf16.msra.mxu1 %v2870_v3 }
 0x839   :  { %2181 = vmatprep.subr.bf16.mxu1 %v2875_v4 }
 0x83c   :  { %2182 = vmatpush1.bf16.msra.mxu1 %v2873_v5 }
 0x83d   :  { %2183 = vmatprep.subr.bf16.mxu1 %v2878_v6 }
 0x840   :  { %2184 = vmatpush1.bf16.msra.mxu1 %v2876_v7 }
 0x841   :  { %2185 = vmatprep.subr.bf16.mxu1 %v2881_v8 }
 0x844   :  { %2186 = vmatpush1.bf16.msra.mxu1 %v2879_v9 }
 0x845   :  { %2187 = vmatprep.subr.bf16.mxu1 %v2884_v10 }
 0x848   :  { %2188 = vmatpush1.bf16.msra.mxu1 %v2882_v11 }
 0x849   :  { %2189 = vmatprep.subr.bf16.mxu1 %v2887_v13 }
 0x84c   :  { %2190 = vmatpush1.bf16.msra.mxu1 %v2885_v14 }
 0x84d   :  { %2191 = vmatprep.subr.bf16.mxu1 %v2890_v16 }
 0x850   :  { %2192 = vmatpush1.bf16.msra.mxu1 %v2888_v17 }
 0x853   :  { %2194 = vmatmul.mubr.bf16.vlgmr.msra.gmra.mrb[16].mxu1 %v1722_v19 }
 0x854   :  { %3308 = shalt.err (!%p3305_p8)
}
 0x855   :  { %s3309_s29 = scalar_lea.hbm %s3848_s19, 128 }
 0x856   :  { %p3310_p9 = scmp.ne.s32.totalorder %s3848_s19, %s3309_s29  ;;  %p3313_p10 = scmp.lt.u32.totalorder %s3309_s29, %s3848_s19 }
 0x858   :  { %p3315_p11 = pnand %p3313_p10, %p3310_p9 }
 0x85a   :  { %3318 = shalt.err (!%p3315_p11)
}
 0x85b   :  { %2242 = dma.vmem_to_hbm [thread:$0]  %s2240_s12, 128, %s3848_s19, [#allocation33]   ;;  %v1788_v37 = vld [vmem:[#allocation29] sm:$0x3] }
 0x85c   :  { %v1793_v53 = vrot.slane %v1788_v37, %v3744_v38  ;;  %v1797_v20 = vrot.slane %v1788_v37, %v3747_v40  ;;  %s3395_s19 = smov [#allocation31]  }
 0x85d   :  { %s2229_s14 = sshll.u32 %s3395_s19, 4  ;;  %s2230_s14 = int_to_ptr.vmem [resolvable:$true] %s2229_s14 }
 0x85e   :  { %s3319_s28 = scalar_lea.vmem %s2230_s14, 256  ;;  %p3324_p13 = scmp.lt.s32.totalorder %s2230_s14, %s2230_s14 }
 0x85f   :  { %p3320_p12 = scmp.ne.s32.totalorder %s2230_s14, %s3319_s28  ;;  %p3325_p0 = scmp.lt.s32.totalorder %s3319_s28, %s3319_s28 }
 0x861   :  { %p3326_p1 = por %p3325_p0, %p3324_p13 }
 0x863   :  { %p3327_p2 = pnand %p3326_p1, %p3320_p12 }
 0x926   :  { %v2195_v21 = vpop.f32.mrb[16].mxu1 }
 0x927   :  { %v2567_v22 = vadd.f32 %v2195_v21, %v1793_v53  ;;  %v2197_v23 = vpop.f32.mrb[17].mxu1 }
 0x928   :  { %v2568_v24 = vadd.f32 %v2197_v23, %v1797_v20  ;;  %v2199_v25 = vpop.f32.mrb[18].mxu1 }
 0x929   :  { %v2202_v26 = vsub.f32 0.0, %v2567_v22  ;;  %v2200_v27 = vpop.f32.mrb[19].mxu1 }
 0x92a   :  { %v2203_v28 = vsub.f32 0.0, %v2568_v24 }
 0x92b   :  { %v2204_v29 = vmul.f32 1.442695, %v2202_v26 }
 0x92c   :  { %v2206_v30 = vmul.f32 1.442695, %v2203_v28 }
 0x92d   :  { %2893 = vpow2.f32 %v2204_v29 }
 0x92e   :  { %2895 = vpow2.f32 %v2206_v30 }
 0x937   :  { %v2894_v31 = vpop.eup %2893 }
 0x938   :  { %v2896_v32 = vpop.eup %2895  ;;  %v2208_v33 = vadd.f32 1.0, %v2894_v31 }
 0x939   :  { %v2209_v34 = vadd.f32 1.0, %v2896_v32 }
 0x93a   :  { %2897 = vrcp.f32 %v2208_v33 }
 0x93b   :  { %2899 = vrcp.f32 %v2209_v34 }
 0x944   :  { %v2898_v38 = vpop.eup %2897 }
 0x945   :  { %v2900_v40 = vpop.eup %2899  ;;  %2212 = vst [vmem:[#allocation31] sm:$0xff] %v2898_v38 }
 0x946   :  { %2213 = vst [vmem:[#allocation31 + $0x8] sm:$0xff] %v2900_v40 }
 0x947   :  { %3330 = shalt.err (!%p3327_p2)
}
 0x948   :  { %s3331_s1 = scalar_lea.hbm %s3847_s18, 256 }
 0x949   :  { %p3332_p3 = scmp.ne.s32.totalorder %s3847_s18, %s3331_s1  ;;  %p3335_p4 = scmp.lt.u32.totalorder %s3331_s1, %s3847_s18 }
 0x94b   :  { %p3337_p5 = pnand %p3335_p4, %p3332_p3 }
 0x94d   :  { %3340 = shalt.err (!%p3337_p5)
}
 0x94e   :  { %2232 = dma.vmem_to_hbm [thread:$0]  %s2230_s14, 256, %s3847_s18, [#allocation4]  }
 0x94f   :  { %3361 = dma.done.wait [#allocation4], 256  }
 0x950   :  { %3362 = vsyncadd [#allocation4], 4294967040 }
 0x951   :  { %3363 = dma.done.wait [#allocation33], 128  }
 0x952   :  { %3364 = vsyncadd [#allocation33], 4294967168 }
 0x953   :  { %2249 = vsyncpa [#allocation3], 1 }
 0x954   :  { %2250 = vsyncpa [#allocation6], 1 }
 0x955   :  { %2251 = vsyncpa [#allocation9], 1 }
 0x956   :  { %2252 = vsyncpa [#allocation12], 1 }
 0x957   :  { %2253 = vsyncpa [#allocation15], 1 }
 0x958   :  { %2254 = vsyncpa [#allocation18], 1 }
 0x959   :  { %2255 = vsyncpa [#allocation21], 1 }
 0x95a   :  { %2256 = vsyncpa [#allocation24], 1 }
 0x95b   :  { %2257 = vsyncpa [#allocation27], 1 }
 0x95c   :  { %2258 = vsyncpa [#allocation30], 1 }
 0x95d   :  { %2259 = vsyncpa [#allocation4], 1 }
 0x95e   :  { %2260 = vsyncpa [#allocation33], 1 }

</bundles_post_ra>
